<compile_context>
chip_gen: v6e
topology: v6e:2x2x1
jax: 0.10.0
libtpu: 0.0.40
codegen_flags: <defaults>
</compile_context>

<pallas_src>
import functools

import jax
import jax.numpy as jnp
from jax import lax
from jax.experimental import pallas as pl
from jax.experimental.pallas import tpu as pltpu

# ---- problem constants (deterministic, play the role of mesh / eos / IC fn) ----
T_DOMAIN = (0.0, 1.0)          # mesh.t_domain
X_DOMAIN = (0.0, 1.0)          # mesh.x_domain
GAMMA = 1.4                    # ideal-gas eos: E = p/(gamma-1) + 0.5*rho*u^2
UPWIND_ONLY = True

INPUT_SIZE = 2                 # (t, x)
HIDDEN = (32, 32)              # hidden_layers
OUTPUT_SIZE = 3                # state vector [rho, rho*u, E]

_HIGHEST = lax.Precision.HIGHEST


def _round_up(a, b):
    return ((a + b - 1) // b) * b


def _pinn_kernel(x_ref, w1_ref, b1_ref, w2_ref, b2_ref, wh_ref, bh_ref, o_ref):
    # Feature-major: x_ref is (2, TILE); the point dimension is lane-dense.
    xin = x_ref[...]                                   # (2, TILE) f32
    t = xin[0:1, :]                                    # (1, TILE)
    x = xin[1:2, :]                                    # (1, TILE)

    # --- SimplePINN.forward: Linear -> ReLU -> Linear -> ReLU -> head ---
    # Layer 1 on the MXU (K=2 contraction). The kernel is VALU-bound once the
    # tiles are large, and the MXU vex slot is otherwise idle.
    h = jnp.dot(w1_ref[...], xin, precision=_HIGHEST,
                preferred_element_type=jnp.float32) + b1_ref[...]      # (H1, T)
    h = jnp.maximum(h, 0.0)

    h = jnp.dot(w2_ref[...], h, precision=_HIGHEST,
                preferred_element_type=jnp.float32) + b2_ref[...]      # (H2, T)
    h = jnp.maximum(h, 0.0)

    out = jnp.dot(wh_ref[...], h, precision=_HIGHEST,
                  preferred_element_type=jnp.float32) + bh_ref[...]    # (3, T)

    # --- DirichletPINN.overwrite_ics_and_bcs ---
    if UPWIND_ONLY:
        is_ic_or_bc = jnp.logical_or(
            t <= T_DOMAIN[0],
            jnp.logical_or(x <= X_DOMAIN[0], x >= X_DOMAIN[1]))
    else:
        is_ic_or_bc = jnp.logical_or(
            jnp.logical_or(t <= T_DOMAIN[0], t >= T_DOMAIN[1]),
            jnp.logical_or(x <= X_DOMAIN[0], x >= X_DOMAIN[1]))        # (1, T)

    # ic_state_vec_evaluation(input, eos): Sod-shock-tube-like initial condition.
    # u == 0, so rho*u == 0 and E == p/(gamma-1): both are simple lane selects.
    left = x < 0.5                                     # (1, T)
    rho = jnp.where(left, 1.0, 0.125)                  # (1, T)
    energy = jnp.where(left, 1.0 / (GAMMA - 1.0), 0.1 / (GAMMA - 1.0))

    row0 = jnp.where(is_ic_or_bc, rho, out[0:1, :])
    row1 = jnp.where(is_ic_or_bc, 0.0, out[1:2, :])    # rho * u == 0
    row2 = jnp.where(is_ic_or_bc, energy, out[2:3, :])
    o_ref[...] = jnp.concatenate([row0, row1, row2], axis=0)


@functools.partial(jax.jit, static_argnames=("tile_n",))
def dirichlet_pinn_forward(x, params, *, tile_n=8192):
    """x: (N, 2) float32 (any N). Returns (N, OUTPUT_SIZE) float32."""
    w1, b1, w2, b2, wh, bh = params        # PyTorch layout: W (out,in), b (out,)
    n = x.shape[0]
    h1 = w1.shape[0]
    h2 = w2.shape[0]
    nout = wh.shape[0]

    # ---- tile / grid heuristic ------------------------------------------
    # Round any caller tile to a 128-lane multiple and cap it so the per-step
    # footprint stays well inside scoped VMEM on all generations (v5e 16 MiB
    # default -> raised to 32 MiB below; v7x 32 MiB of 64 MiB physical).
    tile_cap = 16384
    tile_req = min(max(128, _round_up(int(tile_n), 128)), tile_cap)
    grid = max(1, pl.cdiv(n, tile_req))
    # v7x shards the single "parallel" axis across 2 TensorCores: keep the step
    # count even whenever there is more than one step (load balance).
    if grid > 1 and grid % 2 == 1:
        grid += 1
    tile = max(128, _round_up(pl.cdiv(n, grid), 128))
    n_pad = grid * tile

    # Single fused pad+transpose HBM pass for the input; padded points are
    # (t, x) = (0, 0) -> IC/BC branch (finite), and are sliced off below.
    xt = jnp.pad(x.T, ((0, 0), (0, n_pad - n)))        # (2, n_pad)

    b1c = b1.reshape(h1, 1)
    b2c = b2.reshape(h2, 1)
    bhc = bh.reshape(nout, 1)

    full = lambda shape: pl.BlockSpec(shape, lambda i: (0, 0))

    out_t = pl.pallas_call(
        _pinn_kernel,
        out_shape=jax.ShapeDtypeStruct((nout, n_pad), jnp.float32),
        grid_spec=pltpu.PrefetchScalarGridSpec(
            num_scalar_prefetch=0,
            grid=(grid,),
            in_specs=[
                pl.BlockSpec((INPUT_SIZE, tile), lambda i: (0, i)),  # x tile (2, T)
                full((h1, INPUT_SIZE)),                              # w1 (32, 2)
                full((h1, 1)),                                       # b1 (32, 1)
                full((h2, h1)),                                      # w2 (32, 32)
                full((h2, 1)),                                       # b2 (32, 1)
                full((nout, h2)),                                    # w_head (3, 32)
                full((nout, 1)),                                     # b_head (3, 1)
            ],
            out_specs=pl.BlockSpec((nout, tile), lambda i: (0, i)),  # (3, T) lane-dense
        ),
        compiler_params=pltpu.CompilerParams(
            dimension_semantics=("parallel",),
            vmem_limit_bytes=32 * 1024 * 1024),
    )(xt, w1, b1c, w2, b2c, wh, bhc)

    # Return points-major (N, 3) to match the PyTorch module. If the consumer
    # can take feature-major (3, N), return out_t[:, :n] and skip this pass.
    return out_t[:, :n].T


def init_params(key):
    """Deterministic PyTorch-Linear-style init (uniform +-1/sqrt(fan_in)).

    Weights stored PyTorch-style: W is (out_features, in_features), b is (out,)."""
    sizes = (INPUT_SIZE,) + HIDDEN + (OUTPUT_SIZE,)
    keys = jax.random.split(key, 2 * (len(sizes) - 1))
    params = []
    for i in range(len(sizes) - 1):
        fan_in, fan_out = sizes[i], sizes[i + 1]
        bound = 1.0 / (fan_in ** 0.5)
        w = jax.random.uniform(keys[2 * i], (fan_out, fan_in),
                               jnp.float32, -bound, bound)
        b = jax.random.uniform(keys[2 * i + 1], (fan_out,),
                               jnp.float32, -bound, bound)
        params += [w, b]
    return tuple(params)


def reference_forward(x, params):
    """Pure-JAX reference matching the PyTorch semantics (fp32 matmuls)."""
    w1, b1, w2, b2, wh, bh = params
    h = jnp.maximum(jnp.dot(x, w1.T, precision=_HIGHEST) + b1, 0.0)
    h = jnp.maximum(jnp.dot(h, w2.T, precision=_HIGHEST) + b2, 0.0)
    out = jnp.dot(h, wh.T, precision=_HIGHEST) + bh
    t = x[..., 0]
    xx = x[..., 1]
    mask = jnp.logical_or(t <= T_DOMAIN[0],
                          jnp.logical_or(xx <= X_DOMAIN[0], xx >= X_DOMAIN[1]))
    rho = jnp.where(xx < 0.5, 1.0, 0.125)
    p = jnp.where(xx < 0.5, 1.0, 0.1)
    u = jnp.zeros_like(xx)
    energy = p / (GAMMA - 1.0) + 0.5 * rho * u * u
    ic = jnp.stack([rho, rho * u, energy], axis=-1)
    return jnp.where(mask[..., None], ic, out)


if __name__ == "__main__":
    key = jax.random.PRNGKey(0)
    k_params, k_t, k_x = jax.random.split(key, 3)

    params = init_params(k_params)

    N = 1000  # deliberately NOT a multiple of the tile: exercises the padded tail
    t = jax.random.uniform(k_t, (N, 1), jnp.float32, 0.0, 1.0)
    x = jax.random.uniform(k_x, (N, 1), jnp.float32, 0.0, 1.0)
    # Force a few points onto the IC/BC region to exercise the overwrite path.
    t = t.at[:8, 0].set(0.0)
    x = x.at[8:16, 0].set(0.0)
    x = x.at[16:24, 0].set(1.0)
    inp = jnp.concatenate([t, x], axis=-1)             # (N, 2)

    out = dirichlet_pinn_forward(inp, params)
    out = jax.block_until_ready(out)

    ref = reference_forward(inp, params)
    assert out.shape == (N, OUTPUT_SIZE), out.shape
    assert jnp.allclose(out, ref, atol=2e-5, rtol=1e-5), \
        float(jnp.max(jnp.abs(out - ref)))

    print("KERNEL_OK")
</pallas_src>

<mosaic_0001>
module attributes {stable_mosaic.version = 11 : i64} {
  func.func @_pinn_kernel(%arg0: i32, %arg1: memref<2x1024xf32, #tpu.memory_space<vmem>>, %arg2: memref<32x2xf32, #tpu.memory_space<vmem>>, %arg3: memref<32x1xf32, #tpu.memory_space<vmem>>, %arg4: memref<32x32xf32, #tpu.memory_space<vmem>>, %arg5: memref<32x1xf32, #tpu.memory_space<vmem>>, %arg6: memref<3x32xf32, #tpu.memory_space<vmem>>, %arg7: memref<3x1xf32, #tpu.memory_space<vmem>>, %arg8: memref<3x1024xf32, #tpu.memory_space<vmem>>) attributes {dimension_semantics = [#tpu.dimension_semantics<parallel>], iteration_bounds = array<i64: 1>, scalar_prefetch = 0 : i64, scratch_operands = 0 : i64, tpu.core_type = #tpu.core_type<tc>, window_params = [{transform_indices = @transform_0, window_bounds = array<i64: 2, 1024>}, {pipeline_mode = #tpu.pipeline_mode<synchronous>, transform_indices = @transform_1, window_bounds = array<i64: 32, 2>}, {pipeline_mode = #tpu.pipeline_mode<synchronous>, transform_indices = @transform_2, window_bounds = array<i64: 32, 1>}, {pipeline_mode = #tpu.pipeline_mode<synchronous>, transform_indices = @transform_3, window_bounds = array<i64: 32, 32>}, {pipeline_mode = #tpu.pipeline_mode<synchronous>, transform_indices = @transform_4, window_bounds = array<i64: 32, 1>}, {pipeline_mode = #tpu.pipeline_mode<synchronous>, transform_indices = @transform_5, window_bounds = array<i64: 3, 32>}, {pipeline_mode = #tpu.pipeline_mode<synchronous>, transform_indices = @transform_6, window_bounds = array<i64: 3, 1>}, {transform_indices = @transform_7, window_bounds = array<i64: 3, 1024>}]} {
    %c0 = arith.constant 0 : index
    %c0_0 = arith.constant 0 : index
    %0 = vector.load %arg1[%c0, %c0_0] : memref<2x1024xf32, #tpu.memory_space<vmem>>, vector<2x1024xf32>
    %1 = vector.extract_strided_slice %0 {offsets = [0, 0], sizes = [1, 1024], strides = [1, 1]} : vector<2x1024xf32> to vector<1x1024xf32>
    %2 = vector.extract_strided_slice %0 {offsets = [1, 0], sizes = [1, 1024], strides = [1, 1]} : vector<2x1024xf32> to vector<1x1024xf32>
    %c0_1 = arith.constant 0 : index
    %c0_2 = arith.constant 0 : index
    %3 = vector.load %arg2[%c0_1, %c0_2] : memref<32x2xf32, #tpu.memory_space<vmem>>, vector<32x2xf32>
    %cst = arith.constant dense<0.000000e+00> : vector<32x1024xf32>
    %4 = tpu.matmul %3, %0, %cst {dimension_numbers = #tpu.dot_dimension_numbers<[1], [0], [0], [1], [0, 0, 1, 1], [], []>, precision = #tpu.contract_precision<fp32>} : vector<32x2xf32>, vector<2x1024xf32>, vector<32x1024xf32> -> vector<32x1024xf32>
    %c0_3 = arith.constant 0 : index
    %c0_4 = arith.constant 0 : index
    %5 = vector.load %arg3[%c0_3, %c0_4] : memref<32x1xf32, #tpu.memory_space<vmem>>, vector<32x1xf32>
    %6 = vector.broadcast %5 : vector<32x1xf32> to vector<32x1024xf32>
    %7 = arith.addf %4, %6 : vector<32x1024xf32>
    %cst_5 = arith.constant 0.000000e+00 : f32
    %8 = vector.broadcast %cst_5 : f32 to vector<32x1024xf32>
    %9 = arith.maximumf %7, %8 : vector<32x1024xf32>
    %c0_6 = arith.constant 0 : index
    %c0_7 = arith.constant 0 : index
    %10 = vector.load %arg4[%c0_6, %c0_7] : memref<32x32xf32, #tpu.memory_space<vmem>>, vector<32x32xf32>
    %cst_8 = arith.constant dense<0.000000e+00> : vector<32x1024xf32>
    %11 = tpu.matmul %10, %9, %cst_8 {dimension_numbers = #tpu.dot_dimension_numbers<[1], [0], [0], [1], [0, 0, 1, 1], [], []>, precision = #tpu.contract_precision<fp32>} : vector<32x32xf32>, vector<32x1024xf32>, vector<32x1024xf32> -> vector<32x1024xf32>
    %c0_9 = arith.constant 0 : index
    %c0_10 = arith.constant 0 : index
    %12 = vector.load %arg5[%c0_9, %c0_10] : memref<32x1xf32, #tpu.memory_space<vmem>>, vector<32x1xf32>
    %13 = vector.broadcast %12 : vector<32x1xf32> to vector<32x1024xf32>
    %14 = arith.addf %11, %13 : vector<32x1024xf32>
    %cst_11 = arith.constant 0.000000e+00 : f32
    %15 = vector.broadcast %cst_11 : f32 to vector<32x1024xf32>
    %16 = arith.maximumf %14, %15 : vector<32x1024xf32>
    %c0_12 = arith.constant 0 : index
    %c0_13 = arith.constant 0 : index
    %17 = vector.load %arg6[%c0_12, %c0_13] : memref<3x32xf32, #tpu.memory_space<vmem>>, vector<3x32xf32>
    %cst_14 = arith.constant dense<0.000000e+00> : vector<3x1024xf32>
    %18 = tpu.matmul %17, %16, %cst_14 {dimension_numbers = #tpu.dot_dimension_numbers<[1], [0], [0], [1], [0, 0, 1, 1], [], []>, precision = #tpu.contract_precision<fp32>} : vector<3x32xf32>, vector<32x1024xf32>, vector<3x1024xf32> -> vector<3x1024xf32>
    %c0_15 = arith.constant 0 : index
    %c0_16 = arith.constant 0 : index
    %19 = vector.load %arg7[%c0_15, %c0_16] : memref<3x1xf32, #tpu.memory_space<vmem>>, vector<3x1xf32>
    %20 = vector.broadcast %19 : vector<3x1xf32> to vector<3x1024xf32>
    %21 = arith.addf %18, %20 : vector<3x1024xf32>
    %cst_17 = arith.constant 0.000000e+00 : f32
    %22 = vector.broadcast %cst_17 : f32 to vector<1x1024xf32>
    %23 = arith.cmpf ole, %1, %22 : vector<1x1024xf32>
    %cst_18 = arith.constant 0.000000e+00 : f32
    %24 = vector.broadcast %cst_18 : f32 to vector<1x1024xf32>
    %25 = arith.cmpf ole, %2, %24 : vector<1x1024xf32>
    %cst_19 = arith.constant 1.000000e+00 : f32
    %26 = vector.broadcast %cst_19 : f32 to vector<1x1024xf32>
    %27 = arith.cmpf oge, %2, %26 : vector<1x1024xf32>
    %28 = arith.ori %25, %27 : vector<1x1024xi1>
    %29 = arith.ori %23, %28 : vector<1x1024xi1>
    %cst_20 = arith.constant 5.000000e-01 : f32
    %30 = vector.broadcast %cst_20 : f32 to vector<1x1024xf32>
    %31 = arith.cmpf olt, %2, %30 : vector<1x1024xf32>
    %cst_21 = arith.constant 1.000000e+00 : f32
    %cst_22 = arith.constant 1.250000e-01 : f32
    %32 = vector.broadcast %cst_21 : f32 to vector<1x1024xf32>
    %33 = vector.broadcast %cst_22 : f32 to vector<1x1024xf32>
    %34 = arith.select %31, %32, %33 : vector<1x1024xi1>, vector<1x1024xf32>
    %cst_23 = arith.constant 2.500000e+00 : f32
    %cst_24 = arith.constant 2.500000e-01 : f32
    %35 = vector.broadcast %cst_23 : f32 to vector<1x1024xf32>
    %36 = vector.broadcast %cst_24 : f32 to vector<1x1024xf32>
    %37 = arith.select %31, %35, %36 : vector<1x1024xi1>, vector<1x1024xf32>
    %38 = vector.extract_strided_slice %21 {offsets = [0, 0], sizes = [1, 1024], strides = [1, 1]} : vector<3x1024xf32> to vector<1x1024xf32>
    %39 = arith.select %29, %34, %38 : vector<1x1024xi1>, vector<1x1024xf32>
    %40 = vector.extract_strided_slice %21 {offsets = [1, 0], sizes = [1, 1024], strides = [1, 1]} : vector<3x1024xf32> to vector<1x1024xf32>
    %cst_25 = arith.constant 0.000000e+00 : f32
    %41 = vector.broadcast %cst_25 : f32 to vector<1x1024xf32>
    %42 = arith.select %29, %41, %40 : vector<1x1024xi1>, vector<1x1024xf32>
    %43 = vector.extract_strided_slice %21 {offsets = [2, 0], sizes = [1, 1024], strides = [1, 1]} : vector<3x1024xf32> to vector<1x1024xf32>
    %44 = arith.select %29, %37, %43 : vector<1x1024xi1>, vector<1x1024xf32>
    %45 = tpu.concatenate %39, %42, %44 in 0 : vector<1x1024xf32>, vector<1x1024xf32>, vector<1x1024xf32> -> vector<3x1024xf32>
    %c0_26 = arith.constant 0 : index
    %c0_27 = arith.constant 0 : index
    %46 = vector.load %arg8[%c0_26, %c0_27] : memref<3x1024xf32, #tpu.memory_space<vmem>>, vector<3x1024xf32>
    tpu.vector_store %arg8[%c0_26, %c0_27], %45 {strides = array<i32>} : memref<3x1024xf32, #tpu.memory_space<vmem>>, vector<3x1024xf32>,
    return
  }
  func.func @transform_0(%arg0: i32) -> (i32, i32) {
    %c0_i32 = arith.constant 0 : i32
    %c0_i32_0 = arith.constant 0 : i32
    return %c0_i32, %arg0 : i32, i32
  }
  func.func @transform_1(%arg0: i32) -> (i32, i32) {
    %c0_i32 = arith.constant 0 : i32
    %c0_i32_0 = arith.constant 0 : i32
    %c0_i32_1 = arith.constant 0 : i32
    return %c0_i32, %c0_i32_0 : i32, i32
  }
  func.func @transform_2(%arg0: i32) -> (i32, i32) {
    %c0_i32 = arith.constant 0 : i32
    %c0_i32_0 = arith.constant 0 : i32
    %c0_i32_1 = arith.constant 0 : i32
    return %c0_i32, %c0_i32_0 : i32, i32
  }
  func.func @transform_3(%arg0: i32) -> (i32, i32) {
    %c0_i32 = arith.constant 0 : i32
    %c0_i32_0 = arith.constant 0 : i32
    %c0_i32_1 = arith.constant 0 : i32
    return %c0_i32, %c0_i32_0 : i32, i32
  }
  func.func @transform_4(%arg0: i32) -> (i32, i32) {
    %c0_i32 = arith.constant 0 : i32
    %c0_i32_0 = arith.constant 0 : i32
    %c0_i32_1 = arith.constant 0 : i32
    return %c0_i32, %c0_i32_0 : i32, i32
  }
  func.func @transform_5(%arg0: i32) -> (i32, i32) {
    %c0_i32 = arith.constant 0 : i32
    %c0_i32_0 = arith.constant 0 : i32
    %c0_i32_1 = arith.constant 0 : i32
    return %c0_i32, %c0_i32_0 : i32, i32
  }
  func.func @transform_6(%arg0: i32) -> (i32, i32) {
    %c0_i32 = arith.constant 0 : i32
    %c0_i32_0 = arith.constant 0 : i32
    %c0_i32_1 = arith.constant 0 : i32
    return %c0_i32, %c0_i32_0 : i32, i32
  }
  func.func @transform_7(%arg0: i32) -> (i32, i32) {
    %c0_i32 = arith.constant 0 : i32
    %c0_i32_0 = arith.constant 0 : i32
    return %c0_i32, %arg0 : i32, i32
  }
}

</mosaic_0001>

<bundles_post_ra>
// kernel: dirichlet_pinn_forward.1
= control target key start
LH: loop header
LB: loop body
LE: loop exit
PB: predicated region body
PF: predicated region fallthrough
CT: control target
= control target key end

     0   :  { %v62_v0 = vlaneseq  ;;  %v7901_v1 = vmov 1983009808   ;;  %v10347_v3 = vmov 0.0   ;;  %vm92_vm0 = vcmask 15360   ;;  %s10334_s1 = inlined_call_operand.vmem [shape: f32[32,2], index: 1, kind: input, shape index: {}]   ;;  %s10335_s2 = inlined_call_operand.vmem [shape: f32[32,1], index: 2, kind: input, shape index: {}]   ;;  %s10336_s0 = inlined_call_operand.vmem [shape: f32[2,1024], index: 0, kind: input, shape index: {}]   ;;  %s10337_s4 = inlined_call_operand.vmem [shape: f32[32,1], index: 4, kind: input, shape index: {}]   ;;  %s10338_s6 = inlined_call_operand.vmem [shape: f32[3,1], index: 6, kind: input, shape index: {}]   ;;  %s10339_s3 = inlined_call_operand.vmem [shape: f32[32,32], index: 3, kind: input, shape index: {}]   ;;  %s10340_s5 = inlined_call_operand.vmem [shape: f32[3,32], index: 5, kind: input, shape index: {}]   ;;  %s10341_s7 = inlined_call_operand.vmem [shape: f32[3,1024], index: 7, kind: output, shape index: {}]  }
   0x1   :  { %v60_v2 = vunpack.c.l.s4 %v7901_v1  ;;  %188 = vmatprep.mubr.f32.mxu0 %v10347_v3  ;;  %v28_v4 = vld [vmem:[%s10334_s1] sm:$0xff]  ;;  %v29_v5 = vld [vmem:[%s10334_s1 + $0x8] sm:$0xff]  ;;  %307 = vmatprep.mubr.f32.mxu1 %v10347_v3  ;;  %v30_v9 = vld [vmem:[%s10334_s1 + $0x10] sm:$0xff]  ;;  %v10342_v11 = vmov 0   ;;  %vm105_vm1 = vcmask 1041408   ;;  %vm2630_vm2 = vcmask 261120  }
   0x2   :  { %v7954_v6 = vshrl.u32 %v62_v0, 7  ;;  %v94_v7 = vsel %vm92_vm0, %v28_v4, 0  ;;  %v97_v8 = vsel %vm92_vm0, %v29_v5, 0  ;;  %v31_v10 = vld [vmem:[%s10334_s1 + $0x18] sm:$0xff]  ;;  %7896 = vset.pattern.permute.xlu1 %v10342_v11  ;;  %7895 = vset.pattern.permute.xlu0 %v10342_v11  ;;  %v100_v15 = vsel %vm92_vm0, %v30_v9, 0  ;;  %v33_v16 = vld [vmem:[%s10335_s2 + $0x8] sm:$0xff] }
   0x3   :  { %v61_v12 = vunpack.c.0.s8 %v60_v2  ;;  %v7966_v13 = vand.u32 4294901760, %v94_v7  ;;  %v7968_v14 = vand.u32 4294901760, %v97_v8  ;;  %v35_v17 = vld [vmem:[%s10335_s2 + $0x18] sm:$0xff]  ;;  %v26_v18 = vld [vmem:[%s10336_s0] sm:$0xff]  ;;  %v7980_v19 = vand.u32 4294901760, %v100_v15  ;;  %43 = vperm.xlu1 %7896, %v33_v16   ;;  %v34_v25 = vld [vmem:[%s10335_s2 + $0x10] sm:$0xff] }
   0x4   :  { %10404 = vst [vmem:[#allocation2_spill] sm:$0xff] %v7954_v6  ;;  %v103_v20 = vsel %vm92_vm0, %v31_v10, 0  ;;  %53 = vperm.xlu0 %7895, %v35_v17   ;;  %v32_v24 = vld [vmem:[%s10335_s2] sm:$0xff]  ;;  %v58_v26 = vcombine.high %v26_v18, %v26_v18  ;;  %v2609_v35 = vld [vmem:[%s10337_s4 + $0x18] sm:$0xff]  ;;  %v2608_v36 = vld [vmem:[%s10337_s4 + $0x10] sm:$0xff]  ;;  %vm7841_vm9 = vcmask 1040384  }
   0x5   :  { %v7984_v21 = vsub.s32 %v61_v12, %v7954_v6  ;;  %v7987_v22 = vsub.f32 %v94_v7, %v7966_v13  ;;  %v7990_v23 = vsub.f32 %v97_v8, %v7968_v14  ;;  %v8003_v29 = vsub.f32 %v100_v15, %v7980_v19  ;;  %v2607_v50 = vld [vmem:[%s10337_s4 + $0x8] sm:$0xff]  ;;  %v2606_v55 = vld [vmem:[%s10337_s4] sm:$0xff] }
   0x6   :  { %v8005_v30 = vand.u32 4294901760, %v103_v20  ;;  %v5436_v58 = vld [vmem:[%s10338_s6] sm:$0x7]  ;;  %v8117_v16 = vld [vmem:[%s10336_s0 + $0x8] sm:$0xff] }
   0x7   :  { %10405 = vst [vmem:[#allocation3_spill] sm:$0xff] %v7984_v21  ;;  %v65_v27 = vrot.slane %v26_v18, %v7984_v21  ;;  %v8000_v28 = vand.u32 4294901760, %v7987_v22  ;;  %v8008_v31 = vand.u32 4294901760, %v7990_v23  ;;  %38 = vperm.xlu1 %7896, %v32_v24   ;;  %v8023_v39 = vand.u32 4294901760, %v8003_v29 }
   0x8   :  { %48 = vperm.xlu0 %7895, %v34_v25   ;;  %v8026_v40 = vsub.f32 %v103_v20, %v8005_v30  ;;  %v72_v41 = vrot.slane %v58_v26, %v7984_v21  ;;  %v82_v17 = vrot.slane %v8117_v16, %v7984_v21 }
   0x9   :  { %v73_v32 = vcombine.high %v65_v27, %v65_v27  ;;  %v106_v33 = vsel %vm105_vm1, %v65_v27, 0  ;;  %v192_v34 = vsub.f32 %v7987_v22, %v8000_v28  ;;  %v203_v44 = vsub.f32 %v7990_v23, %v8008_v31 }
   0xa   :  { %v8019_v37 = vand.u32 4294901760, %v106_v33  ;;  %v214_v48 = vsub.f32 %v8003_v29, %v8023_v39  ;;  %v8038_v49 = vand.u32 4294901760, %v8026_v40  ;;  %v74_v54 = vcombine.high %v72_v41, %v72_v41 }
   0xb   :  { %v108_v38 = vsel %vm105_vm1, %v73_v32, 0  ;;  %v8029_v43 = vand.u32 4294901760, %v192_v34  ;;  %2622 = vperm.xlu1 %7896, %v2608_v36   ;;  %v8044_v51 = vand.u32 4294901760, %v203_v44  ;;  %v110_v4 = vsel %vm105_vm1, %v72_v41, 0 }
   0xc   :  { %v152_v42 = vand.u32 4294901760, %v108_v38  ;;  %v270_v45 = vsub.f32 %v106_v33, %v8019_v37  ;;  %2627 = vperm.xlu0 %7895, %v2609_v35   ;;  %v8054_v60 = vand.u32 4294901760, %v214_v48  ;;  %v225_v61 = vsub.f32 %v8026_v40, %v8038_v49 }
   0xd   :  { %v112_v62 = vsel %vm105_vm1, %v74_v54, 0  ;;  %v8088_v7 = vand.u32 4294901760, %v110_v4  ;;  %v90_v18 = vcombine.high %v82_v17, %v82_v17  ;;  %v114_v27 = vsel %vm105_vm1, %v82_v17, 0 }
   0xe   :  { %153 = vmatprep.subr.mxu0 %v152_v42  ;;  %v264_v46 = vsub.f32 %v108_v38, %v152_v42  ;;  %v271_v47 = vand.u32 4294901760, %v270_v45  ;;  %v8060_v63 = vand.u32 4294901760, %v112_v62  ;;  %v8064_v0 = vand.u32 4294901760, %v225_v61 }
   0xf   :  { %155 = vmatpush1.msra.mxu0 %v8019_v37  ;;  %2612 = vperm.xlu1 %7896, %v2606_v55   ;;  %v882_v9 = vsub.f32 %v110_v4, %v8088_v7  ;;  %v116_v20 = vsel %vm105_vm1, %v90_v18, 0  ;;  %v8158_v33 = vand.u32 4294901760, %v114_v27  ;;  %v75_v41 = vcombine.high %v8117_v16, %v8117_v16 }
  0x10   :  { %194 = vmatmul.mubr.f32.vlgmr.msra.gmra.mxu0 %v8029_v43  ;;  %v265_v52 = vand.u32 4294901760, %v264_v46  ;;  %v272_v53 = vsub.f32 %v270_v45, %v271_v47  ;;  %368 = vmatprep.subr.mxu0 %v264_v46  ;;  %v8070_v1 = vsub.f32 %v112_v62, %v8060_v63  ;;  %v8135_v24 = vand.u32 4294901760, %v116_v20 }
  0x11   :  { %199 = vmatprep.mubr.f32.mxu0 %v10347_v3  ;;  %371 = vmatpush1.msra.mxu0 %v270_v45  ;;  %v883_v10 = vand.u32 4294901760, %v882_v9  ;;  %v1494_v35 = vsub.f32 %v114_v27, %v8158_v33 }
  0x12   :  { %v266_v56 = vsub.f32 %v264_v46, %v265_v52  ;;  %573 = vmatprep.subr.mxu0 %v265_v52  ;;  %2617 = vperm.xlu0 %7895, %v2607_v50   ;;  %v273_v57 = vand.u32 4294901760, %v272_v53  ;;  %v877_v2 = vand.u32 4294901760, %v8070_v1  ;;  %v1488_v25 = vsub.f32 %v116_v20, %v8135_v24 }
  0x13   :  { %v884_v12 = vsub.f32 %v882_v9, %v883_v10  ;;  %v1495_v36 = vand.u32 4294901760, %v1494_v35 }
  0x14   :  { %205 = vmatmul.mubr.f32.gmra.mxu0 %v8044_v51  ;;  %v267_v59 = vand.u32 4294901760, %v266_v56  ;;  %v878_v5 = vsub.f32 %v8070_v1, %v877_v2  ;;  %v1489_v26 = vand.u32 4294901760, %v1488_v25 }
  0x15   :  { %210 = vmatprep.mubr.f32.mxu0 %v10347_v3  ;;  %v885_v15 = vand.u32 4294901760, %v884_v12 }
  0x16   :  { %268 = vmatprep.subr.mxu1 %v267_v59  ;;  %5439 = vperm.xlu0 %7895, %v5436_v58   ;;  %v879_v8 = vand.u32 4294901760, %v878_v5  ;;  %v1490_v32 = vsub.f32 %v1488_v25, %v1489_v26 }
  0x17   :  { %274 = vmatpush1.msra.mxu1 %v273_v57 }
  0x18   :  { %216 = vmatmul.mubr.f32.gmra.mxu0 %v8054_v60  ;;  %309 = vmatmul.mubr.f32.vlgmr.msra.gmra.mxu1 %v7966_v13  ;;  %v1491_v34 = vand.u32 4294901760, %v1490_v32 }
  0x19   :  { %221 = vmatprep.mubr.f32.mxu0 %v10347_v3  ;;  %314 = vmatprep.mubr.f32.mxu1 %v10347_v3 }
  0x1a   :  { %468 = vmatprep.subr.mxu1 %v152_v42 }
  0x1b   :  { %470 = vmatpush1.msra.mxu1 %v8019_v37 }
  0x1c   :  { %227 = vmatmul.mubr.f32.gmra.mxu0 %v8064_v0  ;;  %316 = vmatmul.mubr.f32.gmra.mxu1 %v7968_v14 }
  0x1d   :  { %321 = vmatprep.mubr.f32.mxu1 %v10347_v3  ;;  %404 = vmatprep.mubr.f32.mxu0 %v10347_v3 }
  0x1e   :  { %670 = vmatprep.subr.mxu1 %v152_v42  ;;  %v89_v42 = vrot.slane %v75_v41, %v7984_v21 }
  0x20   :  { %323 = vmatmul.mubr.f32.gmra.mxu1 %v7980_v19  ;;  %407 = vmatmul.mubr.f32.vlgmr.msra.gmra.mxu0 %v7987_v22  ;;  %v91_v44 = vcombine.high %v89_v42, %v89_v42  ;;  %v118_v50 = vsel %vm105_vm1, %v89_v42, 0 }
  0x21   :  { %328 = vmatprep.mubr.f32.mxu1 %v10347_v3  ;;  %412 = vmatprep.mubr.f32.mxu0 %v10347_v3  ;;  %v8223_v53 = vand.u32 4294901760, %v118_v50 }
  0x22   :  { %577 = vmatpush1.msra.mxu0 %v271_v47  ;;  %v120_v45 = vsel %vm105_vm1, %v91_v44, 0 }
  0x23   :  { %765 = vmatprep.subr.mxu0 %v8060_v63  ;;  %v8200_v46 = vand.u32 4294901760, %v120_v45  ;;  %v2106_v55 = vsub.f32 %v118_v50, %v8223_v53 }
  0x24   :  { %330 = vmatmul.mubr.f32.gmra.mxu1 %v8005_v30  ;;  %415 = vmatmul.mubr.f32.gmra.mxu0 %v7990_v23 }
  0x25   :  { %420 = vmatprep.mubr.f32.mxu0 %v10347_v3  ;;  %503 = vmatprep.mubr.f32.mxu1 %v10347_v3  ;;  %v2100_v47 = vsub.f32 %v120_v45, %v8200_v46  ;;  %v2107_v56 = vand.u32 4294901760, %v2106_v55 }
  0x27   :  { %v2101_v48 = vand.u32 4294901760, %v2100_v47  ;;  %v2108_v57 = vsub.f32 %v2106_v55, %v2107_v56 }
  0x28   :  { %423 = vmatmul.mubr.f32.gmra.mxu0 %v8003_v29  ;;  %507 = vmatmul.mubr.f32.vlgmr.msra.gmra.mxu1 %v8000_v28 }
  0x29   :  { %428 = vmatprep.mubr.f32.mxu0 %v10347_v3  ;;  %512 = vmatprep.mubr.f32.mxu1 %v10347_v3  ;;  %v2102_v52 = vsub.f32 %v2100_v47, %v2101_v48  ;;  %v2109_v58 = vand.u32 4294901760, %v2108_v57 }
  0x2a   :  { %672 = vmatpush1.msra.mxu1 %v8019_v37  ;;  %v1496_v37 = vsub.f32 %v1494_v35, %v1495_v36 }
  0x2b   :  { %880 = vmatprep.subr.mxu1 %v879_v8  ;;  %v2103_v54 = vand.u32 4294901760, %v2102_v52 }
  0x2c   :  { %431 = vmatmul.mubr.f32.gmra.mxu0 %v8026_v40  ;;  %516 = vmatmul.mubr.f32.gmra.mxu1 %v8008_v31  ;;  %v1497_v38 = vand.u32 4294901760, %v1496_v37 }
  0x2d   :  { %521 = vmatprep.mubr.f32.mxu1 %v10347_v3  ;;  %610 = vmatprep.mubr.f32.mxu0 %v10347_v3 }
  0x30   :  { %525 = vmatmul.mubr.f32.gmra.mxu1 %v8023_v39  ;;  %612 = vmatmul.mubr.f32.vlgmr.msra.gmra.mxu0 %v7966_v13 }
  0x31   :  { %530 = vmatprep.mubr.f32.mxu1 %v10347_v3  ;;  %617 = vmatprep.mubr.f32.mxu0 %v10347_v3 }
  0x32   :  { %767 = vmatpush1.msra.mxu0 %v8088_v7 }
  0x33   :  { %980 = vmatprep.subr.mxu0 %v8070_v1 }
  0x34   :  { %534 = vmatmul.mubr.f32.gmra.mxu1 %v8038_v49  ;;  %619 = vmatmul.mubr.f32.gmra.mxu0 %v7968_v14 }
  0x35   :  { %624 = vmatprep.mubr.f32.mxu0 %v10347_v3  ;;  %705 = vmatprep.mubr.f32.mxu1 %v10347_v3 }
  0x38   :  { %626 = vmatmul.mubr.f32.gmra.mxu0 %v7980_v19  ;;  %707 = vmatmul.mubr.f32.vlgmr.msra.gmra.mxu1 %v7966_v13 }
  0x39   :  { %631 = vmatprep.mubr.f32.mxu0 %v10347_v3  ;;  %712 = vmatprep.mubr.f32.mxu1 %v10347_v3 }
  0x3a   :  { %886 = vmatpush1.msra.mxu1 %v885_v15 }
  0x3b   :  { %1080 = vmatprep.subr.mxu1 %v8060_v63 }
  0x3c   :  { %633 = vmatmul.mubr.f32.gmra.mxu0 %v8005_v30  ;;  %714 = vmatmul.mubr.f32.gmra.mxu1 %v7968_v14 }
  0x3d   :  { %719 = vmatprep.mubr.f32.mxu1 %v10347_v3  ;;  %800 = vmatprep.mubr.f32.mxu0 %v10347_v3 }
  0x40   :  { %721 = vmatmul.mubr.f32.gmra.mxu1 %v7980_v19  ;;  %806 = vmatmul.mubr.f32.vlgmr.msra.gmra.mxu0 %v8029_v43 }
  0x41   :  { %726 = vmatprep.mubr.f32.mxu1 %v10347_v3  ;;  %811 = vmatprep.mubr.f32.mxu0 %v10347_v3 }
  0x42   :  { %983 = vmatpush1.msra.mxu0 %v882_v9 }
  0x43   :  { %1185 = vmatprep.subr.mxu0 %v877_v2 }
  0x44   :  { %728 = vmatmul.mubr.f32.gmra.mxu1 %v8005_v30  ;;  %817 = vmatmul.mubr.f32.gmra.mxu0 %v8044_v51 }
  0x45   :  { %822 = vmatprep.mubr.f32.mxu0 %v10347_v3  ;;  %919 = vmatprep.mubr.f32.mxu1 %v10347_v3 }
  0x48   :  { %828 = vmatmul.mubr.f32.gmra.mxu0 %v8054_v60  ;;  %921 = vmatmul.mubr.f32.vlgmr.msra.gmra.mxu1 %v7966_v13 }
  0x49   :  { %833 = vmatprep.mubr.f32.mxu0 %v10347_v3  ;;  %926 = vmatprep.mubr.f32.mxu1 %v10347_v3 }
  0x4a   :  { %1082 = vmatpush1.msra.mxu1 %v8088_v7 }
  0x4b   :  { %1282 = vmatprep.subr.mxu1 %v8060_v63 }
  0x4c   :  { %839 = vmatmul.mubr.f32.gmra.mxu0 %v8064_v0  ;;  %928 = vmatmul.mubr.f32.gmra.mxu1 %v7968_v14 }
  0x4d   :  { %933 = vmatprep.mubr.f32.mxu1 %v10347_v3  ;;  %1016 = vmatprep.mubr.f32.mxu0 %v10347_v3 }
  0x50   :  { %935 = vmatmul.mubr.f32.gmra.mxu1 %v7980_v19  ;;  %1019 = vmatmul.mubr.f32.vlgmr.msra.gmra.mxu0 %v7987_v22 }
  0x51   :  { %940 = vmatprep.mubr.f32.mxu1 %v10347_v3  ;;  %1024 = vmatprep.mubr.f32.mxu0 %v10347_v3 }
  0x52   :  { %1189 = vmatpush1.msra.mxu0 %v883_v10 }
  0x53   :  { %1377 = vmatprep.subr.mxu0 %v8135_v24 }
  0x54   :  { %942 = vmatmul.mubr.f32.gmra.mxu1 %v8005_v30  ;;  %1027 = vmatmul.mubr.f32.gmra.mxu0 %v7990_v23 }
  0x55   :  { %1032 = vmatprep.mubr.f32.mxu0 %v10347_v3  ;;  %1115 = vmatprep.mubr.f32.mxu1 %v10347_v3 }
  0x58   :  { %1035 = vmatmul.mubr.f32.gmra.mxu0 %v8003_v29  ;;  %1119 = vmatmul.mubr.f32.vlgmr.msra.gmra.mxu1 %v8000_v28 }
  0x59   :  { %1040 = vmatprep.mubr.f32.mxu0 %v10347_v3  ;;  %1124 = vmatprep.mubr.f32.mxu1 %v10347_v3 }
  0x5a   :  { %1284 = vmatpush1.msra.mxu1 %v8088_v7 }
  0x5b   :  { %1492 = vmatprep.subr.mxu1 %v1491_v34 }
  0x5c   :  { %1043 = vmatmul.mubr.f32.gmra.mxu0 %v8026_v40  ;;  %1128 = vmatmul.mubr.f32.gmra.mxu1 %v8008_v31 }
  0x5d   :  { %1133 = vmatprep.mubr.f32.mxu1 %v10347_v3  ;;  %1222 = vmatprep.mubr.f32.mxu0 %v10347_v3 }
  0x60   :  { %1137 = vmatmul.mubr.f32.gmra.mxu1 %v8023_v39  ;;  %1224 = vmatmul.mubr.f32.vlgmr.msra.gmra.mxu0 %v7966_v13 }
  0x61   :  { %1142 = vmatprep.mubr.f32.mxu1 %v10347_v3  ;;  %1229 = vmatprep.mubr.f32.mxu0 %v10347_v3 }
  0x62   :  { %1379 = vmatpush1.msra.mxu0 %v8158_v33 }
  0x63   :  { %1592 = vmatprep.subr.mxu0 %v1488_v25 }
  0x64   :  { %1146 = vmatmul.mubr.f32.gmra.mxu1 %v8038_v49  ;;  %1231 = vmatmul.mubr.f32.gmra.mxu0 %v7968_v14 }
  0x65   :  { %1236 = vmatprep.mubr.f32.mxu0 %v10347_v3  ;;  %1317 = vmatprep.mubr.f32.mxu1 %v10347_v3 }
  0x68   :  { %1238 = vmatmul.mubr.f32.gmra.mxu0 %v7980_v19  ;;  %1319 = vmatmul.mubr.f32.vlgmr.msra.gmra.mxu1 %v7966_v13 }
  0x69   :  { %1243 = vmatprep.mubr.f32.mxu0 %v10347_v3  ;;  %1324 = vmatprep.mubr.f32.mxu1 %v10347_v3 }
  0x6a   :  { %1498 = vmatpush1.msra.mxu1 %v1497_v38 }
  0x6b   :  { %1692 = vmatprep.subr.mxu1 %v8135_v24 }
  0x6c   :  { %1245 = vmatmul.mubr.f32.gmra.mxu0 %v8005_v30  ;;  %1326 = vmatmul.mubr.f32.gmra.mxu1 %v7968_v14 }
  0x6d   :  { %1331 = vmatprep.mubr.f32.mxu1 %v10347_v3  ;;  %1412 = vmatprep.mubr.f32.mxu0 %v10347_v3 }
  0x70   :  { %1333 = vmatmul.mubr.f32.gmra.mxu1 %v7980_v19  ;;  %1418 = vmatmul.mubr.f32.vlgmr.msra.gmra.mxu0 %v8029_v43 }
  0x71   :  { %1338 = vmatprep.mubr.f32.mxu1 %v10347_v3  ;;  %1423 = vmatprep.mubr.f32.mxu0 %v10347_v3 }
  0x72   :  { %1595 = vmatpush1.msra.mxu0 %v1494_v35 }
  0x73   :  { %1797 = vmatprep.subr.mxu0 %v1489_v26 }
  0x74   :  { %1340 = vmatmul.mubr.f32.gmra.mxu1 %v8005_v30  ;;  %1429 = vmatmul.mubr.f32.gmra.mxu0 %v8044_v51 }
  0x75   :  { %1434 = vmatprep.mubr.f32.mxu0 %v10347_v3  ;;  %1531 = vmatprep.mubr.f32.mxu1 %v10347_v3 }
  0x78   :  { %1440 = vmatmul.mubr.f32.gmra.mxu0 %v8054_v60  ;;  %1533 = vmatmul.mubr.f32.vlgmr.msra.gmra.mxu1 %v7966_v13 }
  0x79   :  { %1445 = vmatprep.mubr.f32.mxu0 %v10347_v3  ;;  %1538 = vmatprep.mubr.f32.mxu1 %v10347_v3 }
  0x7a   :  { %1694 = vmatpush1.msra.mxu1 %v8158_v33 }
  0x7b   :  { %1894 = vmatprep.subr.mxu1 %v8135_v24 }
  0x7c   :  { %1451 = vmatmul.mubr.f32.gmra.mxu0 %v8064_v0  ;;  %1540 = vmatmul.mubr.f32.gmra.mxu1 %v7968_v14 }
  0x7d   :  { %1545 = vmatprep.mubr.f32.mxu1 %v10347_v3  ;;  %1628 = vmatprep.mubr.f32.mxu0 %v10347_v3 }
  0x7e   :  { %v8314_v15 = vpop.permute.xlu1 %43 }
  0x7f   :  { %v8310_v7 = vpop.permute.xlu0 %53 }
  0x80   :  { %1547 = vmatmul.mubr.f32.gmra.mxu1 %v7980_v19  ;;  %1631 = vmatmul.mubr.f32.vlgmr.msra.gmra.mxu0 %v7987_v22 }
  0x81   :  { %1552 = vmatprep.mubr.f32.mxu1 %v10347_v3  ;;  %1636 = vmatprep.mubr.f32.mxu0 %v10347_v3 }
  0x82   :  { %1801 = vmatpush1.msra.mxu0 %v1495_v36  ;;  %v8320_v27 = vpop.permute.xlu1 %38 }
  0x83   :  { %1989 = vmatprep.subr.mxu0 %v8200_v46  ;;  %v8318_v18 = vpop.permute.xlu0 %48  ;;  %10407 = vst [vmem:[#allocation5_spill] sm:$0xff] %v8320_v27 }
  0x84   :  { %1554 = vmatmul.mubr.f32.gmra.mxu1 %v8005_v30  ;;  %1639 = vmatmul.mubr.f32.gmra.mxu0 %v7990_v23  ;;  %10406 = vst [vmem:[#allocation4_spill] sm:$0xff] %v8318_v18 }
  0x85   :  { %1644 = vmatprep.mubr.f32.mxu0 %v10347_v3  ;;  %1727 = vmatprep.mubr.f32.mxu1 %v10347_v3 }
  0x88   :  { %1647 = vmatmul.mubr.f32.gmra.mxu0 %v8003_v29  ;;  %1731 = vmatmul.mubr.f32.vlgmr.msra.gmra.mxu1 %v8000_v28 }
  0x89   :  { %1652 = vmatprep.mubr.f32.mxu0 %v10347_v3  ;;  %1736 = vmatprep.mubr.f32.mxu1 %v10347_v3 }
  0x8a   :  { %1896 = vmatpush1.msra.mxu1 %v8158_v33 }
  0x8b   :  { %2104 = vmatprep.subr.mxu1 %v2103_v54 }
  0x8c   :  { %1655 = vmatmul.mubr.f32.gmra.mxu0 %v8026_v40  ;;  %1740 = vmatmul.mubr.f32.gmra.mxu1 %v8008_v31 }
  0x8d   :  { %1745 = vmatprep.mubr.f32.mxu1 %v10347_v3  ;;  %1834 = vmatprep.mubr.f32.mxu0 %v10347_v3 }
  0x90   :  { %1749 = vmatmul.mubr.f32.gmra.mxu1 %v8023_v39  ;;  %1836 = vmatmul.mubr.f32.vlgmr.msra.gmra.mxu0 %v7966_v13 }
  0x91   :  { %1754 = vmatprep.mubr.f32.mxu1 %v10347_v3  ;;  %1841 = vmatprep.mubr.f32.mxu0 %v10347_v3 }
  0x92   :  { %1991 = vmatpush1.msra.mxu0 %v8223_v53 }
  0x93   :  { %2204 = vmatprep.subr.mxu0 %v2100_v47 }
  0x94   :  { %1758 = vmatmul.mubr.f32.gmra.mxu1 %v8038_v49  ;;  %1843 = vmatmul.mubr.f32.gmra.mxu0 %v7968_v14 }
  0x95   :  { %1848 = vmatprep.mubr.f32.mxu0 %v10347_v3  ;;  %1929 = vmatprep.mubr.f32.mxu1 %v10347_v3 }
  0x98   :  { %1850 = vmatmul.mubr.f32.gmra.mxu0 %v7980_v19  ;;  %1931 = vmatmul.mubr.f32.vlgmr.msra.gmra.mxu1 %v7966_v13 }
  0x99   :  { %1855 = vmatprep.mubr.f32.mxu0 %v10347_v3  ;;  %1936 = vmatprep.mubr.f32.mxu1 %v10347_v3 }
  0x9a   :  { %2110 = vmatpush1.msra.mxu1 %v2109_v58 }
  0x9b   :  { %2304 = vmatprep.subr.mxu1 %v8200_v46 }
  0x9c   :  { %1857 = vmatmul.mubr.f32.gmra.mxu0 %v8005_v30  ;;  %1938 = vmatmul.mubr.f32.gmra.mxu1 %v7968_v14 }
  0x9d   :  { %1943 = vmatprep.mubr.f32.mxu1 %v10347_v3  ;;  %2024 = vmatprep.mubr.f32.mxu0 %v10347_v3 }
  0xa0   :  { %1945 = vmatmul.mubr.f32.gmra.mxu1 %v7980_v19  ;;  %2030 = vmatmul.mubr.f32.vlgmr.msra.gmra.mxu0 %v8029_v43 }
  0xa1   :  { %1950 = vmatprep.mubr.f32.mxu1 %v10347_v3  ;;  %2035 = vmatprep.mubr.f32.mxu0 %v10347_v3 }
  0xa2   :  { %2207 = vmatpush1.msra.mxu0 %v2106_v55 }
  0xa3   :  { %2409 = vmatprep.subr.mxu0 %v2101_v48  ;;  %v2602_v48 = vld [vmem:[%s10339_s3] sm:$0xff] }
  0xa4   :  { %1952 = vmatmul.mubr.f32.gmra.mxu1 %v8005_v30  ;;  %2041 = vmatmul.mubr.f32.gmra.mxu0 %v8044_v51 }
  0xa5   :  { %2046 = vmatprep.mubr.f32.mxu0 %v10347_v3  ;;  %2143 = vmatprep.mubr.f32.mxu1 %v10347_v3 }
  0xa8   :  { %2052 = vmatmul.mubr.f32.gmra.mxu0 %v8054_v60  ;;  %2145 = vmatmul.mubr.f32.vlgmr.msra.gmra.mxu1 %v7966_v13 }
  0xa9   :  { %2057 = vmatprep.mubr.f32.mxu0 %v10347_v3  ;;  %2150 = vmatprep.mubr.f32.mxu1 %v10347_v3 }
  0xaa   :  { %2306 = vmatpush1.msra.mxu1 %v8223_v53 }
  0xab   :  { %2506 = vmatprep.subr.mxu1 %v8200_v46 }
  0xac   :  { %2063 = vmatmul.mubr.f32.gmra.mxu0 %v8064_v0  ;;  %2152 = vmatmul.mubr.f32.gmra.mxu1 %v7968_v14 }
  0xad   :  { %2157 = vmatprep.mubr.f32.mxu1 %v10347_v3  ;;  %2240 = vmatprep.mubr.f32.mxu0 %v10347_v3 }
  0xb0   :  { %2159 = vmatmul.mubr.f32.gmra.mxu1 %v7980_v19  ;;  %2243 = vmatmul.mubr.f32.vlgmr.msra.gmra.mxu0 %v7987_v22 }
  0xb1   :  { %2164 = vmatprep.mubr.f32.mxu1 %v10347_v3  ;;  %2248 = vmatprep.mubr.f32.mxu0 %v10347_v3 }
  0xb2   :  { %2413 = vmatpush1.msra.mxu0 %v2107_v56 }
  0xb4   :  { %2166 = vmatmul.mubr.f32.gmra.mxu1 %v8005_v30  ;;  %2251 = vmatmul.mubr.f32.gmra.mxu0 %v7990_v23 }
  0xb5   :  { %2256 = vmatprep.mubr.f32.mxu0 %v10347_v3  ;;  %2339 = vmatprep.mubr.f32.mxu1 %v10347_v3 }
  0xb8   :  { %2259 = vmatmul.mubr.f32.gmra.mxu0 %v8003_v29  ;;  %2343 = vmatmul.mubr.f32.vlgmr.msra.gmra.mxu1 %v8000_v28 }
  0xb9   :  { %2264 = vmatprep.mubr.f32.mxu0 %v10347_v3  ;;  %2348 = vmatprep.mubr.f32.mxu1 %v10347_v3 }
  0xba   :  { %2508 = vmatpush1.msra.mxu1 %v8223_v53 }
  0xbc   :  { %2267 = vmatmul.mubr.f32.gmra.mxu0 %v8026_v40  ;;  %2352 = vmatmul.mubr.f32.gmra.mxu1 %v8008_v31 }
  0xbd   :  { %2357 = vmatprep.mubr.f32.mxu1 %v10347_v3  ;;  %2446 = vmatprep.mubr.f32.mxu0 %v10347_v3 }
  0xc0   :  { %2361 = vmatmul.mubr.f32.gmra.mxu1 %v8023_v39  ;;  %2448 = vmatmul.mubr.f32.vlgmr.msra.gmra.mxu0 %v7966_v13 }
  0xc1   :  { %2366 = vmatprep.mubr.f32.mxu1 %v10347_v3  ;;  %2453 = vmatprep.mubr.f32.mxu0 %v10347_v3 }
  0xc4   :  { %2370 = vmatmul.mubr.f32.gmra.mxu1 %v8038_v49  ;;  %2455 = vmatmul.mubr.f32.gmra.mxu0 %v7968_v14 }
  0xc5   :  { %2460 = vmatprep.mubr.f32.mxu0 %v10347_v3  ;;  %2541 = vmatprep.mubr.f32.mxu1 %v10347_v3 }
  0xc8   :  { %2462 = vmatmul.mubr.f32.gmra.mxu0 %v7980_v19  ;;  %2543 = vmatmul.mubr.f32.vlgmr.msra.gmra.mxu1 %v7966_v13 }
  0xc9   :  { %2467 = vmatprep.mubr.f32.mxu0 %v10347_v3  ;;  %2548 = vmatprep.mubr.f32.mxu1 %v10347_v3 }
  0xcc   :  { %2469 = vmatmul.mubr.f32.gmra.mxu0 %v8005_v30  ;;  %2550 = vmatmul.mubr.f32.gmra.mxu1 %v7968_v14 }
  0xcd   :  { %2555 = vmatprep.mubr.f32.mxu1 %v10347_v3  ;;  %2715 = vmatprep.mubr.f32.mxu0 %v10347_v3 }
  0xd0   :  { %v195_v22 = vpop.f32.mrf.mxu0  ;;  %2557 = vmatmul.mubr.f32.gmra.mxu1 %v7980_v19 }
  0xd1   :  { %2562 = vmatprep.mubr.f32.mxu1 %v10347_v3  ;;  %v196_v37 = vadd.f32 %v195_v22, %v8320_v27 }
  0xd2   :  { %v197_v23 = vpop.f32.mrf.mxu0 }
  0xd3   :  { %v198_v38 = vadd.f32 %v197_v23, %v8320_v27 }
  0xd4   :  { %v206_v28 = vpop.f32.mrf.mxu0  ;;  %2564 = vmatmul.mubr.f32.gmra.mxu1 %v8005_v30 }
  0xd5   :  { %2864 = vmatprep.mubr.f32.mxu1 %v10347_v3  ;;  %v207_v33 = vadd.f32 %v206_v28, %v8314_v15 }
  0xd6   :  { %v208_v13 = vpop.f32.mrf.mxu0 }
  0xd7   :  { %v209_v36 = vadd.f32 %v208_v13, %v8314_v15 }
  0xd8   :  { %v217_v29 = vpop.f32.mrf.mxu0  ;;  %v310_v31 = vpop.f32.mrf.mxu1 }
  0xd9   :  { %v218_v32 = vadd.f32 %v217_v29, %v8318_v18  ;;  %v311_v58 = vadd.f32 %v310_v31, %v196_v37  ;;  %v2632_v29 = vsel %vm2630_vm2, %v2602_v48, 0 }
  0xda   :  { %v219_v39 = vpop.f32.mrf.mxu0  ;;  %v312_v14 = vpop.f32.mrf.mxu1 }
  0xdb   :  { %v220_v47 = vadd.f32 %v219_v39, %v8318_v18  ;;  %v313_v50 = vadd.f32 %v312_v14, %v198_v38 }
  0xdc   :  { %v228_v40 = vpop.f32.mrf.mxu0  ;;  %v317_v43 = vpop.f32.mrf.mxu1 }
  0xdd   :  { %v229_v44 = vadd.f32 %v228_v40, %v8310_v7  ;;  %v318_v52 = vadd.f32 %v317_v43, %v207_v33 }
  0xde   :  { %v230_v49 = vpop.f32.mrf.mxu0  ;;  %v319_v51 = vpop.f32.mrf.mxu1 }
  0xdf   :  { %v320_v45 = vadd.f32 %v319_v51, %v209_v36 }
  0xe0   :  { %v324_v59 = vpop.f32.mrf.mxu1  ;;  %v408_v60 = vpop.f32.mrf.mxu0 }
  0xe1   :  { %v325_v46 = vadd.f32 %v324_v59, %v218_v32  ;;  %v231_v32 = vadd.f32 %v230_v49, %v8310_v7  ;;  %v409_v14 = vadd.f32 %v408_v60, %v311_v58 }
  0xe2   :  { %v326_v19 = vpop.f32.mrf.mxu1  ;;  %v410_v61 = vpop.f32.mrf.mxu0 }
  0xe3   :  { %v327_v55 = vadd.f32 %v326_v19, %v220_v47  ;;  %v411_v22 = vadd.f32 %v410_v61, %v313_v50 }
  0xe4   :  { %v331_v62 = vpop.f32.mrf.mxu1  ;;  %v416_v63 = vpop.f32.mrf.mxu0 }
  0xe5   :  { %v417_v23 = vadd.f32 %v416_v63, %v318_v52  ;;  %v332_v40 = vadd.f32 %v331_v62, %v229_v44 }
  0xe6   :  { %v8308_v0 = vpop.f32.mrf.mxu1  ;;  %v418_v30 = vpop.f32.mrf.mxu0 }
  0xe7   :  { %v419_v56 = vadd.f32 %v418_v30, %v320_v45  ;;  %v334_v63 = vadd.f32 %v8308_v0, %v231_v32  ;;  %v8343_v0 = vand.u32 4294901760, %v2632_v29 }
  0xe8   :  { %v424_v1 = vpop.f32.mrf.mxu0  ;;  %v508_v2 = vpop.f32.mrf.mxu1 }
  0xe9   :  { %v425_v57 = vadd.f32 %v424_v1, %v325_v46  ;;  %v509_v37 = vadd.f32 %v508_v2, %v409_v14  ;;  %10408 = vst [vmem:[#allocation6_spill] sm:$0xff] %v8343_v0 }
  0xea   :  { %v426_v4 = vpop.f32.mrf.mxu0  ;;  %v510_v5 = vpop.f32.mrf.mxu1 }
  0xeb   :  { %v427_v39 = vadd.f32 %v426_v4, %v327_v55  ;;  %v511_v43 = vadd.f32 %v510_v5, %v411_v22  ;;  %v2603_v5 = vld [vmem:[%s10339_s3 + $0x8] sm:$0xff] }
  0xec   :  { %v432_v8 = vpop.f32.mrf.mxu0  ;;  %v517_v9 = vpop.f32.mrf.mxu1  ;;  %v2635_v48 = vsel %vm2630_vm2, %v2603_v5, 0 }
  0xed   :  { %v518_v33 = vadd.f32 %v517_v9, %v417_v23  ;;  %v433_v30 = vadd.f32 %v432_v8, %v332_v40 }
  0xee   :  { %v8312_v10 = vpop.f32.mrf.mxu0  ;;  %v519_v12 = vpop.f32.mrf.mxu1 }
  0xef   :  { %v520_v51 = vadd.f32 %v519_v12, %v419_v56  ;;  %v435_v8 = vadd.f32 %v8312_v10, %v334_v63 }
  0xf0   :  { %v526_v16 = vpop.f32.mrf.mxu1  ;;  %v8316_v17 = vpop.f32.mrf.mxu0 }
  0xf1   :  { %v527_v59 = vadd.f32 %v526_v16, %v425_v57  ;;  %v614_v2 = vadd.f32 %v8316_v17, %v509_v37  ;;  %v8352_v17 = vsub.f32 %v2632_v29, %v8343_v0 }
  0xf2   :  { %v528_v20 = vpop.f32.mrf.mxu1  ;;  %v615_v24 = vpop.f32.mrf.mxu0 }
  0xf3   :  { %v529_v1 = vadd.f32 %v528_v20, %v427_v39  ;;  %v616_v38 = vadd.f32 %v615_v24, %v511_v43  ;;  %10409 = vst [vmem:[#allocation7_spill] sm:$0xff] %v8352_v17 }
  0xf4   :  { %v535_v25 = vpop.f32.mrf.mxu1  ;;  %v620_v26 = vpop.f32.mrf.mxu0 }
  0xf5   :  { %v621_v45 = vadd.f32 %v620_v26, %v518_v33  ;;  %v536_v12 = vadd.f32 %v535_v25, %v433_v30  ;;  %v8382_v30 = vand.u32 4294901760, %v8352_v17 }
  0xf6   :  { %v537_v34 = vpop.f32.mrf.mxu1  ;;  %v622_v35 = vpop.f32.mrf.mxu0 }
  0xf7   :  { %v623_v31 = vadd.f32 %v622_v35, %v520_v51  ;;  %10412 = vst [vmem:[#allocation10_spill] sm:$0xff] %v8382_v30 }
  0xf8   :  { %v627_v41 = vpop.f32.mrf.mxu0  ;;  %v708_v42 = vpop.f32.mrf.mxu1 }
  0xf9   :  { %v628_v61 = vadd.f32 %v627_v41, %v527_v59  ;;  %v538_v41 = vadd.f32 %v537_v34, %v435_v8  ;;  %v709_v50 = vadd.f32 %v708_v42, %v614_v2  ;;  %v2604_v34 = vld [vmem:[%s10339_s3 + $0x10] sm:$0xff]  ;;  %v8359_v42 = vand.u32 4294901760, %v2635_v48 }
  0xfa   :  { %v629_v53 = vpop.f32.mrf.mxu0  ;;  %v710_v54 = vpop.f32.mrf.mxu1  ;;  %v2638_v32 = vsel %vm2630_vm2, %v2604_v34, 0 }
  0xfb   :  { %v630_v16 = vadd.f32 %v629_v53, %v529_v1  ;;  %v711_v24 = vadd.f32 %v710_v54, %v616_v38  ;;  %10410 = vst [vmem:[#allocation8_spill] sm:$0xff] %v8359_v42  ;;  %v2570_v51 = vmax.f32 %v709_v50, 0.0  ;;  %v2605_v1 = vld [vmem:[%s10339_s3 + $0x18] sm:$0xff]  ;;  %v8393_v63 = vsub.f32 %v2635_v48, %v8359_v42 }
  0xfc   :  { %v634_v28 = vpop.f32.mrf.mxu0  ;;  %v715_v13 = vpop.f32.mrf.mxu1  ;;  %v2641_v5 = vsel %vm2630_vm2, %v2605_v1, 0 }
  0xfd   :  { %v716_v9 = vadd.f32 %v715_v13, %v621_v45  ;;  %v635_v26 = vadd.f32 %v634_v28, %v536_v12  ;;  %v2571_v54 = vmax.f32 %v711_v24, 0.0  ;;  %v8404_v12 = vand.u32 4294901760, %v2638_v32 }
  0xfe   :  { %v636_v36 = vpop.f32.mrf.mxu0  ;;  %v717_v19 = vpop.f32.mrf.mxu1  ;;  %v2719_v24 = vsub.f32 %v8352_v17, %v8382_v30 }
  0xff   :  { %v718_v49 = vadd.f32 %v717_v19, %v623_v31  ;;  %v2578_v55 = vmax.f32 %v716_v9, 0.0  ;;  %v637_v56 = vadd.f32 %v636_v36, %v538_v41  ;;  %v8387_v31 = vand.u32 4294901760, %v2571_v54 }
 0x100   :  { %v722_v62 = vpop.f32.mrf.mxu1  ;;  %v8335_v4 = vpop.f32.mrf.mxu0  ;;  %v8432_v41 = vand.u32 4294901760, %v8393_v63 }
 0x101   :  { %v723_v60 = vadd.f32 %v722_v62, %v628_v61  ;;  %v2579_v10 = vmax.f32 %v718_v49, 0.0  ;;  %v8372_v14 = vand.u32 4294901760, %v2578_v55  ;;  %10413 = vst [vmem:[#allocation11_spill] sm:$0xff] %v8387_v31 }
 0x102   :  { %v724_v20 = vpop.f32.mrf.mxu1  ;;  %v8341_v35 = vpop.f32.mrf.mxu0  ;;  %10415 = vst [vmem:[#allocation13_spill] sm:$0xff] %v8432_v41 }
 0x103   :  { %v725_v25 = vadd.f32 %v724_v20, %v630_v16  ;;  %v2586_v44 = vmax.f32 %v723_v60, 0.0  ;;  %v8367_v29 = vand.u32 4294901760, %v2579_v10  ;;  %10411 = vst [vmem:[#allocation9_spill] sm:$0xff] %v8372_v14  ;;  %v8406_v16 = vand.u32 4294901760, %v2570_v51 }
 0x104   :  { %v729_v46 = vpop.f32.mrf.mxu1  ;;  %v8346_v47 = vpop.f32.mrf.mxu0  ;;  %v8414_v8 = vsub.f32 %v2578_v55, %v8372_v14 }
 0x105   :  { %v2587_v52 = vmax.f32 %v725_v25, 0.0  ;;  %v730_v53 = vadd.f32 %v729_v46, %v635_v26  ;;  %v8361_v28 = vand.u32 4294901760, %v2586_v44  ;;  %10414 = vst [vmem:[#allocation12_spill] sm:$0xff] %v8406_v16  ;;  %v8409_v49 = vsub.f32 %v2579_v10, %v8367_v29 }
 0x106   :  { %v731_v57 = vpop.f32.mrf.mxu1  ;;  %v8349_v58 = vpop.f32.mrf.mxu0  ;;  %v8428_v25 = vsub.f32 %v2571_v54, %v8387_v31  ;;  %v8442_v10 = vsub.f32 %v2638_v32, %v8404_v12  ;;  %v2730_v32 = vsub.f32 %v8393_v63, %v8432_v41 }
 0x107   :  { %v8357_v22 = vand.u32 4294901760, %v2587_v52  ;;  %v2594_v23 = vmax.f32 %v730_v53, 0.0  ;;  %v732_v13 = vadd.f32 %v731_v57, %v637_v56  ;;  %v8396_v37 = vsub.f32 %v2586_v44, %v8361_v28 }
 0x108   :  { %v8363_v40 = vpop.f32.mrf.mxu0  ;;  %v8365_v39 = vpop.f32.mrf.mxu1  ;;  %10416 = vst [vmem:[#allocation14_spill] sm:$0xff] %v8442_v10  ;;  %v8447_v53 = vsub.f32 %v2570_v51, %v8406_v16  ;;  %v10354_v56 = vand.u32 4294901760, %v8409_v49  ;;  %v10355_v57 = vand.u32 4294901760, %v8414_v8  ;;  %v10421_v3 = vand.u32 4294901760, %v8428_v25 }
 0x109   :  { %v8369_v59 = vand.u32 4294901760, %v2594_v23  ;;  %v8375_v43 = vsub.f32 %v2587_v52, %v8357_v22  ;;  %v2595_v33 = vmax.f32 %v732_v13, 0.0  ;;  %v10349_v44 = vand.u32 4294901760, %v8396_v37 }
 0x10a   :  { %v8377_v36 = vpop.f32.mrf.mxu0  ;;  %v8379_v19 = vpop.f32.mrf.mxu1  ;;  %v8444_v52 = vand.u32 4294901760, %v2641_v5  ;;  %v2817_v6 = vsub.f32 %v8414_v8, %v10355_v57 }
 0x10b   :  { %v8390_v61 = vsub.f32 %v2594_v23, %v8369_v59  ;;  %v8398_v38 = vand.u32 4294901760, %v2595_v33  ;;  %v10345_v26 = vand.u32 4294901760, %v8375_v43  ;;  %v8460_v23 = vand.u32 4294901760, %v2719_v24 }
 0x10c   :  { %v8400_v45 = vpop.f32.mrf.mxu0  ;;  %v8402_v62 = vpop.f32.mrf.mxu1  ;;  %v2805_v1 = vsub.f32 %v8396_v37, %v10349_v44  ;;  %v2811_v44 = vsub.f32 %v8409_v49, %v10354_v56  ;;  %v2823_v56 = vsub.f32 %v8428_v25, %v10421_v3  ;;  %v10425_v3 = vmov 0.0  }
 0x10d   :  { %v10344_v60 = vand.u32 4294901760, %v8390_v61  ;;  %v8417_v9 = vsub.f32 %v2595_v33, %v8398_v38  ;;  %2668 = vmatprep.subr.mxu0 %v8398_v38  ;;  %10417 = vst [vmem:[#allocation15_spill] sm:$0xff] %v8460_v23  ;;  %v2799_v51 = vsub.f32 %v8375_v43, %v10345_v26  ;;  %v8481_v26 = vand.u32 4294901760, %v8442_v10 }
 0x10e   :  { %v8420_v20 = vpop.f32.mrf.mxu0  ;;  %v8422_v2 = vpop.f32.mrf.mxu1  ;;  %2670 = vmatpush1.msra.mxu0 %v8369_v59  ;;  %v2824_v30 = vand.u32 4294901760, %v2823_v56 }
 0x10f   :  { %2672 = vmatprep.subr.mxu0 %v8357_v22  ;;  %v10346_v50 = vand.u32 4294901760, %v8417_v9  ;;  %v2793_v55 = vsub.f32 %v8390_v61, %v10344_v60  ;;  %10418 = vst [vmem:[#allocation16_spill] sm:$0xff] %v8481_v26  ;;  %v2800_v21 = vand.u32 4294901760, %v2799_v51  ;;  %v2741_v51 = vsub.f32 %v8442_v10, %v8481_v26 }
 0x110   :  { %v8436_v46 = vpop.f32.mrf.mxu1  ;;  %v8438_v48 = vpop.f32.mrf.mxu0  ;;  %2674 = vmatpush1.msra.mxu0 %v8361_v28  ;;  %v2818_v26 = vand.u32 4294901760, %v2817_v6 }
 0x111   :  { %2676 = vmatprep.subr.mxu0 %v8367_v29  ;;  %v2787_v13 = vsub.f32 %v8417_v9, %v10346_v50  ;;  %v8484_v50 = vsub.f32 %v2641_v5, %v8444_v52  ;;  %v2794_v33 = vand.u32 4294901760, %v2793_v55  ;;  %v8500_v55 = vand.u32 4294901760, %v2730_v32 }
 0x112   :  { %v8456_v34 = vpop.f32.mrf.mxu1  ;;  %v8458_v54 = vpop.f32.mrf.mxu0  ;;  %2678 = vmatpush1.msra.mxu0 %v8372_v14  ;;  %v10424_v32 = vand.u32 4294901760, %v8447_v53 }
 0x113   :  { %2680 = vmatprep.subr.mxu0 %v8387_v31  ;;  %v2788_v60 = vand.u32 4294901760, %v2787_v13  ;;  %10419 = vst [vmem:[#allocation17_spill] sm:$0xff] %v8484_v50  ;;  %10420 = vst [vmem:[#allocation18_spill] sm:$0xff] %v8500_v55  ;;  %v8513_v41 = vand.u32 4294901760, %v8484_v50 }
 0x114   :  { %v8476_v24 = vpop.f32.mrf.mxu1  ;;  %v8478_v11 = vpop.f32.mrf.mxu0  ;;  %2682 = vmatpush1.msra.mxu0 %v8406_v16 }
 0x115   :  { %2721 = vmatmul.mubr.f32.vlgmr.msra.gmra.mxu0 %v8460_v23  ;;  %2789 = vmatprep.subr.mxu1 %v2788_v60  ;;  %v2806_v23 = vand.u32 4294901760, %v2805_v1  ;;  %10423 = vst [vmem:[#allocation20_spill] sm:$0xff] %v8513_v41 }
 0x116   :  { %v8495_v13 = vpop.f32.mrf.mxu1  ;;  %v8497_v5 = vpop.f32.mrf.mxu0  ;;  %2919 = vmatprep.subr.mxu0 %v8417_v9  ;;  %2795 = vmatpush1.msra.mxu1 %v2794_v33  ;;  %v2829_v33 = vsub.f32 %v8447_v53, %v10424_v32 }
 0x117   :  { %2922 = vmatpush1.msra.mxu0 %v8390_v61  ;;  %2801 = vmatprep.subr.mxu1 %v2800_v21  ;;  %v2812_v21 = vand.u32 4294901760, %v2811_v44  ;;  %v8531_v44 = vand.u32 4294901760, %v2741_v51 }
 0x118   :  { %v8506_v57 = vpop.f32.mrf.mxu0  ;;  %v8508_v60 = vpop.f32.mrf.mxu1  ;;  %2925 = vmatprep.subr.mxu0 %v8375_v43  ;;  %2726 = vmatprep.mubr.f32.mxu0 %v10425_v3  ;;  %v2830_v6 = vand.u32 4294901760, %v2829_v33  ;;  %v10428_v33 = vand.u32 4294901760, %v8417_v9 }
 0x119   :  { %10422 = vst [vmem:[#allocation19_spill] sm:$0xff] %v8508_v60  ;;  %2807 = vmatpush1.msra.mxu1 %v2806_v23  ;;  %2928 = vmatpush1.msra.mxu0 %v8396_v37  ;;  %10426 = vst [vmem:[#allocation21_spill] sm:$0xff] %v8531_v44  ;;  %v2752_v23 = vsub.f32 %v8484_v50, %v8513_v41 }
 0x11a   :  { %v8521_v60 = vpop.f32.mrf.mxu0  ;;  %v8523_v1 = vpop.f32.mrf.mxu1  ;;  %2732 = vmatmul.mubr.f32.gmra.mxu0 %v8500_v55  ;;  %2813 = vmatprep.subr.mxu1 %v2812_v21 }
 0x11b   :  { %2931 = vmatprep.subr.mxu0 %v8409_v49  ;;  %2819 = vmatpush1.msra.mxu1 %v2818_v26 }
 0x11c   :  { %v8527_v32 = vpop.f32.mrf.mxu0  ;;  %v8529_v10 = vpop.f32.mrf.mxu1  ;;  %2934 = vmatpush1.msra.mxu0 %v8414_v8  ;;  %2825 = vmatprep.subr.mxu1 %v2824_v30  ;;  %v8549_v30 = vand.u32 4294901760, %v2752_v23 }
 0x11d   :  { %2937 = vmatprep.subr.mxu0 %v8428_v25  ;;  %2737 = vmatprep.mubr.f32.mxu0 %v10425_v3 }
 0x11e   :  { %v8538_v56 = vpop.f32.mrf.mxu0  ;;  %v8540_v26 = vpop.f32.mrf.mxu1  ;;  %2831 = vmatpush1.msra.mxu1 %v2830_v6  ;;  %2940 = vmatpush1.msra.mxu0 %v8447_v53  ;;  %10427 = vst [vmem:[#allocation22_spill] sm:$0xff] %v8549_v30 }
 0x11f   :  { %2743 = vmatmul.mubr.f32.gmra.mxu0 %v8531_v44  ;;  %2866 = vmatmul.mubr.f32.vlgmr.msra.gmra.mxu1 %v8343_v0  ;;  %v832_v0 = vadd.f32 %v8377_v36, %v8318_v18 }
 0x120   :  { %v8545_v51 = vpop.f32.mrf.mxu1  ;;  %v8547_v21 = vpop.f32.mrf.mxu0  ;;  %3031 = vmatprep.subr.mxu1 %v8398_v38  ;;  %3142 = vmatprep.subr.mxu0 %v10428_v33 }
 0x121   :  { %3033 = vmatpush1.msra.mxu1 %v8369_v59  ;;  %2748 = vmatprep.mubr.f32.mxu0 %v10425_v3 }
 0x122   :  { %v1140_v6 = vpop.f32.mrf.mxu1  ;;  %v8556_v55 = vpop.f32.mrf.mxu0  ;;  %3035 = vmatprep.subr.mxu1 %v8357_v22  ;;  %2871 = vmatprep.mubr.f32.mxu1 %v10425_v3 }
 0x123   :  { %3037 = vmatpush1.msra.mxu1 %v8361_v28  ;;  %2754 = vmatmul.mubr.f32.gmra.mxu0 %v8549_v30 }
 0x124   :  { %v1147_v23 = vpop.f32.mrf.mxu1  ;;  %v8562_v44 = vpop.f32.mrf.mxu0  ;;  %2873 = vmatmul.mubr.f32.gmra.mxu1 %v8359_v42  ;;  %3039 = vmatprep.subr.mxu1 %v8367_v29  ;;  %v808_v42 = vadd.f32 %v8335_v4, %v8320_v27  ;;  %v10431_v4 = vand.u32 4294901760, %v8375_v43 }
 0x125   :  { %3041 = vmatpush1.msra.mxu1 %v8372_v14  ;;  %2878 = vmatprep.mubr.f32.mxu1 %v10425_v3  ;;  %v10430_v14 = vand.u32 4294901760, %v8390_v61  ;;  %v939_v61 = vadd.f32 %v8456_v34, %v832_v0 }
 0x126   :  { %v8568_v9 = vpop.f32.mrf.mxu1  ;;  %v8570_v33 = vpop.f32.mrf.mxu0  ;;  %3043 = vmatprep.subr.mxu1 %v8387_v31  ;;  %2973 = vmatprep.mubr.f32.mxu0 %v10425_v3  ;;  %v810_v31 = vadd.f32 %v8341_v35, %v8320_v27  ;;  %v841_v35 = vadd.f32 %v8400_v45, %v8310_v7 }
 0x127   :  { %3045 = vmatpush1.msra.mxu1 %v8406_v16  ;;  %2976 = vmatmul.mubr.f32.vlgmr.msra.gmra.mxu0 %v8352_v17  ;;  %v819_v17 = vadd.f32 %v8346_v47, %v8314_v15  ;;  %v830_v16 = vadd.f32 %v8363_v40, %v8318_v18  ;;  %v10432_v47 = vand.u32 4294901760, %v8396_v37  ;;  %v923_v40 = vadd.f32 %v8365_v39, %v808_v42 }
 0x128   :  { %v1239_v30 = vpop.f32.mrf.mxu0  ;;  %v8576_v41 = vpop.f32.mrf.mxu1  ;;  %2880 = vmatmul.mubr.f32.gmra.mxu1 %v8404_v12  ;;  %3146 = vmatpush1.msra.mxu0 %v10430_v14  ;;  %v821_v14 = vadd.f32 %v8349_v58, %v8314_v15  ;;  %v925_v43 = vadd.f32 %v8379_v19, %v810_v31  ;;  %v10433_v58 = vand.u32 4294901760, %v8409_v49  ;;  %v944_v37 = vadd.f32 %v8476_v24, %v841_v35  ;;  %v10437_v35 = vld [vmem:[#allocation14_spill] sm:$0xff] }
 0x129   :  { %10429 = vst [vmem:[#allocation23_spill] sm:$0xff] %v8576_v41  ;;  %3257 = vmatprep.subr.mxu1 %v8398_v38  ;;  %3150 = vmatprep.subr.mxu0 %v10431_v4  ;;  %v937_v38 = vadd.f32 %v8436_v46, %v830_v16  ;;  %v930_v0 = vadd.f32 %v8402_v62, %v819_v17  ;;  %v10434_v31 = vand.u32 4294901760, %v8414_v8  ;;  %v10435_v24 = vand.u32 4294901760, %v8428_v25 }
 0x12a   :  { %v1241_v36 = vpop.f32.mrf.mxu0  ;;  %v8594_v41 = vpop.f32.mrf.mxu1  ;;  %3154 = vmatpush1.msra.mxu0 %v10432_v47  ;;  %2885 = vmatprep.mubr.f32.mxu1 %v10425_v3  ;;  %v1039_v34 = vadd.f32 %v8521_v60, %v939_v61  ;;  %v843_v42 = vadd.f32 %v8420_v20, %v8310_v7  ;;  %v932_v39 = vadd.f32 %v8422_v2, %v821_v14  ;;  %v10436_v60 = vand.u32 4294901760, %v8447_v53  ;;  %v10438_v61 = vld [vmem:[#allocation10_spill] sm:$0xff] }
 0x12b   :  { %2981 = vmatprep.mubr.f32.mxu0 %v10425_v3  ;;  %3158 = vmatprep.subr.mxu0 %v10433_v58  ;;  %v1037_v19 = vadd.f32 %v8506_v57, %v937_v38  ;;  %v1021_v16 = vadd.f32 %v8438_v48, %v923_v40  ;;  %v1045_v49 = vadd.f32 %v8527_v32, %v944_v37 }
 0x12c   :  { %v1246_v4 = vpop.f32.mrf.mxu0  ;;  %v8610_v45 = vpop.f32.mrf.mxu1  ;;  %2887 = vmatmul.mubr.f32.gmra.mxu1 %v8444_v52  ;;  %2984 = vmatmul.mubr.f32.gmra.mxu0 %v8393_v63  ;;  %v1141_v46 = vadd.f32 %v1140_v6, %v1039_v34  ;;  %v1023_v20 = vadd.f32 %v8458_v54, %v925_v43  ;;  %v946_v2 = vadd.f32 %v8495_v13, %v843_v42  ;;  %v10439_v43 = vld [vmem:[#allocation19_spill] sm:$0xff] }
 0x12d   :  { %3162 = vmatpush1.msra.mxu0 %v10434_v31  ;;  %2989 = vmatprep.mubr.f32.mxu0 %v10425_v3  ;;  %v1031_v8 = vadd.f32 %v8497_v5, %v932_v39  ;;  %v1139_v57 = vadd.f32 %v8545_v51, %v1037_v19  ;;  %v1029_v32 = vadd.f32 %v8478_v11, %v930_v0  ;;  %v10442_v39 = vld [vmem:[#allocation11_spill] sm:$0xff] }
 0x12e   :  { %v1248_v17 = vpop.f32.mrf.mxu0  ;;  %v1329_v62 = vpop.f32.mrf.mxu1  ;;  %3166 = vmatprep.subr.mxu0 %v10435_v24  ;;  %3078 = vmatprep.mubr.f32.mxu1 %v10425_v3  ;;  %v1148_v25 = vadd.f32 %v1147_v23, %v1045_v49  ;;  %v1242_v6 = vadd.f32 %v1241_v36, %v1141_v46  ;;  %v1047_v54 = vadd.f32 %v8538_v56, %v946_v2  ;;  %v10445_v49 = vld [vmem:[#allocation6_spill] sm:$0xff] }
 0x12f   :  { %3170 = vmatpush1.msra.mxu0 %v10436_v60  ;;  %v1132_v13 = vadd.f32 %v8540_v26, %v1031_v8  ;;  %v1240_v5 = vadd.f32 %v1239_v30, %v1139_v57  ;;  %v1130_v11 = vadd.f32 %v8529_v10, %v1029_v32  ;;  %v1123_v56 = vadd.f32 %v8523_v1, %v1023_v20 }
 0x130   :  { %v1334_v48 = vpop.f32.mrf.mxu1  ;;  %v8635_v14 = vpop.f32.mrf.mxu0  ;;  %2992 = vmatmul.mubr.f32.gmra.mxu0 %v10437_v35  ;;  %3082 = vmatmul.mubr.f32.vlgmr.msra.gmra.mxu1 %v10438_v61  ;;  %v1247_v23 = vadd.f32 %v1246_v4, %v1148_v25  ;;  %v1150_v26 = vadd.f32 %v8568_v9, %v1047_v54  ;;  %v1121_v10 = vadd.f32 %v10439_v43, %v1021_v16 }
 0x131   :  { %3259 = vmatpush1.msra.mxu1 %v8369_v59  ;;  %2997 = vmatprep.mubr.f32.mxu0 %v10425_v3  ;;  %v1235_v30 = vadd.f32 %v8570_v33, %v1132_v13  ;;  %v1335_v59 = vadd.f32 %v1334_v48, %v1240_v5  ;;  %v1233_v38 = vadd.f32 %v8562_v44, %v1130_v11  ;;  %v10440_v33 = vld [vmem:[#allocation13_spill] sm:$0xff]  ;;  %v10447_v5 = vld [vmem:[#allocation8_spill] sm:$0xff] }
 0x132   :  { %v1336_v53 = vpop.f32.mrf.mxu1  ;;  %v8644_v51 = vpop.f32.mrf.mxu0  ;;  %3261 = vmatprep.subr.mxu1 %v8357_v22  ;;  %3087 = vmatprep.mubr.f32.mxu1 %v10425_v3  ;;  %v1228_v1 = vadd.f32 %v8556_v55, %v1123_v56  ;;  %v1249_v9 = vadd.f32 %v1248_v17, %v1150_v26  ;;  %v1226_v37 = vadd.f32 %v8547_v21, %v1121_v10  ;;  %v10444_v21 = vld [vmem:[#allocation12_spill] sm:$0xff] }
 0x133   :  { %v1337_v36 = vadd.f32 %v1336_v53, %v1242_v6  ;;  %3263 = vmatpush1.msra.mxu1 %v8361_v28  ;;  %v1330_v58 = vadd.f32 %v1329_v62, %v1235_v30  ;;  %v1328_v44 = vadd.f32 %v8610_v45, %v1233_v38  ;;  %v2588_v42 = vmax.f32 %v1335_v59, 0.0  ;;  %v10443_v62 = vld [vmem:[#allocation23_spill] sm:$0xff] }
 0x134   :  { %v1341_v47 = vpop.f32.mrf.mxu1  ;;  %v8653_v40 = vpop.f32.mrf.mxu0  ;;  %3265 = vmatprep.subr.mxu1 %v8367_v29  ;;  %3000 = vmatmul.mubr.f32.gmra.mxu0 %v8484_v50  ;;  %v10441_v29 = vld [vmem:[#allocation9_spill] sm:$0xff]  ;;  %v1323_v55 = vadd.f32 %v8594_v41, %v1228_v1  ;;  %v1321_v16 = vadd.f32 %v10443_v62, %v1226_v37  ;;  %v10446_v41 = vld [vmem:[#allocation16_spill] sm:$0xff] }
 0x135   :  { %v1342_v22 = vadd.f32 %v1341_v47, %v1247_v23  ;;  %3091 = vmatmul.mubr.f32.gmra.mxu1 %v10440_v33  ;;  %v2589_v28 = vmax.f32 %v1337_v36, 0.0  ;;  %3203 = vmatprep.mubr.f32.mxu0 %v10425_v3  ;;  %v2581_v46 = vmax.f32 %v1330_v58, 0.0  ;;  %v2580_v57 = vmax.f32 %v1328_v44, 0.0  ;;  %v10448_v36 = vld [vmem:[#allocation20_spill] sm:$0xff] }
 0x136   :  { %v1343_v4 = vpop.f32.mrf.mxu1  ;;  %v8662_v0 = vpop.f32.mrf.mxu0  ;;  %3267 = vmatpush1.msra.mxu1 %v10441_v29  ;;  %3096 = vmatprep.mubr.f32.mxu1 %v10425_v3  ;;  %v2573_v60 = vmax.f32 %v1323_v55, 0.0  ;;  %v8688_v48 = vand.u32 4294901760, %v2588_v42  ;;  %v2572_v54 = vmax.f32 %v1321_v16, 0.0 }
 0x137   :  { %v2596_v34 = vmax.f32 %v1342_v22, 0.0  ;;  %3269 = vmatprep.subr.mxu1 %v10442_v39  ;;  %v1344_v19 = vadd.f32 %v1343_v4, %v1249_v9  ;;  %v8679_v24 = vand.u32 4294901760, %v2589_v28  ;;  %v8700_v53 = vand.u32 4294901760, %v2581_v46 }
 0x138   :  { %v8670_v31 = vpop.f32.mrf.mxu0  ;;  %v8672_v17 = vpop.f32.mrf.mxu1  ;;  %3271 = vmatpush1.msra.mxu1 %v10444_v21  ;;  %3205 = vmatmul.mubr.f32.vlgmr.msra.gmra.mxu0 %v10445_v49  ;;  %v8714_v30 = vand.u32 4294901760, %v2580_v57  ;;  %v8718_v59 = vand.u32 4294901760, %v2573_v60  ;;  %v8721_v47 = vsub.f32 %v2588_v42, %v8688_v48  ;;  %v8729_v22 = vand.u32 4294901760, %v2572_v54 }
 0x139   :  { %v8676_v45 = vand.u32 4294901760, %v2596_v34  ;;  %3100 = vmatmul.mubr.f32.gmra.mxu1 %v10446_v41  ;;  %v2597_v20 = vmax.f32 %v1344_v19, 0.0  ;;  %3210 = vmatprep.mubr.f32.mxu0 %v10425_v3  ;;  %v8703_v11 = vsub.f32 %v2589_v28, %v8679_v24  ;;  %v8735_v9 = vsub.f32 %v2581_v46, %v8700_v53 }
 0x13a   :  { %v8683_v2 = vpop.f32.mrf.mxu0  ;;  %v8685_v8 = vpop.f32.mrf.mxu1  ;;  %3105 = vmatprep.mubr.f32.mxu1 %v10425_v3  ;;  %v8748_v44 = vsub.f32 %v2580_v57, %v8714_v30  ;;  %v8753_v29 = vsub.f32 %v2573_v60, %v8718_v59  ;;  %v8762_v39 = vsub.f32 %v2572_v54, %v8729_v22 }
 0x13b   :  { %v8690_v32 = vand.u32 4294901760, %v2597_v20  ;;  %v8697_v13 = vsub.f32 %v2596_v34, %v8676_v45  ;;  %v10383_v37 = vand.u32 4294901760, %v8703_v11  ;;  %v10386_v34 = vand.u32 4294901760, %v8721_v47 }
 0x13c   :  { %v8692_v25 = vpop.f32.mrf.mxu0  ;;  %v8694_v6 = vpop.f32.mrf.mxu1  ;;  %3212 = vmatmul.mubr.f32.gmra.mxu0 %v10447_v5  ;;  %v10454_v50 = vand.u32 4294901760, %v8762_v39 }
 0x13d   :  { %v8706_v23 = vsub.f32 %v2597_v20, %v8690_v32  ;;  %3109 = vmatmul.mubr.f32.gmra.mxu1 %v10448_v36  ;;  %3217 = vmatprep.mubr.f32.mxu0 %v10425_v3  ;;  %v10384_v1 = vand.u32 4294901760, %v8697_v13  ;;  %v3489_v46 = vsub.f32 %v8703_v11, %v10383_v37  ;;  %v10387_v20 = vand.u32 4294901760, %v8735_v9 }
 0x13e   :  { %v8710_v56 = vpop.f32.mrf.mxu0  ;;  %v8712_v26 = vpop.f32.mrf.mxu1  ;;  %3304 = vmatprep.mubr.f32.mxu1 %v10425_v3  ;;  %3358 = vmatprep.subr.mxu0 %v8690_v32  ;;  %v3495_v60 = vsub.f32 %v8721_v47, %v10386_v34  ;;  %v10452_v37 = vand.u32 4294901760, %v8748_v44 }
 0x13f   :  { %3360 = vmatpush1.msra.mxu0 %v8676_v45  ;;  %v10385_v38 = vand.u32 4294901760, %v8706_v23  ;;  %v3483_v19 = vsub.f32 %v8697_v13, %v10384_v1  ;;  %v3490_v34 = vand.u32 4294901760, %v3489_v46  ;;  %v3501_v36 = vsub.f32 %v8735_v9, %v10387_v20 }
 0x140   :  { %v8724_v43 = vpop.f32.mrf.mxu1  ;;  %v8726_v10 = vpop.f32.mrf.mxu0  ;;  %3219 = vmatmul.mubr.f32.gmra.mxu0 %v8404_v12  ;;  %3362 = vmatprep.subr.mxu0 %v8679_v24  ;;  %v3507_v1 = vsub.f32 %v8748_v44, %v10452_v37 }
 0x141   :  { %3306 = vmatmul.mubr.f32.vlgmr.msra.gmra.mxu1 %v10445_v49  ;;  %3224 = vmatprep.mubr.f32.mxu0 %v10425_v3  ;;  %v3477_v4 = vsub.f32 %v8706_v23, %v10385_v38  ;;  %v10450_v38 = vld [vmem:[#allocation15_spill] sm:$0xff]  ;;  %v3484_v57 = vand.u32 4294901760, %v3483_v19  ;;  %v3496_v19 = vand.u32 4294901760, %v3495_v60  ;;  %v3502_v37 = vand.u32 4294901760, %v3501_v36  ;;  %v10455_v60 = vld [vmem:[#allocation18_spill] sm:$0xff] }
 0x142   :  { %v8739_v58 = vpop.f32.mrf.mxu1  ;;  %v8741_v28 = vpop.f32.mrf.mxu0  ;;  %3311 = vmatprep.mubr.f32.mxu1 %v10425_v3  ;;  %3364 = vmatpush1.msra.mxu0 %v8688_v48 }
 0x143   :  { %3366 = vmatprep.subr.mxu0 %v8700_v53  ;;  %v3478_v62 = vand.u32 4294901760, %v3477_v4 }
 0x144   :  { %v8757_v55 = vpop.f32.mrf.mxu1  ;;  %v8759_v42 = vpop.f32.mrf.mxu0  ;;  %3226 = vmatmul.mubr.f32.gmra.mxu0 %v8444_v52 }
 0x145   :  { %3313 = vmatmul.mubr.f32.gmra.mxu1 %v10447_v5  ;;  %3368 = vmatpush1.msra.mxu0 %v8714_v30 }
 0x146   :  { %v8770_v16 = vpop.f32.mrf.mxu1  ;;  %v8772_v21 = vpop.f32.mrf.mxu0  ;;  %3370 = vmatprep.subr.mxu0 %v8718_v59  ;;  %3318 = vmatprep.mubr.f32.mxu1 %v10425_v3 }
 0x147   :  { %3372 = vmatpush1.msra.mxu0 %v8729_v22  ;;  %3405 = vmatprep.mubr.f32.mxu0 %v10425_v3 }
 0x148   :  { %v8786_v54 = vpop.f32.mrf.mxu0  ;;  %v8788_v4 = vpop.f32.mrf.mxu1  ;;  %3411 = vmatmul.mubr.f32.vlgmr.msra.gmra.mxu0 %v10450_v38  ;;  %3479 = vmatprep.subr.mxu1 %v3478_v62  ;;  %v10453_v62 = vand.u32 4294901760, %v8753_v29 }
 0x149   :  { %10449 = vst [vmem:[#allocation19_spill] sm:$0xff] %v8788_v4  ;;  %3320 = vmatmul.mubr.f32.gmra.mxu1 %v8404_v12  ;;  %3609 = vmatprep.subr.mxu0 %v8706_v23 }
 0x14a   :  { %v8798_v41 = vpop.f32.mrf.mxu0  ;;  %v8800_v33 = vpop.f32.mrf.mxu1  ;;  %3485 = vmatpush1.msra.mxu1 %v3484_v57  ;;  %3612 = vmatpush1.msra.mxu0 %v8697_v13  ;;  %v3513_v46 = vsub.f32 %v8753_v29, %v10453_v62  ;;  %v3508_v62 = vand.u32 4294901760, %v3507_v1 }
 0x14b   :  { %10451 = vst [vmem:[#allocation9_spill] sm:$0xff] %v8800_v33  ;;  %3491 = vmatprep.subr.mxu1 %v3490_v34  ;;  %3615 = vmatprep.subr.mxu0 %v8703_v11  ;;  %v3519_v33 = vsub.f32 %v8762_v39, %v10454_v50 }
 0x14c   :  { %v8810_v20 = vpop.f32.mrf.mxu0  ;;  %v8812_v38 = vpop.f32.mrf.mxu1  ;;  %3325 = vmatprep.mubr.f32.mxu1 %v10425_v3  ;;  %3416 = vmatprep.mubr.f32.mxu0 %v10425_v3  ;;  %v3514_v50 = vand.u32 4294901760, %v3513_v46 }
 0x14d   :  { %3497 = vmatpush1.msra.mxu1 %v3496_v19  ;;  %3618 = vmatpush1.msra.mxu0 %v8721_v47  ;;  %v3520_v36 = vand.u32 4294901760, %v3519_v33  ;;  %v10459_v33 = vand.u32 4294901760, %v8706_v23  ;;  %v1444_v23 = vadd.f32 %v8683_v2, %v8318_v18 }
 0x14e   :  { %v8820_v34 = vpop.f32.mrf.mxu0  ;;  %v8822_v57 = vpop.f32.mrf.mxu1  ;;  %3327 = vmatmul.mubr.f32.gmra.mxu1 %v8444_v52  ;;  %3422 = vmatmul.mubr.f32.gmra.mxu0 %v10455_v60  ;;  %v1442_v60 = vadd.f32 %v8670_v31, %v8318_v18  ;;  %v1453_v31 = vadd.f32 %v8692_v25, %v8310_v7 }
 0x14f   :  { %3503 = vmatprep.subr.mxu1 %v3502_v37  ;;  %3621 = vmatprep.subr.mxu0 %v8735_v9  ;;  %v10458_v37 = vld [vmem:[#allocation21_spill] sm:$0xff] }
 0x150   :  { %v1750_v4 = vpop.f32.mrf.mxu1  ;;  %v8827_v61 = vpop.f32.mrf.mxu0  ;;  %3509 = vmatpush1.msra.mxu1 %v3508_v62  ;;  %3624 = vmatpush1.msra.mxu0 %v8748_v44  ;;  %v1549_v2 = vadd.f32 %v8724_v43, %v1442_v60 }
 0x151   :  { %10456 = vst [vmem:[#allocation11_spill] sm:$0xff] %v8827_v61  ;;  %3515 = vmatprep.subr.mxu1 %v3514_v50  ;;  %3627 = vmatprep.subr.mxu0 %v8753_v29  ;;  %v1433_v61 = vadd.f32 %v8662_v0, %v8314_v15  ;;  %v1431_v0 = vadd.f32 %v8653_v40, %v8314_v15 }
 0x152   :  { %v1752_v19 = vpop.f32.mrf.mxu1  ;;  %v8831_v35 = vpop.f32.mrf.mxu0  ;;  %3427 = vmatprep.mubr.f32.mxu0 %v10425_v3  ;;  %3521 = vmatpush1.msra.mxu1 %v3520_v36  ;;  %v1649_v60 = vadd.f32 %v8786_v54, %v1549_v2 }
 0x153   :  { %10457 = vst [vmem:[#allocation23_spill] sm:$0xff] %v8831_v35  ;;  %3554 = vmatprep.mubr.f32.mxu1 %v10425_v3  ;;  %3630 = vmatpush1.msra.mxu0 %v8762_v39  ;;  %v1544_v18 = vadd.f32 %v8712_v26, %v1433_v61  ;;  %v1455_v61 = vadd.f32 %v8710_v56, %v8310_v7 }
 0x154   :  { %v1759_v1 = vpop.f32.mrf.mxu1  ;;  %v8836_v46 = vpop.f32.mrf.mxu0  ;;  %3433 = vmatmul.mubr.f32.gmra.mxu0 %v10458_v37  ;;  %3556 = vmatmul.mubr.f32.vlgmr.msra.gmra.mxu1 %v10445_v49  ;;  %v1420_v49 = vadd.f32 %v8635_v14, %v8320_v27  ;;  %v1422_v14 = vadd.f32 %v8644_v51, %v8320_v27  ;;  %v10462_v51 = vld [vmem:[#allocation7_spill] sm:$0xff]  ;;  %v10463_v27 = vand.u32 4294901760, %v8697_v13  ;;  %v10465_v13 = vand.u32 4294901760, %v8721_v47 }
 0x155   :  { %3721 = vmatprep.subr.mxu1 %v8690_v32  ;;  %3832 = vmatprep.subr.mxu0 %v10459_v33  ;;  %v10461_v33 = vld [vmem:[#allocation22_spill] sm:$0xff]  ;;  %v1643_v26 = vadd.f32 %v8772_v21, %v1544_v18  ;;  %v1558_v18 = vadd.f32 %v8770_v16, %v1455_v61 }
 0x156   :  { %v8843_v62 = vpop.f32.mrf.mxu1  ;;  %v1846_v50 = vpop.f32.mrf.mxu0  ;;  %3723 = vmatpush1.msra.mxu1 %v8676_v45  ;;  %3438 = vmatprep.mubr.f32.mxu0 %v10425_v3  ;;  %v1535_v40 = vadd.f32 %v8672_v17, %v1420_v49  ;;  %v10464_v17 = vand.u32 4294901760, %v8703_v11  ;;  %v1537_v49 = vadd.f32 %v8685_v8, %v1422_v14  ;;  %v1542_v11 = vadd.f32 %v8694_v6, %v1431_v0 }
 0x157   :  { %3725 = vmatprep.subr.mxu1 %v8679_v24  ;;  %3561 = vmatprep.mubr.f32.mxu1 %v10425_v3  ;;  %v1744_v56 = vadd.f32 %v8822_v57, %v1643_v26  ;;  %v1659_v16 = vadd.f32 %v8820_v34, %v1558_v18 }
 0x158   :  { %v1851_v36 = vpop.f32.mrf.mxu0  ;;  %v8849_v37 = vpop.f32.mrf.mxu1  ;;  %3727 = vmatpush1.msra.mxu1 %v8688_v48  ;;  %3444 = vmatmul.mubr.f32.gmra.mxu0 %v10461_v33  ;;  %v1551_v33 = vadd.f32 %v8739_v58, %v1444_v23  ;;  %v1556_v58 = vadd.f32 %v8757_v55, %v1453_v31  ;;  %v1641_v6 = vadd.f32 %v8759_v42, %v1542_v11 }
 0x159   :  { %10460 = vst [vmem:[#allocation12_spill] sm:$0xff] %v8849_v37  ;;  %3563 = vmatmul.mubr.f32.gmra.mxu1 %v10447_v5  ;;  %3729 = vmatprep.subr.mxu1 %v8700_v53  ;;  %v1847_v57 = vadd.f32 %v1846_v50, %v1744_v56  ;;  %v1762_v34 = vadd.f32 %v8843_v62, %v1659_v16  ;;  %v10468_v50 = vand.u32 4294901760, %v8753_v29  ;;  %v10470_v29 = vld [vmem:[#allocation14_spill] sm:$0xff] }
 0x15a   :  { %v1853_v37 = vpop.f32.mrf.mxu0  ;;  %v8863_v35 = vpop.f32.mrf.mxu1  ;;  %3731 = vmatpush1.msra.mxu1 %v8714_v30  ;;  %3568 = vmatprep.mubr.f32.mxu1 %v10425_v3  ;;  %v1651_v23 = vadd.f32 %v8798_v41, %v1551_v33  ;;  %v1657_v41 = vadd.f32 %v8810_v20, %v1556_v58  ;;  %v1751_v33 = vadd.f32 %v1750_v4, %v1649_v60  ;;  %v10469_v58 = vand.u32 4294901760, %v8762_v39 }
 0x15b   :  { %3733 = vmatprep.subr.mxu1 %v8718_v59  ;;  %3663 = vmatprep.mubr.f32.mxu0 %v10425_v3  ;;  %v1633_v0 = vadd.f32 %v8726_v10, %v1535_v40  ;;  %v1742_v62 = vadd.f32 %v8812_v38, %v1641_v6  ;;  %v10473_v10 = vld [vmem:[#allocation9_spill] sm:$0xff]  ;;  %v10479_v6 = vld [vmem:[#allocation6_spill] sm:$0xff] }
 0x15c   :  { %v1858_v25 = vpop.f32.mrf.mxu0  ;;  %v8878_v43 = vpop.f32.mrf.mxu1  ;;  %3735 = vmatpush1.msra.mxu1 %v8729_v22  ;;  %3666 = vmatmul.mubr.f32.vlgmr.msra.gmra.mxu0 %v10462_v51  ;;  %v1753_v31 = vadd.f32 %v1752_v19, %v1651_v23  ;;  %v1760_v20 = vadd.f32 %v1759_v1, %v1657_v41  ;;  %v1852_v4 = vadd.f32 %v1851_v36, %v1751_v33  ;;  %v10467_v1 = vand.u32 4294901760, %v8748_v44  ;;  %v10471_v23 = vld [vmem:[#allocation10_spill] sm:$0xff]  ;;  %v10472_v41 = vld [vmem:[#allocation19_spill] sm:$0xff] }
 0x15d   :  { %3570 = vmatmul.mubr.f32.gmra.mxu1 %v8404_v12  ;;  %3836 = vmatpush1.msra.mxu0 %v10463_v27  ;;  %v1733_v33 = vadd.f32 %v10472_v41, %v1633_v0  ;;  %v1845_v38 = vadd.f32 %v8836_v46, %v1742_v62  ;;  %v10475_v46 = vld [vmem:[#allocation11_spill] sm:$0xff] }
 0x15e   :  { %v1860_v55 = vpop.f32.mrf.mxu0  ;;  %v1941_v54 = vpop.f32.mrf.mxu1  ;;  %3947 = vmatprep.subr.mxu1 %v8690_v32  ;;  %3840 = vmatprep.subr.mxu0 %v10464_v17  ;;  %v10466_v32 = vand.u32 4294901760, %v8735_v9  ;;  %v1854_v8 = vadd.f32 %v1853_v37, %v1753_v31  ;;  %v1859_v36 = vadd.f32 %v1858_v25, %v1760_v20  ;;  %v1635_v25 = vadd.f32 %v8741_v28, %v1537_v49 }
 0x15f   :  { %3844 = vmatpush1.msra.mxu0 %v10465_v13  ;;  %3575 = vmatprep.mubr.f32.mxu1 %v10425_v3  ;;  %v8923_v2 = vadd.f32 %v1941_v54, %v1847_v57  ;;  %v1861_v61 = vadd.f32 %v1860_v55, %v1762_v34  ;;  %v1940_v20 = vadd.f32 %v8878_v43, %v1845_v38 }
 0x160   :  { %v1946_v27 = vpop.f32.mrf.mxu1  ;;  %v8902_v21 = vpop.f32.mrf.mxu0  ;;  %3671 = vmatprep.mubr.f32.mxu0 %v10425_v3  ;;  %3848 = vmatprep.subr.mxu0 %v10466_v32  ;;  %v1735_v40 = vadd.f32 %v10473_v10, %v1635_v25  ;;  %v10478_v43 = vld [vmem:[#allocation12_spill] sm:$0xff] }
 0x161   :  { %3577 = vmatmul.mubr.f32.gmra.mxu1 %v8444_v52  ;;  %3674 = vmatmul.mubr.f32.gmra.mxu0 %v8393_v63  ;;  %v8916_v9 = vadd.f32 %v1946_v27, %v1852_v4  ;;  %v2583_v31 = vmax.f32 %v8923_v2, 0.0  ;;  %v1838_v27 = vadd.f32 %v10475_v46, %v1733_v33  ;;  %v10480_v25 = vld [vmem:[#allocation16_spill] sm:$0xff] }
 0x162   :  { %v1948_v47 = vpop.f32.mrf.mxu1  ;;  %v8911_v19 = vpop.f32.mrf.mxu0  ;;  %3852 = vmatpush1.msra.mxu0 %v10467_v1  ;;  %3679 = vmatprep.mubr.f32.mxu0 %v10425_v3 }
 0x163   :  { %v1949_v37 = vadd.f32 %v1948_v47, %v1854_v8  ;;  %3856 = vmatprep.subr.mxu0 %v10468_v50  ;;  %3768 = vmatprep.mubr.f32.mxu1 %v10425_v3  ;;  %v2590_v28 = vmax.f32 %v8916_v9, 0.0  ;;  %v8972_v47 = vand.u32 4294901760, %v2583_v31 }
 0x164   :  { %v1953_v14 = vpop.f32.mrf.mxu1  ;;  %v8925_v44 = vpop.f32.mrf.mxu0  ;;  %3860 = vmatpush1.msra.mxu0 %v10469_v58 }
 0x165   :  { %v2591_v42 = vmax.f32 %v1949_v37, 0.0  ;;  %v1954_v60 = vadd.f32 %v1953_v14, %v1859_v36  ;;  %3682 = vmatmul.mubr.f32.gmra.mxu0 %v10470_v29  ;;  %3772 = vmatmul.mubr.f32.vlgmr.msra.gmra.mxu1 %v10471_v23  ;;  %v8964_v16 = vand.u32 4294901760, %v2590_v28  ;;  %v2582_v37 = vmax.f32 %v1940_v20, 0.0 }
 0x166   :  { %v1955_v26 = vpop.f32.mrf.mxu1  ;;  %v8934_v54 = vpop.f32.mrf.mxu0  ;;  %3949 = vmatpush1.msra.mxu1 %v8676_v45  ;;  %3687 = vmatprep.mubr.f32.mxu0 %v10425_v3  ;;  %v10474_v45 = vld [vmem:[#allocation23_spill] sm:$0xff] }
 0x167   :  { %v2598_v39 = vmax.f32 %v1954_v60, 0.0  ;;  %3951 = vmatprep.subr.mxu1 %v8679_v24  ;;  %3777 = vmatprep.mubr.f32.mxu1 %v10425_v3  ;;  %v8945_v55 = vand.u32 4294901760, %v2591_v42  ;;  %v1956_v17 = vadd.f32 %v1955_v26, %v1861_v61  ;;  %v1840_v56 = vadd.f32 %v10474_v45, %v1735_v40  ;;  %v10476_v24 = vld [vmem:[#allocation17_spill] sm:$0xff] }
 0x168   :  { %v8947_v49 = vpop.f32.mrf.mxu0  ;;  %v8949_v18 = vpop.f32.mrf.mxu1  ;;  %3953 = vmatpush1.msra.mxu1 %v8688_v48  ;;  %v10477_v48 = vld [vmem:[#allocation13_spill] sm:$0xff]  ;;  %v8996_v14 = vsub.f32 %v2590_v28, %v8964_v16  ;;  %v9013_v61 = vand.u32 4294901760, %v2582_v37 }
 0x169   :  { %v8953_v13 = vand.u32 4294901760, %v2598_v39  ;;  %3955 = vmatprep.subr.mxu1 %v8700_v53  ;;  %3690 = vmatmul.mubr.f32.gmra.mxu0 %v10476_v24  ;;  %v2599_v4 = vmax.f32 %v1956_v17, 0.0  ;;  %v1935_v11 = vadd.f32 %v8863_v35, %v1840_v56  ;;  %v1933_v53 = vadd.f32 %v10478_v43, %v1838_v27 }
 0x16a   :  { %v8959_v32 = vpop.f32.mrf.mxu0  ;;  %v8961_v8 = vpop.f32.mrf.mxu1  ;;  %3781 = vmatmul.mubr.f32.gmra.mxu1 %v10477_v48  ;;  %3893 = vmatprep.mubr.f32.mxu0 %v10425_v3  ;;  %v8976_v1 = vsub.f32 %v2591_v42, %v8945_v55  ;;  %v10395_v40 = vand.u32 4294901760, %v8996_v14  ;;  %v9046_v27 = vsub.f32 %v2582_v37, %v9013_v61 }
 0x16b   :  { %v8968_v57 = vsub.f32 %v2598_v39, %v8953_v13  ;;  %3957 = vmatpush1.msra.mxu1 %v8714_v30  ;;  %3786 = vmatprep.mubr.f32.mxu1 %v10425_v3  ;;  %v8979_v35 = vand.u32 4294901760, %v2599_v4  ;;  %v2575_v2 = vmax.f32 %v1935_v11, 0.0  ;;  %v10481_v39 = vld [vmem:[#allocation20_spill] sm:$0xff] }
 0x16c   :  { %v8981_v36 = vpop.f32.mrf.mxu0  ;;  %v8983_v9 = vpop.f32.mrf.mxu1  ;;  %3959 = vmatprep.subr.mxu1 %v8718_v59  ;;  %v2574_v59 = vmax.f32 %v1933_v53, 0.0  ;;  %v10396_v62 = vand.u32 4294901760, %v8976_v1  ;;  %v4185_v43 = vsub.f32 %v8996_v14, %v10395_v40 }
 0x16d   :  { %3961 = vmatpush1.msra.mxu1 %v8729_v22  ;;  %3895 = vmatmul.mubr.f32.vlgmr.msra.gmra.mxu0 %v10479_v6  ;;  %v8989_v30 = vsub.f32 %v2599_v4, %v8979_v35  ;;  %v10397_v0 = vand.u32 4294901760, %v8968_v57  ;;  %v9002_v22 = vsub.f32 %v2583_v31, %v8972_v47  ;;  %v9024_v10 = vand.u32 4294901760, %v2575_v2 }
 0x16e   :  { %v8991_v34 = vpop.f32.mrf.mxu0  ;;  %v8993_v50 = vpop.f32.mrf.mxu1  ;;  %3790 = vmatmul.mubr.f32.gmra.mxu1 %v10480_v25  ;;  %3900 = vmatprep.mubr.f32.mxu0 %v10425_v3  ;;  %v9032_v38 = vand.u32 4294901760, %v2574_v59  ;;  %v4179_v56 = vsub.f32 %v8976_v1, %v10396_v62 }
 0x16f   :  { %3795 = vmatprep.mubr.f32.mxu1 %v10425_v3  ;;  %4048 = vmatprep.subr.mxu0 %v8979_v35  ;;  %v10399_v60 = vand.u32 4294901760, %v8989_v30  ;;  %v4173_v28 = vsub.f32 %v8968_v57, %v10397_v0  ;;  %v10398_v46 = vand.u32 4294901760, %v9002_v22  ;;  %v9054_v11 = vsub.f32 %v2575_v2, %v9024_v10 }
 0x170   :  { %v9006_v58 = vpop.f32.mrf.mxu1  ;;  %v9008_v42 = vpop.f32.mrf.mxu0  ;;  %4050 = vmatpush1.msra.mxu0 %v8953_v13  ;;  %v9062_v37 = vsub.f32 %v2574_v59, %v9032_v38 }
 0x171   :  { %3902 = vmatmul.mubr.f32.gmra.mxu0 %v10447_v5  ;;  %4052 = vmatprep.subr.mxu0 %v8945_v55  ;;  %v4167_v33 = vsub.f32 %v8989_v30, %v10399_v60  ;;  %v4174_v53 = vand.u32 4294901760, %v4173_v28  ;;  %v4191_v40 = vsub.f32 %v9002_v22, %v10398_v46  ;;  %v10400_v28 = vand.u32 4294901760, %v9046_v27 }
 0x172   :  { %v9017_v26 = vpop.f32.mrf.mxu1  ;;  %v9019_v41 = vpop.f32.mrf.mxu0  ;;  %3799 = vmatmul.mubr.f32.gmra.mxu1 %v10481_v39  ;;  %3907 = vmatprep.mubr.f32.mxu0 %v10425_v3  ;;  %v10484_v39 = vld [vmem:[#allocation15_spill] sm:$0xff] }
 0x173   :  { %3994 = vmatprep.mubr.f32.mxu1 %v10425_v3  ;;  %4054 = vmatpush1.msra.mxu0 %v8964_v16  ;;  %v4168_v45 = vand.u32 4294901760, %v4167_v33  ;;  %v4180_v33 = vand.u32 4294901760, %v4179_v56  ;;  %v4186_v56 = vand.u32 4294901760, %v4185_v43  ;;  %v4197_v43 = vsub.f32 %v9046_v27, %v10400_v28 }
 0x174   :  { %v9036_v31 = vpop.f32.mrf.mxu1  ;;  %v9038_v17 = vpop.f32.mrf.mxu0  ;;  %4056 = vmatprep.subr.mxu0 %v8972_v47 }
 0x175   :  { %3909 = vmatmul.mubr.f32.gmra.mxu0 %v8404_v12  ;;  %4169 = vmatprep.subr.mxu1 %v4168_v45 }
 0x176   :  { %v9049_v20 = vpop.f32.mrf.mxu1  ;;  %v9051_v4 = vpop.f32.mrf.mxu0  ;;  %3996 = vmatmul.mubr.f32.vlgmr.msra.gmra.mxu1 %v10479_v6  ;;  %3914 = vmatprep.mubr.f32.mxu0 %v10425_v3 }
 0x177   :  { %4001 = vmatprep.mubr.f32.mxu1 %v10425_v3  ;;  %4058 = vmatpush1.msra.mxu0 %v9013_v61 }
 0x178   :  { %v9066_v45 = vpop.f32.mrf.mxu0  ;;  %v9068_v2 = vpop.f32.mrf.mxu1  ;;  %4060 = vmatprep.subr.mxu0 %v9024_v10  ;;  %4175 = vmatpush1.msra.mxu1 %v4174_v53  ;;  %v4192_v53 = vand.u32 4294901760, %v4191_v40  ;;  %v10485_v40 = vand.u32 4294901760, %v9054_v11 }
 0x179   :  { %10482 = vst [vmem:[#allocation8_spill] sm:$0xff] %v9068_v2  ;;  %3916 = vmatmul.mubr.f32.gmra.mxu0 %v8444_v52  ;;  %4181 = vmatprep.subr.mxu1 %v4180_v33 }
 0x17a   :  { %v9076_v59 = vpop.f32.mrf.mxu0  ;;  %v9078_v62 = vpop.f32.mrf.mxu1  ;;  %4003 = vmatmul.mubr.f32.gmra.mxu1 %v10447_v5  ;;  %4062 = vmatpush1.msra.mxu0 %v9032_v38  ;;  %v4203_v25 = vsub.f32 %v9054_v11, %v10485_v40  ;;  %v4198_v40 = vand.u32 4294901760, %v4197_v43 }
 0x17b   :  { %10483 = vst [vmem:[#allocation7_spill] sm:$0xff] %v9078_v62  ;;  %4008 = vmatprep.mubr.f32.mxu1 %v10425_v3  ;;  %4095 = vmatprep.mubr.f32.mxu0 %v10425_v3 }
 0x17c   :  { %v9086_v60 = vpop.f32.mrf.mxu0  ;;  %v9088_v33 = vpop.f32.mrf.mxu1  ;;  %4299 = vmatprep.subr.mxu0 %v8989_v30  ;;  %4187 = vmatpush1.msra.mxu1 %v4186_v56  ;;  %v10486_v56 = vand.u32 4294901760, %v9062_v37 }
 0x17d   :  { %4101 = vmatmul.mubr.f32.vlgmr.msra.gmra.mxu0 %v10484_v39  ;;  %4193 = vmatprep.subr.mxu1 %v4192_v53  ;;  %v10488_v39 = vld [vmem:[#allocation18_spill] sm:$0xff] }
 0x17e   :  { %v9095_v46 = vpop.f32.mrf.mxu0  ;;  %v9097_v0 = vpop.f32.mrf.mxu1  ;;  %4010 = vmatmul.mubr.f32.gmra.mxu1 %v8404_v12  ;;  %4302 = vmatpush1.msra.mxu0 %v8968_v57  ;;  %v4209_v48 = vsub.f32 %v9062_v37, %v10486_v56  ;;  %v4204_v56 = vand.u32 4294901760, %v4203_v25  ;;  %v10491_v25 = vld [vmem:[#allocation21_spill] sm:$0xff] }
 0x17f   :  { %4305 = vmatprep.subr.mxu0 %v8976_v1  ;;  %4015 = vmatprep.mubr.f32.mxu1 %v10425_v3 }
 0x180   :  { %v9109_v53 = vpop.f32.mrf.mxu1  ;;  %v9111_v28 = vpop.f32.mrf.mxu0  ;;  %4106 = vmatprep.mubr.f32.mxu0 %v10425_v3  ;;  %4308 = vmatpush1.msra.mxu0 %v8996_v14 }
 0x181   :  { %10487 = vst [vmem:[#allocation14_spill] sm:$0xff] %v9111_v28  ;;  %4112 = vmatmul.mubr.f32.gmra.mxu0 %v10488_v39  ;;  %4311 = vmatprep.subr.mxu0 %v9002_v22  ;;  %v4210_v28 = vand.u32 4294901760, %v4209_v48 }
 0x182   :  { %v2364_v24 = vpop.f32.mrf.mxu1  ;;  %v9117_v2 = vpop.f32.mrf.mxu0  ;;  %4017 = vmatmul.mubr.f32.gmra.mxu1 %v8444_v52  ;;  %4314 = vmatpush1.msra.mxu0 %v9046_v27 }
 0x183   :  { %10489 = vst [vmem:[#allocation19_spill] sm:$0xff] %v9117_v2  ;;  %4199 = vmatpush1.msra.mxu1 %v4198_v40  ;;  %4317 = vmatprep.subr.mxu0 %v9054_v11  ;;  %v10494_v2 = vand.u32 4294901760, %v8989_v30 }
 0x184   :  { %v2371_v62 = vpop.f32.mrf.mxu1  ;;  %v9122_v23 = vpop.f32.mrf.mxu0  ;;  %4205 = vmatprep.subr.mxu1 %v4204_v56  ;;  %4117 = vmatprep.mubr.f32.mxu0 %v10425_v3  ;;  %v10493_v56 = vld [vmem:[#allocation4_spill] sm:$0xff] }
 0x185   :  { %10490 = vst [vmem:[#allocation9_spill] sm:$0xff] %v9122_v23  ;;  %4211 = vmatpush1.msra.mxu1 %v4210_v28  ;;  %4244 = vmatprep.mubr.f32.mxu1 %v10425_v3  ;;  %v2056_v28 = vadd.f32 %v8959_v32, %v10493_v56  ;;  %v2054_v30 = vadd.f32 %v8947_v49, %v10493_v56 }
 0x186   :  { %v9126_v43 = vpop.f32.mrf.mxu1  ;;  %v9128_v39 = vpop.f32.mrf.mxu0  ;;  %4320 = vmatpush1.msra.mxu0 %v9062_v37  ;;  %4246 = vmatmul.mubr.f32.vlgmr.msra.gmra.mxu1 %v10479_v6  ;;  %v2067_v49 = vadd.f32 %v8991_v34, %v8310_v7 }
 0x187   :  { %4123 = vmatmul.mubr.f32.gmra.mxu0 %v10491_v25  ;;  %4411 = vmatprep.subr.mxu1 %v8979_v35  ;;  %v2065_v25 = vadd.f32 %v8981_v36, %v8310_v7  ;;  %v2163_v23 = vadd.f32 %v9017_v26, %v2056_v28  ;;  %v2161_v56 = vadd.f32 %v9006_v58, %v2054_v30  ;;  %v10499_v30 = vand.u32 4294901760, %v8976_v1 }
 0x188   :  { %v2463_v48 = vpop.f32.mrf.mxu0  ;;  %v9134_v40 = vpop.f32.mrf.mxu1  ;;  %4522 = vmatprep.subr.mxu0 %v10494_v2  ;;  %4413 = vmatpush1.msra.mxu1 %v8953_v13  ;;  %v10496_v2 = vld [vmem:[#allocation22_spill] sm:$0xff]  ;;  %v2170_v34 = vadd.f32 %v9049_v20, %v2067_v49  ;;  %v10501_v1 = vand.u32 4294901760, %v9002_v22 }
 0x189   :  { %10492 = vst [vmem:[#allocation23_spill] sm:$0xff] %v9134_v40  ;;  %4415 = vmatprep.subr.mxu1 %v8945_v55  ;;  %4128 = vmatprep.mubr.f32.mxu0 %v10425_v3  ;;  %v2168_v36 = vadd.f32 %v9036_v31, %v2065_v25  ;;  %v2263_v26 = vadd.f32 %v9076_v59, %v2163_v23 }
 0x18a   :  { %v9143_v6 = vpop.f32.mrf.mxu1  ;;  %4251 = vmatprep.mubr.f32.mxu1 %v10425_v3  ;;  %4417 = vmatpush1.msra.mxu1 %v8964_v16  ;;  %v2465_v32 = vpop.f32.mrf.mxu0  ;;  %v2261_v58 = vadd.f32 %v9066_v45, %v2161_v56  ;;  %v2271_v20 = vadd.f32 %v9095_v46, %v2170_v34 }
 0x18b   :  { %10495 = vst [vmem:[#allocation11_spill] sm:$0xff] %v9143_v6  ;;  %4134 = vmatmul.mubr.f32.gmra.mxu0 %v10496_v2  ;;  %4253 = vmatmul.mubr.f32.gmra.mxu1 %v10447_v5  ;;  %v2045_v6 = vadd.f32 %v8934_v54, %v8314_v15  ;;  %v10497_v2 = vld [vmem:[#allocation5_spill] sm:$0xff]  ;;  %v2269_v23 = vadd.f32 %v9086_v60, %v2168_v36 }
 0x18c   :  { %v9154_v40 = vpop.f32.mrf.mxu1  ;;  %4419 = vmatprep.subr.mxu1 %v8972_v47  ;;  %4258 = vmatprep.mubr.f32.mxu1 %v10425_v3  ;;  %v2032_v54 = vadd.f32 %v8902_v21, %v10497_v2  ;;  %v2365_v59 = vadd.f32 %v2364_v24, %v2263_v26  ;;  %v2470_v25 = vpop.f32.mrf.mxu0  ;;  %v2034_v7 = vadd.f32 %v8911_v19, %v10497_v2  ;;  %v10498_v24 = vand.u32 4294901760, %v8968_v57 }
 0x18d   :  { %4421 = vmatpush1.msra.mxu1 %v9013_v61  ;;  %4353 = vmatprep.mubr.f32.mxu0 %v10425_v3  ;;  %v2156_v31 = vadd.f32 %v8993_v50, %v2045_v6  ;;  %v2372_v50 = vadd.f32 %v2371_v62, %v2269_v23  ;;  %v2043_v19 = vadd.f32 %v8925_v44, %v8314_v15  ;;  %v10500_v2 = vand.u32 4294901760, %v8996_v14 }
 0x18e   :  { %v2553_v28 = vpop.f32.mrf.mxu1  ;;  %4423 = vmatprep.subr.mxu1 %v9024_v10  ;;  %v2466_v60 = vadd.f32 %v2465_v32, %v2365_v59  ;;  %v2363_v45 = vadd.f32 %v9109_v53, %v2261_v58  ;;  %v2472_v32 = vpop.f32.mrf.mxu0  ;;  %v2147_v44 = vadd.f32 %v8949_v18, %v2032_v54  ;;  %v2374_v46 = vadd.f32 %v9126_v43, %v2271_v20  ;;  %v10508_v58 = vld [vmem:[#allocation9_spill] sm:$0xff] }
 0x18f   :  { %4425 = vmatpush1.msra.mxu1 %v9032_v38  ;;  %4356 = vmatmul.mubr.f32.vlgmr.msra.gmra.mxu0 %v10462_v51  ;;  %v2255_v6 = vadd.f32 %v9051_v4, %v2156_v31  ;;  %v2471_v57 = vadd.f32 %v2470_v25, %v2372_v50  ;;  %v2149_v18 = vadd.f32 %v8961_v8, %v2034_v7  ;;  %v10502_v43 = vand.u32 4294901760, %v9046_v27  ;;  %v10507_v7 = vld [vmem:[#allocation8_spill] sm:$0xff]  ;;  %v10511_v20 = vld [vmem:[#allocation17_spill] sm:$0xff] }
 0x190   :  { %v2558_v21 = vpop.f32.mrf.mxu1  ;;  %4260 = vmatmul.mubr.f32.gmra.mxu1 %v8404_v12  ;;  %4526 = vmatpush1.msra.mxu0 %v10498_v24  ;;  %v2464_v53 = vadd.f32 %v2463_v48, %v2363_v45  ;;  %v2473_v48 = vadd.f32 %v2472_v32, %v2374_v46  ;;  %v10504_v27 = vand.u32 4294901760, %v9062_v37  ;;  %v2245_v23 = vadd.f32 %v9008_v42, %v2147_v44  ;;  %v10510_v24 = vld [vmem:[#allocation14_spill] sm:$0xff] }
 0x191   :  { %4637 = vmatprep.subr.mxu1 %v8979_v35  ;;  %4530 = vmatprep.subr.mxu0 %v10499_v30  ;;  %v2356_v62 = vadd.f32 %v9097_v0, %v2255_v6  ;;  %v2154_v0 = vadd.f32 %v8983_v9, %v2043_v19  ;;  %v10503_v9 = vand.u32 4294901760, %v9054_v11  ;;  %v2247_v8 = vadd.f32 %v9019_v41, %v2149_v18  ;;  %v10506_v11 = vld [vmem:[#allocation7_spill] sm:$0xff]  ;;  %v10515_v44 = vld [vmem:[#allocation6_spill] sm:$0xff] }
 0x192   :  { %v2560_v4 = vpop.f32.mrf.mxu1  ;;  %4534 = vmatpush1.msra.mxu0 %v10500_v2  ;;  %4265 = vmatprep.mubr.f32.mxu1 %v10425_v3  ;;  %v2559_v22 = vadd.f32 %v2558_v21, %v2464_v53  ;;  %v2345_v34 = vadd.f32 %v10507_v7, %v2245_v23  ;;  %v10509_v6 = vld [vmem:[#allocation19_spill] sm:$0xff] }
 0x193   :  { %v2561_v15 = vadd.f32 %v2560_v4, %v2466_v60  ;;  %4361 = vmatprep.mubr.f32.mxu0 %v10425_v3  ;;  %4538 = vmatprep.subr.mxu0 %v10501_v1  ;;  %v2459_v14 = vadd.f32 %v9128_v39, %v2356_v62  ;;  %v2253_v49 = vadd.f32 %v9038_v17, %v2154_v0  ;;  %v10505_v17 = vld [vmem:[#allocation10_spill] sm:$0xff]  ;;  %v10512_v45 = vld [vmem:[#allocation11_spill] sm:$0xff]  ;;  %v10513_v4 = vld [vmem:[#allocation13_spill] sm:$0xff] }
 0x194   :  { %v2565_v35 = vpop.f32.mrf.mxu1  ;;  %4267 = vmatmul.mubr.f32.gmra.mxu1 %v8444_v52  ;;  %4364 = vmatmul.mubr.f32.gmra.mxu0 %v8393_v63  ;;  %v2347_v25 = vadd.f32 %v10506_v11, %v2247_v8  ;;  %v2450_v60 = vadd.f32 %v10510_v24, %v2345_v34  ;;  %v10514_v2 = vld [vmem:[#allocation23_spill] sm:$0xff]  ;;  %v10516_v1 = vld [vmem:[#allocation16_spill] sm:$0xff] }
 0x195   :  { %v2566_v36 = vadd.f32 %v2565_v35, %v2471_v57  ;;  %4542 = vmatpush1.msra.mxu0 %v10502_v43  ;;  %4369 = vmatprep.mubr.f32.mxu0 %v10425_v3  ;;  %v2554_v39 = vadd.f32 %v2553_v28, %v2459_v14  ;;  %v2593_v56 = vmax.f32 %v2561_v15, 0.0  ;;  %v2354_v59 = vadd.f32 %v9088_v33, %v2253_v49  ;;  %v10518_v34 = vld [vmem:[#allocation15_spill] sm:$0xff] }
 0x196   :  { %v2567_v26 = vpop.f32.mrf.mxu1  ;;  %4546 = vmatprep.subr.mxu0 %v10503_v9  ;;  %4458 = vmatprep.mubr.f32.mxu1 %v10425_v3  ;;  %v2592_v28 = vmax.f32 %v2559_v22, 0.0  ;;  %v2452_v50 = vadd.f32 %v10509_v6, %v2347_v25  ;;  %v10517_v22 = vld [vmem:[#allocation20_spill] sm:$0xff] }
 0x197   :  { %v2600_v54 = vmax.f32 %v2566_v36, 0.0  ;;  %4550 = vmatpush1.msra.mxu0 %v10504_v27  ;;  %v2568_v31 = vadd.f32 %v2567_v26, %v2473_v48  ;;  %v2457_v42 = vadd.f32 %v10508_v58, %v2354_v59  ;;  %v2585_v21 = vmax.f32 %v2554_v39, 0.0 }
 0x198   :  { %4372 = vmatmul.mubr.f32.gmra.mxu0 %v10470_v29  ;;  %4462 = vmatmul.mubr.f32.vlgmr.msra.gmra.mxu1 %v10505_v17  ;;  %v9226_v33 = vand.u32 4294901760, %v2593_v56  ;;  %v9237_v30 = vand.u32 4294901760, %v2592_v28 }
 0x199   :  { %4639 = vmatpush1.msra.mxu1 %v8953_v13  ;;  %4377 = vmatprep.mubr.f32.mxu0 %v10425_v3  ;;  %v9220_v41 = vand.u32 4294901760, %v2600_v54  ;;  %v2601_v37 = vmax.f32 %v2568_v31, 0.0  ;;  %v2552_v19 = vadd.f32 %v9154_v40, %v2457_v42  ;;  %v2545_v40 = vadd.f32 %v10514_v2, %v2450_v60  ;;  %v10520_v60 = vld [vmem:[#allocation21_spill] sm:$0xff] }
 0x19a   :  { %4641 = vmatprep.subr.mxu1 %v8945_v55  ;;  %4467 = vmatprep.mubr.f32.mxu1 %v10425_v3  ;;  %v2547_v55 = vadd.f32 %v10512_v45, %v2452_v50  ;;  %v9248_v57 = vand.u32 4294901760, %v2585_v21  ;;  %v9261_v53 = vsub.f32 %v2592_v28, %v9237_v30 }
 0x19b   :  { %4643 = vmatpush1.msra.mxu1 %v8964_v16  ;;  %v9230_v13 = vand.u32 4294901760, %v2601_v37  ;;  %v9241_v62 = vsub.f32 %v2600_v54, %v9220_v41  ;;  %v2584_v15 = vmax.f32 %v2552_v19, 0.0  ;;  %v2576_v35 = vmax.f32 %v2545_v40, 0.0  ;;  %v10521_v19 = vld [vmem:[#allocation22_spill] sm:$0xff] }
 0x19c   :  { %4645 = vmatprep.subr.mxu1 %v8972_v47  ;;  %4380 = vmatmul.mubr.f32.gmra.mxu0 %v10511_v20  ;;  %v9252_v47 = vsub.f32 %v2593_v56, %v9226_v33  ;;  %v2577_v46 = vmax.f32 %v2547_v55, 0.0  ;;  %v9270_v0 = vsub.f32 %v2585_v21, %v9248_v57  ;;  %v4874_v43 = vand.u32 4294901760, %v9261_v53  ;;  %v10519_v21 = vld [vmem:[#allocation18_spill] sm:$0xff] }
 0x19d   :  { %4471 = vmatmul.mubr.f32.gmra.mxu1 %v10513_v4  ;;  %4583 = vmatprep.mubr.f32.mxu0 %v10425_v3  ;;  %v9245_v16 = vsub.f32 %v2601_v37, %v9230_v13  ;;  %v9276_v36 = vand.u32 4294901760, %v2584_v15  ;;  %v9287_v26 = vand.u32 4294901760, %v2576_v35 }
 0x19e   :  { %4647 = vmatpush1.msra.mxu1 %v9013_v61  ;;  %4476 = vmatprep.mubr.f32.mxu1 %v10425_v3  ;;  %v4862_v61 = vand.u32 4294901760, %v9241_v62  ;;  %v9279_v18 = vand.u32 4294901760, %v2577_v46  ;;  %v4880_v9 = vand.u32 4294901760, %v9270_v0  ;;  %v4875_v54 = vsub.f32 %v9261_v53, %v4874_v43 }
 0x19f   :  { %4649 = vmatprep.subr.mxu1 %v9024_v10  ;;  %4738 = vmatprep.subr.mxu0 %v9230_v13  ;;  %v4856_v32 = vand.u32 4294901760, %v9245_v16  ;;  %v9297_v39 = vsub.f32 %v2584_v15, %v9276_v36  ;;  %v9309_v27 = vsub.f32 %v2576_v35, %v9287_v26  ;;  %v9422_v35 = vpop.permute.xlu0 %2627 }
 0x1a0   :  { %4651 = vmatpush1.msra.mxu1 %v9032_v38  ;;  %4585 = vmatmul.mubr.f32.vlgmr.msra.gmra.mxu0 %v10515_v44  ;;  %v4868_v38 = vand.u32 4294901760, %v9252_v47  ;;  %v4863_v48 = vsub.f32 %v9241_v62, %v4862_v61  ;;  %v9301_v56 = vsub.f32 %v2577_v46, %v9279_v18  ;;  %v4881_v23 = vsub.f32 %v9270_v0, %v4880_v9 }
 0x1a1   :  { %4480 = vmatmul.mubr.f32.gmra.mxu1 %v10516_v1  ;;  %4590 = vmatprep.mubr.f32.mxu0 %v10425_v3  ;;  %v4857_v10 = vsub.f32 %v9245_v16, %v4856_v32  ;;  %v4886_v59 = vand.u32 4294901760, %v9297_v39  ;;  %v4876_v11 = vand.u32 4294901760, %v4875_v54  ;;  %v4898_v28 = vand.u32 4294901760, %v9309_v27 }
 0x1a2   :  { %4485 = vmatprep.mubr.f32.mxu1 %v10425_v3  ;;  %4740 = vmatpush1.msra.mxu0 %v9220_v41  ;;  %v4869_v49 = vsub.f32 %v9252_v47, %v4868_v38  ;;  %v4864_v8 = vand.u32 4294901760, %v4863_v48  ;;  %v4892_v25 = vand.u32 4294901760, %v9301_v56  ;;  %v4882_v37 = vand.u32 4294901760, %v4881_v23  ;;  %v5435_v23 = vld [vmem:[%s10340_s5] sm:$0x7] }
 0x1a3   :  { %4742 = vmatprep.subr.mxu0 %v9226_v33  ;;  %v4858_v14 = vand.u32 4294901760, %v4857_v10  ;;  %v4887_v7 = vsub.f32 %v9297_v39, %v4886_v59  ;;  %v4899_v42 = vsub.f32 %v9309_v27, %v4898_v28  ;;  %v9426_v48 = vpop.permute.xlu0 %2617 }
 0x1a4   :  { %4592 = vmatmul.mubr.f32.gmra.mxu0 %v10447_v5  ;;  %v4870_v31 = vand.u32 4294901760, %v4869_v49  ;;  %v4893_v58 = vsub.f32 %v9301_v56, %v4892_v25 }
 0x1a5   :  { %4489 = vmatmul.mubr.f32.gmra.mxu1 %v10517_v22  ;;  %4597 = vmatprep.mubr.f32.mxu0 %v10425_v3  ;;  %v4888_v6 = vand.u32 4294901760, %v4887_v7  ;;  %v4900_v24 = vand.u32 4294901760, %v4899_v42 }
 0x1a6   :  { %4684 = vmatprep.mubr.f32.mxu1 %v10425_v3  ;;  %4744 = vmatpush1.msra.mxu0 %v9237_v30  ;;  %v4894_v50 = vand.u32 4294901760, %v4893_v58 }
 0x1a7   :  { %4746 = vmatprep.subr.mxu0 %v9248_v57  ;;  %4859 = vmatprep.subr.mxu1 %v4858_v14 }
 0x1a8   :  { %4599 = vmatmul.mubr.f32.gmra.mxu0 %v8404_v12 }
 0x1a9   :  { %4686 = vmatmul.mubr.f32.vlgmr.msra.gmra.mxu1 %v10515_v44  ;;  %4604 = vmatprep.mubr.f32.mxu0 %v10425_v3 }
 0x1aa   :  { %4691 = vmatprep.mubr.f32.mxu1 %v10425_v3  ;;  %4748 = vmatpush1.msra.mxu0 %v9276_v36 }
 0x1ab   :  { %4750 = vmatprep.subr.mxu0 %v9279_v18  ;;  %4865 = vmatpush1.msra.mxu1 %v4864_v8 }
 0x1ac   :  { %4606 = vmatmul.mubr.f32.gmra.mxu0 %v8444_v52  ;;  %4871 = vmatprep.subr.mxu1 %v4870_v31 }
 0x1ad   :  { %4693 = vmatmul.mubr.f32.gmra.mxu1 %v10447_v5  ;;  %4752 = vmatpush1.msra.mxu0 %v9287_v26 }
 0x1ae   :  { %4698 = vmatprep.mubr.f32.mxu1 %v10425_v3  ;;  %4785 = vmatprep.mubr.f32.mxu0 %v10425_v3 }
 0x1af   :  { %4989 = vmatprep.subr.mxu0 %v9245_v16  ;;  %4877 = vmatpush1.msra.mxu1 %v4876_v11 }
 0x1b0   :  { %4791 = vmatmul.mubr.f32.vlgmr.msra.gmra.mxu0 %v10518_v34  ;;  %4883 = vmatprep.subr.mxu1 %v4882_v37 }
 0x1b1   :  { %4700 = vmatmul.mubr.f32.gmra.mxu1 %v8404_v12  ;;  %4992 = vmatpush1.msra.mxu0 %v9241_v62 }
 0x1b2   :  { %4995 = vmatprep.subr.mxu0 %v9252_v47  ;;  %4705 = vmatprep.mubr.f32.mxu1 %v10425_v3 }
 0x1b3   :  { %4796 = vmatprep.mubr.f32.mxu0 %v10425_v3  ;;  %4998 = vmatpush1.msra.mxu0 %v9261_v53 }
 0x1b4   :  { %4802 = vmatmul.mubr.f32.gmra.mxu0 %v10519_v21  ;;  %5001 = vmatprep.subr.mxu0 %v9270_v0 }
 0x1b5   :  { %4707 = vmatmul.mubr.f32.gmra.mxu1 %v8444_v52  ;;  %5004 = vmatpush1.msra.mxu0 %v9297_v39 }
 0x1b6   :  { %4889 = vmatpush1.msra.mxu1 %v4888_v6  ;;  %5007 = vmatprep.subr.mxu0 %v9301_v56 }
 0x1b7   :  { %4895 = vmatprep.subr.mxu1 %v4894_v50  ;;  %4807 = vmatprep.mubr.f32.mxu0 %v10425_v3 }
 0x1b8   :  { %4901 = vmatpush1.msra.mxu1 %v4900_v24  ;;  %4934 = vmatprep.mubr.f32.mxu1 %v10425_v3  ;;  %v5443_v24 = vsel %vm2630_vm2, %v5435_v23, 0 }
 0x1b9   :  { %5010 = vmatpush1.msra.mxu0 %v9309_v27  ;;  %4936 = vmatmul.mubr.f32.vlgmr.msra.gmra.mxu1 %v10515_v44 }
 0x1ba   :  { %4813 = vmatmul.mubr.f32.gmra.mxu0 %v10520_v60  ;;  %5101 = vmatprep.subr.mxu1 %v9230_v13 }
 0x1bb   :  { %5212 = vmatprep.subr.mxu0 %v4856_v32  ;;  %5103 = vmatpush1.msra.mxu1 %v9220_v41 }
 0x1bc   :  { %5105 = vmatprep.subr.mxu1 %v9226_v33  ;;  %4818 = vmatprep.mubr.f32.mxu0 %v10425_v3 }
 0x1bd   :  { %4941 = vmatprep.mubr.f32.mxu1 %v10425_v3  ;;  %5107 = vmatpush1.msra.mxu1 %v9237_v30 }
 0x1be   :  { %4824 = vmatmul.mubr.f32.gmra.mxu0 %v10521_v19  ;;  %4943 = vmatmul.mubr.f32.gmra.mxu1 %v10447_v5 }
 0x1bf   :  { %5109 = vmatprep.subr.mxu1 %v9248_v57  ;;  %4948 = vmatprep.mubr.f32.mxu1 %v10425_v3 }
 0x1c0   :  { %5111 = vmatpush1.msra.mxu1 %v9276_v36  ;;  %5043 = vmatprep.mubr.f32.mxu0 %v10425_v3 }
 0x1c1   :  { %5113 = vmatprep.subr.mxu1 %v9279_v18 }
 0x1c2   :  { %5115 = vmatpush1.msra.mxu1 %v9287_v26  ;;  %5046 = vmatmul.mubr.f32.vlgmr.msra.gmra.mxu0 %v10462_v51 }
 0x1c3   :  { %4950 = vmatmul.mubr.f32.gmra.mxu1 %v8404_v12  ;;  %5216 = vmatpush1.msra.mxu0 %v4862_v61 }
 0x1c4   :  { %5327 = vmatprep.subr.mxu1 %v9230_v13  ;;  %5220 = vmatprep.subr.mxu0 %v4868_v38  ;;  %v9424_v38 = vpop.permute.xlu1 %2622 }
 0x1c5   :  { %5224 = vmatpush1.msra.mxu0 %v4874_v43  ;;  %4955 = vmatprep.mubr.f32.mxu1 %v10425_v3 }
 0x1c6   :  { %5051 = vmatprep.mubr.f32.mxu0 %v10425_v3  ;;  %5228 = vmatprep.subr.mxu0 %v4880_v9 }
 0x1c7   :  { %4957 = vmatmul.mubr.f32.gmra.mxu1 %v8444_v52  ;;  %5054 = vmatmul.mubr.f32.gmra.mxu0 %v8393_v63 }
 0x1c8   :  { %5232 = vmatpush1.msra.mxu0 %v4886_v59  ;;  %5059 = vmatprep.mubr.f32.mxu0 %v10425_v3  ;;  %v9429_v9 = vpop.permute.xlu1 %2612 }
 0x1c9   :  { %5236 = vmatprep.subr.mxu0 %v4892_v25  ;;  %5148 = vmatprep.mubr.f32.mxu1 %v10425_v3 }
 0x1ca   :  { %5240 = vmatpush1.msra.mxu0 %v4898_v28 }
 0x1cb   :  { %5062 = vmatmul.mubr.f32.gmra.mxu0 %v10470_v29  ;;  %5152 = vmatmul.mubr.f32.vlgmr.msra.gmra.mxu1 %v10505_v17 }
 0x1cc   :  { %5329 = vmatpush1.msra.mxu1 %v9220_v41  ;;  %5067 = vmatprep.mubr.f32.mxu0 %v10425_v3 }
 0x1cd   :  { %5331 = vmatprep.subr.mxu1 %v9226_v33  ;;  %5157 = vmatprep.mubr.f32.mxu1 %v10425_v3 }
 0x1ce   :  { %5333 = vmatpush1.msra.mxu1 %v9237_v30 }
 0x1cf   :  { %5335 = vmatprep.subr.mxu1 %v9248_v57  ;;  %5070 = vmatmul.mubr.f32.gmra.mxu0 %v10511_v20 }
 0x1d0   :  { %5161 = vmatmul.mubr.f32.gmra.mxu1 %v10513_v4  ;;  %5273 = vmatprep.mubr.f32.mxu0 %v10425_v3 }
 0x1d1   :  { %5337 = vmatpush1.msra.mxu1 %v9276_v36  ;;  %5166 = vmatprep.mubr.f32.mxu1 %v10425_v3 }
 0x1d2   :  { %5339 = vmatprep.subr.mxu1 %v9279_v18 }
 0x1d3   :  { %5341 = vmatpush1.msra.mxu1 %v9287_v26  ;;  %5275 = vmatmul.mubr.f32.vlgmr.msra.gmra.mxu0 %v10515_v44 }
 0x1d4   :  { %5170 = vmatmul.mubr.f32.gmra.mxu1 %v10516_v1  ;;  %5280 = vmatprep.mubr.f32.mxu0 %v10425_v3 }
 0x1d5   :  { %5175 = vmatprep.mubr.f32.mxu1 %v10425_v3  ;;  %v9402_v63 = vpop.f32.mrf.mxu0 }
 0x1d6   :  { %v2723_v59 = vadd.f32 %v9402_v63, %v9429_v9 }
 0x1d7   :  { %5282 = vmatmul.mubr.f32.gmra.mxu0 %v10447_v5  ;;  %v2724_v51 = vpop.f32.mrf.mxu0 }
 0x1d8   :  { %5179 = vmatmul.mubr.f32.gmra.mxu1 %v10517_v22  ;;  %5287 = vmatprep.mubr.f32.mxu0 %v10425_v3  ;;  %v2725_v54 = vadd.f32 %v2724_v51, %v9429_v9 }
 0x1d9   :  { %5374 = vmatprep.mubr.f32.mxu1 %v10425_v3 }
 0x1da   :  { %v2733_v29 = vpop.f32.mrf.mxu0 }
 0x1db   :  { %5289 = vmatmul.mubr.f32.gmra.mxu0 %v8404_v12  ;;  %v2734_v39 = vadd.f32 %v2733_v29, %v9426_v48 }
 0x1dc   :  { %5376 = vmatmul.mubr.f32.vlgmr.msra.gmra.mxu1 %v10515_v44  ;;  %5294 = vmatprep.mubr.f32.mxu0 %v10425_v3  ;;  %v2735_v17 = vpop.f32.mrf.mxu0 }
 0x1dd   :  { %5381 = vmatprep.mubr.f32.mxu1 %v10425_v3  ;;  %v2736_v26 = vadd.f32 %v2735_v17, %v9426_v48 }
 0x1df   :  { %5296 = vmatmul.mubr.f32.gmra.mxu0 %v8444_v52  ;;  %v2744_v41 = vpop.f32.mrf.mxu0  ;;  %v2867_v33 = vpop.f32.mrf.mxu1 }
 0x1e0   :  { %5383 = vmatmul.mubr.f32.gmra.mxu1 %v10447_v5  ;;  %5517 = vmatprep.mubr.f32.mxu0 %v10425_v3  ;;  %v2745_v8 = vadd.f32 %v2744_v41, %v9424_v38  ;;  %v2868_v42 = vadd.f32 %v2867_v33, %v2723_v59 }
 0x1e1   :  { %5388 = vmatprep.mubr.f32.mxu1 %v10425_v3  ;;  %v2746_v13 = vpop.f32.mrf.mxu0  ;;  %v2869_v20 = vpop.f32.mrf.mxu1 }
 0x1e2   :  { %v2747_v11 = vadd.f32 %v2746_v13, %v9424_v38  ;;  %v2870_v37 = vadd.f32 %v2869_v20, %v2725_v54 }
 0x1e3   :  { %v2755_v45 = vpop.f32.mrf.mxu0 }
 0x1e4   :  { %5390 = vmatmul.mubr.f32.gmra.mxu1 %v8404_v12  ;;  %v2874_v55 = vpop.f32.mrf.mxu1  ;;  %v2756_v60 = vadd.f32 %v2755_v45, %v9422_v35 }
 0x1e5   :  { %5395 = vmatprep.mubr.f32.mxu1 %v10425_v3  ;;  %v2757_v30 = vpop.f32.mrf.mxu0  ;;  %v2875_v25 = vadd.f32 %v2874_v55, %v2734_v39 }
 0x1e6   :  { %v2876_v4 = vpop.f32.mrf.mxu1  ;;  %v2758_v17 = vadd.f32 %v2757_v30, %v9422_v35 }
 0x1e7   :  { %v2977_v62 = vpop.f32.mrf.mxu0  ;;  %v2877_v27 = vadd.f32 %v2876_v4, %v2736_v26 }
 0x1e8   :  { %5397 = vmatmul.mubr.f32.gmra.mxu1 %v8444_v52  ;;  %v2881_v16 = vpop.f32.mrf.mxu1  ;;  %v2978_v41 = vadd.f32 %v2977_v62, %v2868_v42 }
 0x1e9   :  { %v2979_v2 = vpop.f32.mrf.mxu0  ;;  %5633 = vmatprep.mubr.f32.mxu1 %v10425_v3  ;;  %v2882_v7 = vadd.f32 %v2881_v16, %v2745_v8 }
 0x1ea   :  { %v2883_v5 = vpop.f32.mrf.mxu1  ;;  %v2980_v19 = vadd.f32 %v2979_v2, %v2870_v37 }
 0x1eb   :  { %v2884_v21 = vadd.f32 %v2883_v5, %v2747_v11 }
 0x1ec   :  { %v2888_v40 = vpop.f32.mrf.mxu1  ;;  %v2985_v57 = vpop.f32.mrf.mxu0 }
 0x1ed   :  { %v2986_v6 = vadd.f32 %v2985_v57, %v2875_v25  ;;  %v2889_v4 = vadd.f32 %v2888_v40, %v2756_v60  ;;  %v9447_v40 = vand.u32 4294901760, %v5443_v24 }
 0x1ee   :  { %v2890_v47 = vpop.f32.mrf.mxu1  ;;  %v2987_v32 = vpop.f32.mrf.mxu0 }
 0x1ef   :  { %v2988_v34 = vadd.f32 %v2987_v32, %v2877_v27  ;;  %v2891_v32 = vadd.f32 %v2890_v47, %v2758_v17 }
 0x1f0   :  { %v2993_v15 = vpop.f32.mrf.mxu0  ;;  %v3083_v44 = vpop.f32.mrf.mxu1 }
 0x1f1   :  { %v2994_v51 = vadd.f32 %v2993_v15, %v2882_v7  ;;  %v3084_v26 = vadd.f32 %v3083_v44, %v2978_v41 }
 0x1f2   :  { %v2995_v12 = vpop.f32.mrf.mxu0  ;;  %v3085_v46 = vpop.f32.mrf.mxu1 }
 0x1f3   :  { %v2996_v13 = vadd.f32 %v2995_v12, %v2884_v21  ;;  %v3086_v16 = vadd.f32 %v3085_v46, %v2980_v19 }
 0x1f4   :  { %v3001_v53 = vpop.f32.mrf.mxu0 }
 0x1f5   :  { %v3092_v61 = vpop.f32.mrf.mxu1  ;;  %v3002_v2 = vadd.f32 %v3001_v53, %v2889_v4 }
 0x1f6   :  { %v9420_v1 = vpop.f32.mrf.mxu0  ;;  %v3093_v20 = vadd.f32 %v3092_v61, %v2986_v6 }
 0x1f7   :  { %v3094_v10 = vpop.f32.mrf.mxu1  ;;  %v3004_v46 = vadd.f32 %v9420_v1, %v2891_v32 }
 0x1f8   :  { %v3206_v52 = vpop.f32.mrf.mxu0  ;;  %v3095_v29 = vadd.f32 %v3094_v10, %v2988_v34 }
 0x1f9   :  { %v3101_v0 = vpop.f32.mrf.mxu1  ;;  %v3207_v62 = vadd.f32 %v3206_v52, %v3084_v26 }
 0x1fa   :  { %v3208_v14 = vpop.f32.mrf.mxu0  ;;  %v3102_v33 = vadd.f32 %v3101_v0, %v2994_v51 }
 0x1fb   :  { %v3103_v36 = vpop.f32.mrf.mxu1  ;;  %v3209_v15 = vadd.f32 %v3208_v14, %v3086_v16 }
 0x1fc   :  { %v3213_v18 = vpop.f32.mrf.mxu0  ;;  %v3104_v39 = vadd.f32 %v3103_v36, %v2996_v13 }
 0x1fd   :  { %v3110_v43 = vpop.f32.mrf.mxu1  ;;  %v3214_v54 = vadd.f32 %v3213_v18, %v3093_v20 }
 0x1fe   :  { %v3215_v22 = vpop.f32.mrf.mxu0  ;;  %v3111_v47 = vadd.f32 %v3110_v43, %v3002_v2 }
 0x1ff   :  { %v3112_v49 = vpop.f32.mrf.mxu1  ;;  %v3216_v5 = vadd.f32 %v3215_v22, %v3095_v29 }
 0x200   :  { %v3220_v56 = vpop.f32.mrf.mxu0  ;;  %v3113_v53 = vadd.f32 %v3112_v49, %v3004_v46 }
 0x201   :  { %v3307_v31 = vpop.f32.mrf.mxu1  ;;  %v3221_v10 = vadd.f32 %v3220_v56, %v3102_v33 }
 0x202   :  { %v3222_v28 = vpop.f32.mrf.mxu0  ;;  %v3308_v18 = vadd.f32 %v3307_v31, %v3207_v62 }
 0x203   :  { %v3309_v58 = vpop.f32.mrf.mxu1  ;;  %v3223_v12 = vadd.f32 %v3222_v28, %v3104_v39  ;;  %v9453_v28 = vsub.f32 %v5443_v24, %v9447_v40 }
 0x204   :  { %v3227_v50 = vpop.f32.mrf.mxu0  ;;  %v3310_v44 = vadd.f32 %v3309_v58, %v3209_v15  ;;  %v5403_v7 = vmax.f32 %v3308_v18, 0.0 }
 0x205   :  { %v3314_v63 = vpop.f32.mrf.mxu1  ;;  %v3228_v14 = vadd.f32 %v3227_v50, %v3111_v47  ;;  %v9466_v24 = vand.u32 4294901760, %v9453_v28 }
 0x206   :  { %v3229_v55 = vpop.f32.mrf.mxu0  ;;  %v3315_v61 = vadd.f32 %v3314_v63, %v3214_v54  ;;  %v5404_v37 = vmax.f32 %v3310_v44, 0.0  ;;  %v9475_v63 = vand.u32 4294901760, %v5403_v7 }
 0x207   :  { %v3316_v57 = vpop.f32.mrf.mxu1  ;;  %v3230_v1 = vadd.f32 %v3229_v55, %v3113_v53 }
 0x208   :  { %v9443_v45 = vpop.f32.mrf.mxu0  ;;  %v3317_v8 = vadd.f32 %v3316_v57, %v3216_v5  ;;  %v5411_v59 = vmax.f32 %v3315_v61, 0.0  ;;  %v9468_v60 = vand.u32 4294901760, %v5404_v37  ;;  %v5521_v57 = vsub.f32 %v9453_v28, %v9466_v24 }
 0x209   :  { %v3321_v30 = vpop.f32.mrf.mxu1  ;;  %v9511_v2 = vsub.f32 %v5403_v7, %v9475_v63 }
 0x20a   :  { %v9445_v27 = vpop.f32.mrf.mxu0  ;;  %v3322_v0 = vadd.f32 %v3321_v30, %v3221_v10  ;;  %v5412_v56 = vmax.f32 %v3317_v8, 0.0  ;;  %v9463_v50 = vand.u32 4294901760, %v5411_v59  ;;  %v9502_v32 = vsub.f32 %v5404_v37, %v9468_v60 }
 0x20b   :  { %v3323_v36 = vpop.f32.mrf.mxu1  ;;  %v9532_v44 = vand.u32 4294901760, %v5521_v57 }
 0x20c   :  { %v3324_v22 = vadd.f32 %v3323_v36, %v3223_v12  ;;  %v5419_v23 = vmax.f32 %v3322_v0, 0.0  ;;  %v9461_v42 = vand.u32 4294901760, %v5412_v56  ;;  %v9493_v16 = vsub.f32 %v5411_v59, %v9463_v50 }
 0x20d   :  { %v5591_v18 = vand.u32 4294901760, %v9502_v32 }
 0x20e   :  { %v5420_v52 = vmax.f32 %v3324_v22, 0.0  ;;  %v3328_v11 = vpop.f32.mrf.mxu1  ;;  %v9450_v25 = vpop.f32.mrf.mxu0  ;;  %v9455_v34 = vand.u32 4294901760, %v5419_v23  ;;  %v9485_v20 = vsub.f32 %v5412_v56, %v9461_v42  ;;  %v5585_v12 = vand.u32 4294901760, %v9493_v16 }
 0x20f   :  { %v3329_v43 = vadd.f32 %v3328_v11, %v3228_v14  ;;  %v5597_v22 = vand.u32 4294901760, %v9511_v2  ;;  %v5592_v7 = vsub.f32 %v9502_v32, %v5591_v18 }
 0x210   :  { %v9457_v31 = vand.u32 4294901760, %v5420_v52  ;;  %v3330_v49 = vpop.f32.mrf.mxu1  ;;  %v9459_v58 = vpop.f32.mrf.mxu0  ;;  %v9478_v17 = vsub.f32 %v5419_v23, %v9455_v34  ;;  %v5579_v62 = vand.u32 4294901760, %v9485_v20 }
 0x211   :  { %v5427_v21 = vmax.f32 %v3329_v43, 0.0  ;;  %v3331_v6 = vadd.f32 %v3330_v49, %v3230_v1  ;;  %v5598_v49 = vsub.f32 %v9511_v2, %v5597_v22 }
 0x212   :  { %v9471_v19 = vsub.f32 %v5420_v52, %v9457_v31  ;;  %v5573_v15 = vand.u32 4294901760, %v9478_v17  ;;  %v5580_v59 = vsub.f32 %v9485_v20, %v5579_v62  ;;  %v5586_v52 = vsub.f32 %v9493_v16, %v5585_v12 }
 0x213   :  { %v9473_v51 = vand.u32 4294901760, %v5427_v21  ;;  %v5428_v29 = vmax.f32 %v3331_v6, 0.0 }
 0x214   :  { %v9480_v41 = vpop.f32.mrf.mxu0  ;;  %v9482_v13 = vpop.f32.mrf.mxu1  ;;  %v5567_v54 = vand.u32 4294901760, %v9471_v19  ;;  %v5574_v53 = vsub.f32 %v9478_v17, %v5573_v15  ;;  %v5581_v57 = vand.u32 4294901760, %v5580_v59 }
 0x215   :  { %v9488_v55 = vsub.f32 %v5427_v21, %v9473_v51  ;;  %v9490_v4 = vand.u32 4294901760, %v5428_v29 }
 0x216   :  { %v9495_v33 = vpop.f32.mrf.mxu0  ;;  %v9497_v5 = vpop.f32.mrf.mxu1  ;;  %v5568_v36 = vsub.f32 %v9471_v19, %v5567_v54  ;;  %v5575_v21 = vand.u32 4294901760, %v5574_v53  ;;  %v5599_v53 = vand.u32 4294901760, %v5598_v49 }
 0x217   :  { %v5561_v26 = vand.u32 4294901760, %v9488_v55  ;;  %v9506_v39 = vsub.f32 %v5428_v29, %v9490_v4  ;;  %5470 = vmatprep.subr.mxu0 %v9490_v4 }
 0x218   :  { %v9514_v10 = vpop.f32.mrf.mxu0  ;;  %5472 = vmatpush1.msra.mxu0 %v9473_v51  ;;  %v5569_v43 = vand.u32 4294901760, %v5568_v36 }
 0x219   :  { %v9517_v8 = vpop.f32.mrf.mxu1  ;;  %5474 = vmatprep.subr.mxu0 %v9457_v31  ;;  %v5555_v30 = vand.u32 4294901760, %v9506_v39  ;;  %v5562_v61 = vsub.f32 %v9488_v55, %v5561_v26 }
 0x21a   :  { %v9526_v46 = vpop.f32.mrf.mxu0  ;;  %5476 = vmatpush1.msra.mxu0 %v9455_v34 }
 0x21b   :  { %v9529_v47 = vpop.f32.mrf.mxu1  ;;  %5478 = vmatprep.subr.mxu0 %v9461_v42  ;;  %v5556_v0 = vsub.f32 %v9506_v39, %v5555_v30  ;;  %v5563_v37 = vand.u32 4294901760, %v5562_v61  ;;  %v5587_v61 = vand.u32 4294901760, %v5586_v52 }
 0x21c   :  { %v9543_v14 = vpop.f32.mrf.mxu0  ;;  %5480 = vmatpush1.msra.mxu0 %v9463_v50 }
 0x21d   :  { %v9546_v56 = vpop.f32.mrf.mxu1  ;;  %5482 = vmatprep.subr.mxu0 %v9468_v60  ;;  %v5557_v23 = vand.u32 4294901760, %v5556_v0 }
 0x21e   :  { %v9555_v11 = vpop.f32.mrf.mxu0  ;;  %5484 = vmatpush1.msra.mxu0 %v9475_v63 }
 0x21f   :  { %v9558_v1 = vpop.f32.mrf.mxu1  ;;  %5523 = vmatmul.mubr.f32.vlgmr.msra.gmra.mxu0 %v9532_v44  ;;  %5558 = vmatprep.subr.mxu1 %v5557_v23 }
 0x220   :  { %5667 = vmatprep.subr.mxu0 %v9506_v39  ;;  %5564 = vmatpush1.msra.mxu1 %v5563_v37  ;;  %v5593_v39 = vand.u32 4294901760, %v5592_v7 }
 0x221   :  { %v9568_v6 = vpop.f32.mrf.mxu1  ;;  %v9570_v29 = vpop.f32.mrf.mxu0  ;;  %5670 = vmatpush1.msra.mxu0 %v9488_v55  ;;  %5570 = vmatprep.subr.mxu1 %v5569_v43 }
 0x222   :  { %5673 = vmatprep.subr.mxu0 %v9471_v19  ;;  %5576 = vmatpush1.msra.mxu1 %v5575_v21 }
 0x223   :  { %v9574_v0 = vpop.f32.mrf.mxu1  ;;  %v9576_v36 = vpop.f32.mrf.mxu0  ;;  %5676 = vmatpush1.msra.mxu0 %v9478_v17  ;;  %5582 = vmatprep.subr.mxu1 %v5581_v57 }
 0x224   :  { %5679 = vmatprep.subr.mxu0 %v9485_v20  ;;  %5588 = vmatpush1.msra.mxu1 %v5587_v61 }
 0x225   :  { %v9580_v23 = vpop.f32.mrf.mxu0  ;;  %v9582_v37 = vpop.f32.mrf.mxu1  ;;  %5682 = vmatpush1.msra.mxu0 %v9493_v16  ;;  %5594 = vmatprep.subr.mxu1 %v5593_v39 }
 0x226   :  { %5685 = vmatprep.subr.mxu0 %v9502_v32  ;;  %5600 = vmatpush1.msra.mxu1 %v5599_v53  ;;  %v3426_v32 = vadd.f32 %v9459_v58, %v9426_v48 }
 0x227   :  { %v9586_v59 = vpop.f32.mrf.mxu0  ;;  %v9588_v52 = vpop.f32.mrf.mxu1  ;;  %5688 = vmatpush1.msra.mxu0 %v9511_v2  ;;  %5635 = vmatmul.mubr.f32.vlgmr.msra.gmra.mxu1 %v9447_v40 }
 0x228   :  { %5721 = vmatprep.mubr.f32.mxu0 %v10425_v3  ;;  %5755 = vmatprep.subr.mxu1 %v9490_v4 }
 0x229   :  { %v9594_v43 = vpop.f32.mrf.mxu0  ;;  %5839 = vmatprep.subr.mxu0 %v5555_v30  ;;  %5724 = vmatmul.mubr.f32.vlgmr.msra.gmra.mxu0 %v9453_v28 }
 0x22a   :  { %v9597_v7 = vpop.f32.mrf.mxu1  ;;  %5757 = vmatpush1.msra.mxu1 %v9473_v51  ;;  %5843 = vmatpush1.msra.mxu0 %v5561_v26 }
 0x22b   :  { %v9602_v49 = vpop.f32.mrf.mxu0  ;;  %5759 = vmatprep.subr.mxu1 %v9457_v31  ;;  %5847 = vmatprep.subr.mxu0 %v5567_v54  ;;  %v3424_v54 = vadd.f32 %v9450_v25, %v9426_v48  ;;  %v3435_v25 = vadd.f32 %v9480_v41, %v9424_v38 }
 0x22c   :  { %v3784_v21 = vpop.f32.mrf.mxu1  ;;  %5761 = vmatpush1.msra.mxu1 %v9455_v34  ;;  %5851 = vmatpush1.msra.mxu0 %v5573_v15  ;;  %v3567_v15 = vadd.f32 %v9529_v47, %v3426_v32 }
 0x22d   :  { %v9610_v30 = vpop.f32.mrf.mxu0  ;;  %5763 = vmatprep.subr.mxu1 %v9461_v42  ;;  %5855 = vmatprep.subr.mxu0 %v5579_v62 }
 0x22e   :  { %v9615_v55 = vpop.f32.mrf.mxu1  ;;  %5765 = vmatpush1.msra.mxu1 %v9463_v50  ;;  %5859 = vmatpush1.msra.mxu0 %v5585_v12 }
 0x22f   :  { %v9620_v19 = vpop.f32.mrf.mxu0  ;;  %5767 = vmatprep.subr.mxu1 %v9468_v60  ;;  %5863 = vmatprep.subr.mxu0 %v5591_v18  ;;  %v3572_v18 = vadd.f32 %v9546_v56, %v3435_v25 }
 0x230   :  { %v3793_v17 = vpop.f32.mrf.mxu1  ;;  %5769 = vmatpush1.msra.mxu1 %v9475_v63  ;;  %5802 = vmatprep.mubr.f32.mxu1 %v10425_v3 }
 0x231   :  { %v3903_v20 = vpop.f32.mrf.mxu0  ;;  %5867 = vmatpush1.msra.mxu0 %v5597_v22  ;;  %5806 = vmatmul.mubr.f32.vlgmr.msra.gmra.mxu1 %v9466_v24  ;;  %v3684_v56 = vadd.f32 %v9580_v23, %v3572_v18 }
 0x232   :  { %v9630_v16 = vpop.f32.mrf.mxu1  ;;  %5933 = vmatprep.subr.mxu1 %v9490_v4  ;;  %5900 = vmatprep.mubr.f32.mxu0 %v10425_v3  ;;  %v3415_v4 = vadd.f32 %v9445_v27, %v9429_v9  ;;  %v3437_v27 = vadd.f32 %v9495_v33, %v9424_v38 }
 0x233   :  { %v3905_v26 = vpop.f32.mrf.mxu0  ;;  %5935 = vmatpush1.msra.mxu1 %v9473_v51  ;;  %5902 = vmatmul.mubr.f32.vlgmr.msra.gmra.mxu0 %v9447_v40  ;;  %v3413_v51 = vadd.f32 %v9443_v45, %v9429_v9 }
 0x234   :  { %v9640_v2 = vpop.f32.mrf.mxu1  ;;  %5937 = vmatprep.subr.mxu1 %v9457_v31  ;;  %5980 = vmatprep.mubr.f32.mxu1 %v10425_v3  ;;  %v3565_v31 = vadd.f32 %v9517_v8, %v3424_v54  ;;  %v3560_v12 = vadd.f32 %v9497_v5, %v3415_v4  ;;  %v3574_v33 = vadd.f32 %v9558_v1, %v3437_v27 }
 0x235   :  { %v3910_v58 = vpop.f32.mrf.mxu0  ;;  %5939 = vmatpush1.msra.mxu1 %v9455_v34  ;;  %6060 = vmatprep.mubr.f32.mxu0 %v10425_v3  ;;  %v3678_v34 = vadd.f32 %v9576_v36, %v3567_v15  ;;  %v3558_v45 = vadd.f32 %v9482_v13, %v3413_v51  ;;  %v3792_v36 = vadd.f32 %v9615_v55, %v3684_v56 }
 0x236   :  { %v3997_v62 = vpop.f32.mrf.mxu1  ;;  %5941 = vmatprep.subr.mxu1 %v9461_v42  ;;  %v3676_v41 = vadd.f32 %v9570_v29, %v3565_v31  ;;  %v3446_v42 = vadd.f32 %v9514_v10, %v9422_v35  ;;  %v3670_v5 = vadd.f32 %v9555_v11, %v3560_v12  ;;  %v3686_v11 = vadd.f32 %v9586_v59, %v3574_v33 }
 0x237   :  { %v3912_v47 = vpop.f32.mrf.mxu0  ;;  %5943 = vmatpush1.msra.mxu1 %v9463_v50  ;;  %v3785_v22 = vadd.f32 %v3784_v21, %v3678_v34  ;;  %v3448_v50 = vadd.f32 %v9526_v46, %v9422_v35  ;;  %v3668_v13 = vadd.f32 %v9543_v14, %v3558_v45  ;;  %v3911_v32 = vadd.f32 %v3910_v58, %v3792_v36 }
 0x238   :  { %v3999_v8 = vpop.f32.mrf.mxu1  ;;  %5945 = vmatprep.subr.mxu1 %v9468_v60  ;;  %v3783_v60 = vadd.f32 %v9597_v7, %v3676_v41  ;;  %v3579_v10 = vadd.f32 %v9568_v6, %v3446_v42  ;;  %v3776_v1 = vadd.f32 %v9588_v52, %v3670_v5  ;;  %v3794_v7 = vadd.f32 %v3793_v17, %v3686_v11 }
 0x239   :  { %v3917_v57 = vpop.f32.mrf.mxu0  ;;  %5947 = vmatpush1.msra.mxu1 %v9475_v63  ;;  %v3906_v61 = vadd.f32 %v3905_v26, %v3785_v22  ;;  %v3581_v46 = vadd.f32 %v9574_v0, %v3448_v50  ;;  %v3774_v14 = vadd.f32 %v9582_v37, %v3668_v13 }
 0x23a   :  { %v4004_v29 = vpop.f32.mrf.mxu1  ;;  %5982 = vmatmul.mubr.f32.vlgmr.msra.gmra.mxu1 %v9447_v40  ;;  %v3904_v39 = vadd.f32 %v3903_v20, %v3783_v60  ;;  %v3692_v23 = vadd.f32 %v9594_v43, %v3579_v10  ;;  %v3899_v6 = vadd.f32 %v9620_v19, %v3776_v1  ;;  %v3913_v55 = vadd.f32 %v3912_v47, %v3794_v7 }
 0x23b   :  { %v3919_v63 = vpop.f32.mrf.mxu0  ;;  %6176 = vmatprep.mubr.f32.mxu1 %v10425_v3  ;;  %v3897_v52 = vadd.f32 %v9610_v30, %v3774_v14  ;;  %v3694_v0 = vadd.f32 %v9602_v49, %v3581_v46 }
 0x23c   :  { %v4006_v53 = vpop.f32.mrf.mxu1  ;;  %v4005_v26 = vadd.f32 %v4004_v29, %v3904_v39  ;;  %v3801_v37 = vadd.f32 %v9630_v16, %v3692_v23  ;;  %v4000_v20 = vadd.f32 %v3999_v8, %v3899_v6 }
 0x23d   :  { %v4007_v59 = vadd.f32 %v4006_v53, %v3906_v61  ;;  %v9684_v21 = vpop.f32.mrf.mxu0  ;;  %v3998_v43 = vadd.f32 %v3997_v62, %v3897_v52  ;;  %v3803_v19 = vadd.f32 %v9640_v2, %v3694_v0 }
 0x23e   :  { %v4011_v54 = vpop.f32.mrf.mxu1  ;;  %v3918_v51 = vadd.f32 %v3917_v57, %v3801_v37  ;;  %v5413_v58 = vmax.f32 %v4005_v26, 0.0  ;;  %v5406_v49 = vmax.f32 %v4000_v20, 0.0 }
 0x23f   :  { %v9689_v4 = vpop.f32.mrf.mxu0  ;;  %v4012_v17 = vadd.f32 %v4011_v54, %v3911_v32  ;;  %v5414_v25 = vmax.f32 %v4007_v59, 0.0  ;;  %v3920_v34 = vadd.f32 %v3919_v63, %v3803_v19  ;;  %v5405_v18 = vmax.f32 %v3998_v43, 0.0 }
 0x240   :  { %v4013_v15 = vpop.f32.mrf.mxu1  ;;  %v9702_v5 = vand.u32 4294901760, %v5413_v58  ;;  %v9706_v57 = vand.u32 4294901760, %v5406_v49 }
 0x241   :  { %v4014_v31 = vadd.f32 %v4013_v15, %v3913_v55  ;;  %v9692_v30 = vpop.f32.mrf.mxu0  ;;  %v5421_v27 = vmax.f32 %v4012_v17, 0.0  ;;  %v9698_v8 = vand.u32 4294901760, %v5414_v25  ;;  %v9715_v29 = vand.u32 4294901760, %v5405_v18 }
 0x242   :  { %v4018_v12 = vpop.f32.mrf.mxu1  ;;  %v9733_v14 = vsub.f32 %v5413_v58, %v9702_v5  ;;  %v9736_v36 = vsub.f32 %v5406_v49, %v9706_v57 }
 0x243   :  { %v5422_v16 = vmax.f32 %v4014_v31, 0.0  ;;  %v4019_v47 = vadd.f32 %v4018_v12, %v3918_v51  ;;  %v9694_v45 = vpop.f32.mrf.mxu0  ;;  %v9696_v62 = vand.u32 4294901760, %v5421_v27  ;;  %v9723_v1 = vsub.f32 %v5414_v25, %v9698_v8 }
 0x244   :  { %v4020_v41 = vpop.f32.mrf.mxu1  ;;  %v9749_v59 = vsub.f32 %v5405_v18, %v9715_v29  ;;  %v6128_v37 = vand.u32 4294901760, %v9733_v14  ;;  %v6134_v15 = vand.u32 4294901760, %v9736_v36 }
 0x245   :  { %v9700_v2 = vand.u32 4294901760, %v5422_v16  ;;  %v5429_v42 = vmax.f32 %v4019_v47, 0.0  ;;  %v4021_v33 = vadd.f32 %v4020_v41, %v3920_v34  ;;  %v9718_v10 = vsub.f32 %v5421_v27, %v9696_v62 }
 0x246   :  { %v9704_v22 = vpop.f32.mrf.mxu1  ;;  %v6122_v0 = vand.u32 4294901760, %v9723_v1  ;;  %v10402_v19 = vand.u32 4294901760, %v9749_v59  ;;  %v6129_v12 = vsub.f32 %v9733_v14, %v6128_v37  ;;  %v6135_v47 = vsub.f32 %v9736_v36, %v6134_v15 }
 0x247   :  { %v9709_v50 = vsub.f32 %v5422_v16, %v9700_v2  ;;  %v9711_v13 = vand.u32 4294901760, %v5429_v42  ;;  %v5430_v56 = vmax.f32 %v4021_v33, 0.0  ;;  %v9713_v60 = vpop.f32.mrf.mxu0  ;;  %v6116_v52 = vand.u32 4294901760, %v9718_v10 }
 0x248   :  { %v9720_v11 = vpop.f32.mrf.mxu1  ;;  %v6123_v27 = vsub.f32 %v9723_v1, %v6122_v0  ;;  %v6141_v18 = vsub.f32 %v9749_v59, %v10402_v19 }
 0x249   :  { %v9726_v61 = vsub.f32 %v5429_v42, %v9711_v13  ;;  %v9728_v63 = vand.u32 4294901760, %v5430_v56  ;;  %v9730_v46 = vpop.f32.mrf.mxu0  ;;  %v6110_v6 = vand.u32 4294901760, %v9709_v50  ;;  %v6117_v51 = vsub.f32 %v9718_v10, %v6116_v52 }
 0x24b   :  { %v6104_v39 = vand.u32 4294901760, %v9726_v61  ;;  %v9740_v53 = vsub.f32 %v5430_v56, %v9728_v63  ;;  %v9742_v23 = vpop.f32.mrf.mxu0  ;;  %v9744_v7 = vpop.f32.mrf.mxu1  ;;  %6013 = vmatprep.subr.mxu0 %v9728_v63  ;;  %v6111_v17 = vsub.f32 %v9709_v50, %v6110_v6  ;;  %v6118_v33 = vand.u32 4294901760, %v6117_v51 }
 0x24c   :  { %6015 = vmatpush1.msra.mxu0 %v9711_v13  ;;  %v6124_v56 = vand.u32 4294901760, %v6123_v27  ;;  %v6142_v51 = vand.u32 4294901760, %v6141_v18 }
 0x24d   :  { %v9753_v32 = vpop.f32.mrf.mxu0  ;;  %v9755_v26 = vpop.f32.mrf.mxu1  ;;  %6017 = vmatprep.subr.mxu0 %v9700_v2  ;;  %v6098_v54 = vand.u32 4294901760, %v9740_v53  ;;  %v6105_v55 = vsub.f32 %v9726_v61, %v6104_v39  ;;  %v6112_v16 = vand.u32 4294901760, %v6111_v17  ;;  %v6130_v17 = vand.u32 4294901760, %v6129_v12 }
 0x24e   :  { %6019 = vmatpush1.msra.mxu0 %v9696_v62 }
 0x24f   :  { %v9765_v20 = vpop.f32.mrf.mxu0  ;;  %6021 = vmatprep.subr.mxu0 %v9698_v8  ;;  %v6099_v43 = vsub.f32 %v9740_v53, %v6098_v54  ;;  %v6106_v34 = vand.u32 4294901760, %v6105_v55 }
 0x250   :  { %v9777_v25 = vpop.f32.mrf.mxu1  ;;  %6023 = vmatpush1.msra.mxu0 %v9702_v5 }
 0x251   :  { %v9780_v31 = vpop.f32.mrf.mxu0  ;;  %6025 = vmatprep.subr.mxu0 %v9706_v57  ;;  %v6100_v58 = vand.u32 4294901760, %v6099_v43 }
 0x252   :  { %v9789_v49 = vpop.f32.mrf.mxu1  ;;  %6027 = vmatpush1.msra.mxu0 %v9715_v29 }
 0x253   :  { %6066 = vmatmul.mubr.f32.vlgmr.msra.gmra.mxu0 %v9532_v44  ;;  %6101 = vmatprep.subr.mxu1 %v6100_v58  ;;  %v6136_v58 = vand.u32 4294901760, %v6135_v47 }
 0x254   :  { %v9799_v41 = vpop.f32.mrf.mxu1  ;;  %v9801_v42 = vpop.f32.mrf.mxu0  ;;  %6210 = vmatprep.subr.mxu0 %v9740_v53  ;;  %6107 = vmatpush1.msra.mxu1 %v6106_v34 }
 0x255   :  { %6213 = vmatpush1.msra.mxu0 %v9726_v61  ;;  %6113 = vmatprep.subr.mxu1 %v6112_v16 }
 0x256   :  { %v9805_v55 = vpop.f32.mrf.mxu1  ;;  %v9807_v43 = vpop.f32.mrf.mxu0  ;;  %6216 = vmatprep.subr.mxu0 %v9709_v50  ;;  %6119 = vmatpush1.msra.mxu1 %v6118_v33 }
 0x257   :  { %6219 = vmatpush1.msra.mxu0 %v9718_v10  ;;  %6125 = vmatprep.subr.mxu1 %v6124_v56 }
 0x258   :  { %v9811_v19 = vpop.f32.mrf.mxu0  ;;  %v9813_v53 = vpop.f32.mrf.mxu1  ;;  %6222 = vmatprep.subr.mxu0 %v9723_v1  ;;  %6131 = vmatpush1.msra.mxu1 %v6130_v17 }
 0x259   :  { %6225 = vmatpush1.msra.mxu0 %v9733_v14  ;;  %6137 = vmatprep.subr.mxu1 %v6136_v58  ;;  %v4116_v14 = vadd.f32 %v9694_v45, %v9426_v48 }
 0x25a   :  { %v9817_v27 = vpop.f32.mrf.mxu0  ;;  %v9819_v34 = vpop.f32.mrf.mxu1  ;;  %6228 = vmatprep.subr.mxu0 %v9736_v36  ;;  %6143 = vmatpush1.msra.mxu1 %v6142_v51  ;;  %v4114_v36 = vadd.f32 %v9692_v30, %v9426_v48  ;;  %v4125_v30 = vadd.f32 %v9713_v60, %v9424_v38 }
 0x25b   :  { %6231 = vmatpush1.msra.mxu0 %v9749_v59  ;;  %6178 = vmatmul.mubr.f32.vlgmr.msra.gmra.mxu1 %v9447_v40 }
 0x25c   :  { %v9824_v12 = vpop.f32.mrf.mxu0  ;;  %6264 = vmatprep.mubr.f32.mxu0 %v10425_v3  ;;  %6298 = vmatprep.subr.mxu1 %v9728_v63  ;;  %v4262_v60 = vadd.f32 %v9777_v25, %v4125_v30 }
 0x25d   :  { %v9828_v16 = vpop.f32.mrf.mxu1  ;;  %6382 = vmatprep.subr.mxu0 %v6098_v54  ;;  %6267 = vmatmul.mubr.f32.vlgmr.msra.gmra.mxu0 %v9453_v28 }
 0x25e   :  { %v9831_v47 = vpop.f32.mrf.mxu0  ;;  %6300 = vmatpush1.msra.mxu1 %v9711_v13  ;;  %6386 = vmatpush1.msra.mxu0 %v6104_v39  ;;  %v10522_v39 = vand.u32 4294901760, %v9749_v59  ;;  %v4105_v59 = vadd.f32 %v9689_v4, %v9429_v9  ;;  %v4127_v4 = vadd.f32 %v9730_v46, %v9424_v38 }
 0x25f   :  { %v4474_v18 = vpop.f32.mrf.mxu1  ;;  %6302 = vmatprep.subr.mxu1 %v9700_v2  ;;  %6390 = vmatprep.subr.mxu0 %v6110_v6 }
 0x260   :  { %v9839_v33 = vpop.f32.mrf.mxu0  ;;  %6304 = vmatpush1.msra.mxu1 %v9696_v62  ;;  %6394 = vmatpush1.msra.mxu0 %v6116_v52  ;;  %v4264_v46 = vadd.f32 %v9789_v49, %v4127_v4 }
 0x261   :  { %v9844_v54 = vpop.f32.mrf.mxu1  ;;  %6306 = vmatprep.subr.mxu1 %v9698_v8  ;;  %6398 = vmatprep.subr.mxu0 %v6122_v0  ;;  %v4257_v0 = vadd.f32 %v9755_v26, %v4116_v14 }
 0x262   :  { %v9849_v61 = vpop.f32.mrf.mxu0  ;;  %6308 = vmatpush1.msra.mxu1 %v9702_v5  ;;  %6402 = vmatpush1.msra.mxu0 %v6128_v37 }
 0x263   :  { %v9854_v50 = vpop.f32.mrf.mxu1  ;;  %6310 = vmatprep.subr.mxu1 %v9706_v57  ;;  %6406 = vmatprep.subr.mxu0 %v6134_v15  ;;  %v4368_v26 = vadd.f32 %v9807_v43, %v4257_v0 }
 0x264   :  { %v4593_v10 = vpop.f32.mrf.mxu0  ;;  %6312 = vmatpush1.msra.mxu1 %v9715_v29  ;;  %6345 = vmatprep.mubr.f32.mxu1 %v10425_v3 }
 0x265   :  { %v9861_v1 = vpop.f32.mrf.mxu1  ;;  %6410 = vmatpush1.msra.mxu0 %v10522_v39  ;;  %6349 = vmatmul.mubr.f32.vlgmr.msra.gmra.mxu1 %v9466_v24  ;;  %v4475_v43 = vadd.f32 %v4474_v18, %v4368_v26 }
 0x266   :  { %6476 = vmatprep.subr.mxu1 %v9728_v63  ;;  %v4595_v6 = vpop.f32.mrf.mxu0  ;;  %6443 = vmatprep.mubr.f32.mxu0 %v10425_v3  ;;  %v4103_v63 = vadd.f32 %v9684_v21, %v9429_v9 }
 0x267   :  { %v9872_v52 = vpop.f32.mrf.mxu1  ;;  %6478 = vmatpush1.msra.mxu1 %v9711_v13  ;;  %6445 = vmatmul.mubr.f32.vlgmr.msra.gmra.mxu0 %v9447_v40  ;;  %v4255_v13 = vadd.f32 %v9744_v7, %v4114_v36 }
 0x268   :  { %6480 = vmatprep.subr.mxu1 %v9700_v2  ;;  %v4600_v45 = vpop.f32.mrf.mxu0  ;;  %6523 = vmatprep.mubr.f32.mxu1 %v10425_v3  ;;  %v4250_v2 = vadd.f32 %v9720_v11, %v4105_v59  ;;  %v4248_v15 = vadd.f32 %v9704_v22, %v4103_v63  ;;  %v4138_v22 = vadd.f32 %v9753_v32, %v9422_v35 }
 0x269   :  { %v4687_v37 = vpop.f32.mrf.mxu1  ;;  %6482 = vmatpush1.msra.mxu1 %v9696_v62  ;;  %6603 = vmatprep.mubr.f32.mxu0 %v10425_v3  ;;  %v4366_v7 = vadd.f32 %v9801_v42, %v4255_v13  ;;  %v4136_v62 = vadd.f32 %v9742_v23, %v9422_v35  ;;  %v4374_v42 = vadd.f32 %v9811_v19, %v4262_v60 }
 0x26a   :  { %6484 = vmatprep.subr.mxu1 %v9698_v8  ;;  %v4602_v21 = vpop.f32.mrf.mxu0  ;;  %v4360_v11 = vadd.f32 %v9780_v31, %v4250_v2  ;;  %v4358_v25 = vadd.f32 %v9765_v20, %v4248_v15  ;;  %v4376_v31 = vadd.f32 %v9817_v27, %v4264_v46  ;;  %v4271_v32 = vadd.f32 %v9805_v55, %v4138_v22 }
 0x26b   :  { %v4689_v56 = vpop.f32.mrf.mxu1  ;;  %6486 = vmatpush1.msra.mxu1 %v9702_v5  ;;  %v4473_v5 = vadd.f32 %v9828_v16, %v4366_v7  ;;  %v4269_v23 = vadd.f32 %v9799_v41, %v4136_v62  ;;  %v4482_v19 = vadd.f32 %v9844_v54, %v4374_v42 }
 0x26c   :  { %6488 = vmatprep.subr.mxu1 %v9706_v57  ;;  %v4607_v8 = vpop.f32.mrf.mxu0  ;;  %v4466_v49 = vadd.f32 %v9819_v34, %v4360_v11  ;;  %v4596_v57 = vadd.f32 %v4595_v6, %v4475_v43  ;;  %v4464_v20 = vadd.f32 %v9813_v53, %v4358_v25  ;;  %v4484_v41 = vadd.f32 %v9854_v50, %v4376_v31 }
 0x26d   :  { %v4694_v17 = vpop.f32.mrf.mxu1  ;;  %6490 = vmatpush1.msra.mxu1 %v9715_v29  ;;  %v4594_v51 = vadd.f32 %v4593_v10, %v4473_v5  ;;  %v4382_v29 = vadd.f32 %v9824_v12, %v4269_v23  ;;  %v4601_v55 = vadd.f32 %v4600_v45, %v4482_v19  ;;  %v4384_v54 = vadd.f32 %v9831_v47, %v4271_v32 }
 0x26e   :  { %6525 = vmatmul.mubr.f32.vlgmr.msra.gmra.mxu1 %v9447_v40  ;;  %v4609_v58 = vpop.f32.mrf.mxu0  ;;  %v4589_v27 = vadd.f32 %v9849_v61, %v4466_v49  ;;  %v4587_v39 = vadd.f32 %v9839_v33, %v4464_v20  ;;  %v4603_v6 = vadd.f32 %v4602_v21, %v4484_v41 }
 0x26f   :  { %v4696_v16 = vpop.f32.mrf.mxu1  ;;  %6719 = vmatprep.mubr.f32.mxu1 %v10425_v3  ;;  %v4695_v14 = vadd.f32 %v4694_v17, %v4594_v51  ;;  %v4491_v10 = vadd.f32 %v9861_v1, %v4382_v29  ;;  %v4493_v61 = vadd.f32 %v9872_v52, %v4384_v54 }
 0x270   :  { %v4697_v34 = vadd.f32 %v4696_v16, %v4596_v57  ;;  %v9919_v18 = vpop.f32.mrf.mxu0  ;;  %v4690_v36 = vadd.f32 %v4689_v56, %v4589_v27  ;;  %v4688_v12 = vadd.f32 %v4687_v37, %v4587_v39 }
 0x271   :  { %v4701_v53 = vpop.f32.mrf.mxu1  ;;  %v4608_v63 = vadd.f32 %v4607_v8, %v4491_v10  ;;  %v5415_v45 = vmax.f32 %v4695_v14, 0.0  ;;  %v4610_v26 = vadd.f32 %v4609_v58, %v4493_v61 }
 0x272   :  { %v9924_v59 = vpop.f32.mrf.mxu0  ;;  %v4702_v50 = vadd.f32 %v4701_v53, %v4601_v55  ;;  %v5416_v30 = vmax.f32 %v4697_v34, 0.0  ;;  %v5408_v47 = vmax.f32 %v4690_v36, 0.0  ;;  %v5407_v60 = vmax.f32 %v4688_v12, 0.0 }
 0x273   :  { %v4703_v0 = vpop.f32.mrf.mxu1  ;;  %v9937_v11 = vand.u32 4294901760, %v5415_v45 }
 0x274   :  { %v4704_v13 = vadd.f32 %v4703_v0, %v4603_v6  ;;  %v9927_v33 = vpop.f32.mrf.mxu0  ;;  %v5423_v4 = vmax.f32 %v4702_v50, 0.0  ;;  %v9933_v56 = vand.u32 4294901760, %v5416_v30  ;;  %v9941_v8 = vand.u32 4294901760, %v5408_v47 }
 0x275   :  { %v4708_v2 = vpop.f32.mrf.mxu1  ;;  %v9950_v17 = vand.u32 4294901760, %v5407_v60  ;;  %v9968_v20 = vsub.f32 %v5415_v45, %v9937_v11 }
 0x276   :  { %v5424_v1 = vmax.f32 %v4704_v13, 0.0  ;;  %v4709_v21 = vadd.f32 %v4708_v2, %v4608_v63  ;;  %v9929_v15 = vpop.f32.mrf.mxu0  ;;  %v9931_v37 = vand.u32 4294901760, %v5423_v4  ;;  %v9958_v49 = vsub.f32 %v5416_v30, %v9933_v56 }
 0x277   :  { %v4710_v7 = vpop.f32.mrf.mxu1  ;;  %v9971_v19 = vsub.f32 %v5408_v47, %v9941_v8  ;;  %v9984_v34 = vsub.f32 %v5407_v60, %v9950_v17  ;;  %v6671_v10 = vand.u32 4294901760, %v9968_v20 }
 0x278   :  { %v9935_v52 = vand.u32 4294901760, %v5424_v1  ;;  %v5431_v62 = vmax.f32 %v4709_v21, 0.0  ;;  %v4711_v46 = vadd.f32 %v4710_v7, %v4610_v26  ;;  %v9953_v23 = vsub.f32 %v5423_v4, %v9931_v37 }
 0x279   :  { %v9939_v43 = vpop.f32.mrf.mxu1  ;;  %v6665_v54 = vand.u32 4294901760, %v9958_v49  ;;  %v6677_v0 = vand.u32 4294901760, %v9971_v19  ;;  %v10403_v61 = vand.u32 4294901760, %v9984_v34  ;;  %v6672_v2 = vsub.f32 %v9968_v20, %v6671_v10 }
 0x27a   :  { %v9944_v22 = vsub.f32 %v5424_v1, %v9935_v52  ;;  %v9946_v25 = vand.u32 4294901760, %v5431_v62  ;;  %v5432_v42 = vmax.f32 %v4711_v46, 0.0  ;;  %v9948_v5 = vpop.f32.mrf.mxu0  ;;  %v6659_v39 = vand.u32 4294901760, %v9953_v23 }
 0x27b   :  { %v9955_v31 = vpop.f32.mrf.mxu1  ;;  %v6666_v4 = vsub.f32 %v9958_v49, %v6665_v54  ;;  %v6678_v21 = vsub.f32 %v9971_v19, %v6677_v0  ;;  %v6684_v60 = vsub.f32 %v9984_v34, %v10403_v61 }
 0x27c   :  { %v9961_v57 = vsub.f32 %v5431_v62, %v9946_v25  ;;  %v9963_v58 = vand.u32 4294901760, %v5432_v42  ;;  %v9965_v32 = vpop.f32.mrf.mxu0  ;;  %v6653_v27 = vand.u32 4294901760, %v9944_v22  ;;  %v6660_v63 = vsub.f32 %v9953_v23, %v6659_v39 }
 0x27e   :  { %v6647_v51 = vand.u32 4294901760, %v9961_v57  ;;  %v9975_v16 = vsub.f32 %v5432_v42, %v9963_v58  ;;  %v9977_v29 = vpop.f32.mrf.mxu0  ;;  %v9979_v41 = vpop.f32.mrf.mxu1  ;;  %6556 = vmatprep.subr.mxu0 %v9963_v58  ;;  %v6654_v50 = vsub.f32 %v9944_v22, %v6653_v27  ;;  %v6661_v46 = vand.u32 4294901760, %v6660_v63 }
 0x27f   :  { %6558 = vmatpush1.msra.mxu0 %v9946_v25  ;;  %v6667_v42 = vand.u32 4294901760, %v6666_v4  ;;  %v6685_v63 = vand.u32 4294901760, %v6684_v60 }
 0x280   :  { %v9988_v55 = vpop.f32.mrf.mxu0  ;;  %v9990_v14 = vpop.f32.mrf.mxu1  ;;  %6560 = vmatprep.subr.mxu0 %v9935_v52  ;;  %v6641_v53 = vand.u32 4294901760, %v9975_v16  ;;  %v6648_v6 = vsub.f32 %v9961_v57, %v6647_v51  ;;  %v6655_v1 = vand.u32 4294901760, %v6654_v50  ;;  %v6673_v50 = vand.u32 4294901760, %v6672_v2 }
 0x281   :  { %6562 = vmatpush1.msra.mxu0 %v9931_v37 }
 0x282   :  { %v10000_v36 = vpop.f32.mrf.mxu0  ;;  %6564 = vmatprep.subr.mxu0 %v9933_v56  ;;  %v6642_v12 = vsub.f32 %v9975_v16, %v6641_v53  ;;  %v6649_v26 = vand.u32 4294901760, %v6648_v6 }
 0x283   :  { %v10012_v30 = vpop.f32.mrf.mxu1  ;;  %6566 = vmatpush1.msra.mxu0 %v9937_v11 }
 0x284   :  { %v10015_v13 = vpop.f32.mrf.mxu0  ;;  %6568 = vmatprep.subr.mxu0 %v9941_v8  ;;  %v6643_v45 = vand.u32 4294901760, %v6642_v12 }
 0x285   :  { %v10024_v47 = vpop.f32.mrf.mxu1  ;;  %6570 = vmatpush1.msra.mxu0 %v9950_v17 }
 0x286   :  { %6609 = vmatmul.mubr.f32.vlgmr.msra.gmra.mxu0 %v9532_v44  ;;  %6644 = vmatprep.subr.mxu1 %v6643_v45  ;;  %v6679_v45 = vand.u32 4294901760, %v6678_v21 }
 0x287   :  { %v10034_v7 = vpop.f32.mrf.mxu1  ;;  %v10036_v62 = vpop.f32.mrf.mxu0  ;;  %6753 = vmatprep.subr.mxu0 %v9975_v16  ;;  %6650 = vmatpush1.msra.mxu1 %v6649_v26 }
 0x288   :  { %6756 = vmatpush1.msra.mxu0 %v9961_v57  ;;  %6656 = vmatprep.subr.mxu1 %v6655_v1 }
 0x289   :  { %v10040_v6 = vpop.f32.mrf.mxu1  ;;  %v10042_v12 = vpop.f32.mrf.mxu0  ;;  %6759 = vmatprep.subr.mxu0 %v9944_v22  ;;  %6662 = vmatpush1.msra.mxu1 %v6661_v46 }
 0x28a   :  { %6762 = vmatpush1.msra.mxu0 %v9953_v23  ;;  %6668 = vmatprep.subr.mxu1 %v6667_v42 }
 0x28b   :  { %v10046_v61 = vpop.f32.mrf.mxu0  ;;  %v10048_v16 = vpop.f32.mrf.mxu1  ;;  %6765 = vmatprep.subr.mxu0 %v9958_v49  ;;  %6674 = vmatpush1.msra.mxu1 %v6673_v50 }
 0x28c   :  { %6768 = vmatpush1.msra.mxu0 %v9968_v20  ;;  %6680 = vmatprep.subr.mxu1 %v6679_v45  ;;  %v4806_v20 = vadd.f32 %v9929_v15, %v9426_v48 }
 0x28d   :  { %v10052_v4 = vpop.f32.mrf.mxu0  ;;  %v10054_v26 = vpop.f32.mrf.mxu1  ;;  %6771 = vmatprep.subr.mxu0 %v9971_v19  ;;  %6686 = vmatpush1.msra.mxu1 %v6685_v63  ;;  %v4804_v19 = vadd.f32 %v9927_v33, %v9426_v48  ;;  %v4815_v48 = vadd.f32 %v9948_v5, %v9424_v38 }
 0x28e   :  { %6774 = vmatpush1.msra.mxu0 %v9984_v34  ;;  %6721 = vmatmul.mubr.f32.vlgmr.msra.gmra.mxu1 %v9447_v40 }
 0x28f   :  { %v10059_v2 = vpop.f32.mrf.mxu0  ;;  %6807 = vmatprep.mubr.f32.mxu0 %v10425_v3  ;;  %6841 = vmatprep.subr.mxu1 %v9963_v58  ;;  %v4945_v33 = vadd.f32 %v9979_v41, %v4804_v19 }
 0x290   :  { %v10063_v1 = vpop.f32.mrf.mxu1  ;;  %6925 = vmatprep.subr.mxu0 %v6641_v53  ;;  %6810 = vmatmul.mubr.f32.vlgmr.msra.gmra.mxu0 %v9453_v28 }
 0x291   :  { %v10066_v21 = vpop.f32.mrf.mxu0  ;;  %6843 = vmatpush1.msra.mxu1 %v9946_v25  ;;  %6929 = vmatpush1.msra.mxu0 %v6647_v51  ;;  %v10523_v51 = vand.u32 4294901760, %v9984_v34  ;;  %v4795_v34 = vadd.f32 %v9924_v59, %v9429_v9  ;;  %v4817_v59 = vadd.f32 %v9965_v32, %v9424_v38  ;;  %v5056_v5 = vadd.f32 %v10036_v62, %v4945_v33 }
 0x292   :  { %v5164_v60 = vpop.f32.mrf.mxu1  ;;  %6845 = vmatprep.subr.mxu1 %v9935_v52  ;;  %6933 = vmatprep.subr.mxu0 %v6653_v27 }
 0x293   :  { %v10074_v46 = vpop.f32.mrf.mxu0  ;;  %6847 = vmatpush1.msra.mxu1 %v9931_v37  ;;  %6937 = vmatpush1.msra.mxu0 %v6659_v39  ;;  %v4954_v38 = vadd.f32 %v10024_v47, %v4817_v59 }
 0x294   :  { %v5171_v53 = vpop.f32.mrf.mxu1  ;;  %6849 = vmatprep.subr.mxu1 %v9933_v56  ;;  %6941 = vmatprep.subr.mxu0 %v6665_v54  ;;  %v4947_v54 = vadd.f32 %v9990_v14, %v4806_v20 }
 0x295   :  { %v10082_v57 = vpop.f32.mrf.mxu0  ;;  %6851 = vmatpush1.msra.mxu1 %v9937_v11  ;;  %6945 = vmatpush1.msra.mxu0 %v6671_v10  ;;  %v5066_v47 = vadd.f32 %v10052_v4, %v4954_v38 }
 0x296   :  { %v5173_v22 = vpop.f32.mrf.mxu1  ;;  %6853 = vmatprep.subr.mxu1 %v9941_v8  ;;  %6949 = vmatprep.subr.mxu0 %v6677_v0  ;;  %v5058_v14 = vadd.f32 %v10042_v12, %v4947_v54 }
 0x297   :  { %v5283_v23 = vpop.f32.mrf.mxu0  ;;  %6855 = vmatpush1.msra.mxu1 %v9950_v17  ;;  %6888 = vmatprep.mubr.f32.mxu1 %v10425_v3 }
 0x298   :  { %v10092_v49 = vpop.f32.mrf.mxu1  ;;  %6953 = vmatpush1.msra.mxu0 %v10523_v51  ;;  %6892 = vmatmul.mubr.f32.vlgmr.msra.gmra.mxu1 %v9466_v24  ;;  %v5165_v32 = vadd.f32 %v5164_v60, %v5058_v14 }
 0x299   :  { %7019 = vmatprep.subr.mxu1 %v9963_v58  ;;  %v5285_v27 = vpop.f32.mrf.mxu0  ;;  %6986 = vmatprep.mubr.f32.mxu0 %v10425_v3  ;;  %v4793_v58 = vadd.f32 %v9919_v18, %v9429_v9  ;;  %v4952_v18 = vadd.f32 %v10012_v30, %v4815_v48  ;;  %v5163_v30 = vadd.f32 %v10063_v1, %v5056_v5 }
 0x29a   :  { %v10103_v39 = vpop.f32.mrf.mxu1  ;;  %7021 = vmatpush1.msra.mxu1 %v9946_v25  ;;  %6988 = vmatmul.mubr.f32.vlgmr.msra.gmra.mxu0 %v9447_v40  ;;  %v5286_v62 = vadd.f32 %v5285_v27, %v5165_v32 }
 0x29b   :  { %7023 = vmatprep.subr.mxu1 %v9935_v52  ;;  %v5290_v15 = vpop.f32.mrf.mxu0  ;;  %7066 = vmatprep.mubr.f32.mxu1 %v10425_v3  ;;  %v4940_v52 = vadd.f32 %v9955_v31, %v4795_v34  ;;  %v4938_v9 = vadd.f32 %v9939_v43, %v4793_v58  ;;  %v5064_v0 = vadd.f32 %v10046_v61, %v4952_v18 }
 0x29c   :  { %v5377_v25 = vpop.f32.mrf.mxu1  ;;  %7025 = vmatpush1.msra.mxu1 %v9931_v37  ;;  %7146 = vmatprep.mubr.f32.mxu0 %v10425_v3  ;;  %v4826_v37 = vadd.f32 %v9977_v29, %v9422_v35 }
 0x29d   :  { %7027 = vmatprep.subr.mxu1 %v9933_v56  ;;  %v5292_v41 = vpop.f32.mrf.mxu0  ;;  %v5050_v31 = vadd.f32 %v10015_v13, %v4940_v52  ;;  %v4828_v56 = vadd.f32 %v9988_v55, %v9422_v35  ;;  %v5048_v43 = vadd.f32 %v10000_v36, %v4938_v9  ;;  %v5172_v55 = vadd.f32 %v5171_v53, %v5064_v0 }
 0x29e   :  { %v5379_v10 = vpop.f32.mrf.mxu1  ;;  %7029 = vmatpush1.msra.mxu1 %v9937_v11  ;;  %v4959_v29 = vadd.f32 %v10034_v7, %v4826_v37  ;;  %v5284_v36 = vadd.f32 %v5283_v23, %v5163_v30  ;;  %v5174_v7 = vadd.f32 %v5173_v22, %v5066_v47 }
 0x29f   :  { %7031 = vmatprep.subr.mxu1 %v9941_v8  ;;  %v5156_v13 = vadd.f32 %v10054_v26, %v5050_v31  ;;  %v4961_v35 = vadd.f32 %v10040_v6, %v4828_v56  ;;  %v5154_v8 = vadd.f32 %v10048_v16, %v5048_v43  ;;  %v5297_v61 = vpop.f32.mrf.mxu0  ;;  %v5291_v63 = vadd.f32 %v5290_v15, %v5172_v55 }
 0x2a0   :  { %v5384_v11 = vpop.f32.mrf.mxu1  ;;  %7033 = vmatpush1.msra.mxu1 %v9950_v17  ;;  %v5072_v17 = vadd.f32 %v10059_v2, %v4959_v29  ;;  %v5293_v1 = vadd.f32 %v5292_v41, %v5174_v7 }
 0x2a1   :  { %7068 = vmatmul.mubr.f32.vlgmr.msra.gmra.mxu1 %v9447_v40  ;;  %v5279_v12 = vadd.f32 %v10082_v57, %v5156_v13  ;;  %v5277_v45 = vadd.f32 %v10074_v46, %v5154_v8  ;;  %v5385_v4 = vadd.f32 %v5384_v11, %v5284_v36  ;;  %v5074_v6 = vadd.f32 %v10066_v21, %v4961_v35  ;;  %v5299_v23 = vpop.f32.mrf.mxu0 }
 0x2a2   :  { %v5386_v42 = vpop.f32.mrf.mxu1  ;;  %7262 = vmatprep.mubr.f32.mxu1 %v10425_v3  ;;  %v5181_v16 = vadd.f32 %v10092_v49, %v5072_v17 }
 0x2a3   :  { %v5387_v50 = vadd.f32 %v5386_v42, %v5286_v62  ;;  %v5380_v60 = vadd.f32 %v5379_v10, %v5279_v12  ;;  %v5378_v53 = vadd.f32 %v5377_v25, %v5277_v45  ;;  %v5183_v2 = vadd.f32 %v10103_v39, %v5074_v6 }
 0x2a4   :  { %v5391_v26 = vpop.f32.mrf.mxu1  ;;  %v5298_v22 = vadd.f32 %v5297_v61, %v5181_v16  ;;  %v5417_v19 = vmax.f32 %v5385_v4, 0.0 }
 0x2a5   :  { %v5392_v51 = vadd.f32 %v5391_v26, %v5291_v63  ;;  %v5418_v57 = vmax.f32 %v5387_v50, 0.0  ;;  %v5410_v54 = vmax.f32 %v5380_v60, 0.0  ;;  %v5300_v15 = vadd.f32 %v5299_v23, %v5183_v2 }
 0x2a6   :  { %v5393_v20 = vpop.f32.mrf.mxu1  ;;  %v5409_v48 = vmax.f32 %v5378_v53, 0.0  ;;  %v10158_v14 = vand.u32 4294901760, %v5417_v19 }
 0x2a7   :  { %v5394_v27 = vadd.f32 %v5393_v20, %v5293_v1  ;;  %v5425_v46 = vmax.f32 %v5392_v51, 0.0  ;;  %v10154_v25 = vand.u32 4294901760, %v5418_v57  ;;  %v10160_v9 = vand.u32 4294901760, %v5410_v54 }
 0x2a8   :  { %v5398_v34 = vpop.f32.mrf.mxu1  ;;  %v10167_v10 = vand.u32 4294901760, %v5409_v48  ;;  %v10179_v56 = vsub.f32 %v5417_v19, %v10158_v14 }
 0x2a9   :  { %v5426_v58 = vmax.f32 %v5394_v27, 0.0  ;;  %v5399_v21 = vadd.f32 %v5398_v34, %v5298_v22  ;;  %v10152_v49 = vand.u32 4294901760, %v5425_v46  ;;  %v10173_v38 = vsub.f32 %v5418_v57, %v10154_v25  ;;  %v10240_v34 = vpop.permute.xlu0 %5439 }
 0x2aa   :  { %v5400_v33 = vpop.f32.mrf.mxu1  ;;  %v10182_v43 = vsub.f32 %v5410_v54, %v10160_v9  ;;  %v10188_v29 = vsub.f32 %v5409_v48, %v10167_v10  ;;  %v7214_v35 = vand.u32 4294901760, %v10179_v56 }
 0x2ab   :  { %v10156_v59 = vand.u32 4294901760, %v5426_v58  ;;  %v5433_v52 = vmax.f32 %v5399_v21, 0.0  ;;  %v5401_v39 = vadd.f32 %v5400_v33, %v5300_v15  ;;  %v10170_v37 = vsub.f32 %v5425_v46, %v10152_v49 }
 0x2ac   :  { %v7208_v62 = vand.u32 4294901760, %v10173_v38  ;;  %v7220_v61 = vand.u32 4294901760, %v10182_v43  ;;  %v7226_v42 = vand.u32 4294901760, %v10188_v29  ;;  %v7215_v50 = vsub.f32 %v10179_v56, %v7214_v35 }
 0x2ad   :  { %v10163_v18 = vsub.f32 %v5426_v58, %v10156_v59  ;;  %v10165_v5 = vand.u32 4294901760, %v5433_v52  ;;  %v5434_v41 = vmax.f32 %v5401_v39, 0.0  ;;  %v7202_v47 = vand.u32 4294901760, %v10170_v37 }
 0x2ae   :  { %v7209_v12 = vsub.f32 %v10173_v38, %v7208_v62  ;;  %v7221_v4 = vsub.f32 %v10182_v43, %v7220_v61  ;;  %v7227_v26 = vsub.f32 %v10188_v29, %v7226_v42  ;;  %v7216_v1 = vand.u32 4294901760, %v7215_v50 }
 0x2af   :  { %v7189_v31 = vsub.f32 %v5433_v52, %v10165_v5  ;;  %v10176_v32 = vand.u32 4294901760, %v5434_v41  ;;  %v7196_v11 = vand.u32 4294901760, %v10163_v18  ;;  %v7203_v17 = vsub.f32 %v10170_v37, %v7202_v47  ;;  %v7899_v52 = vld [vmem:[%s10336_s0] sm:$0xff] }
 0x2b0   :  { %v7210_v16 = vand.u32 4294901760, %v7209_v12  ;;  %v7228_v60 = vand.u32 4294901760, %v7227_v26  ;;  %vm7617_vm3 = vcmp.le.f32.partialorder %v7899_v52, 0.0  ;;  %vm7619_vm4 = vcmp.ge.f32.partialorder %v7899_v52, 1.0 }
 0x2b1   :  { %v7190_v0 = vand.u32 4294901760, %v7189_v31  ;;  %v7183_v30 = vsub.f32 %v5434_v41, %v10176_v32  ;;  %7099 = vmatprep.subr.mxu0 %v10176_v32  ;;  %v7197_v36 = vsub.f32 %v10163_v18, %v7196_v11  ;;  %v7204_v6 = vand.u32 4294901760, %v7203_v17  ;;  %vm7621_vm5 = vmor %vm7617_vm3, %vm7619_vm4 }
 0x2b2   :  { %7101 = vmatpush1.msra.mxu0 %v10165_v5  ;;  %vm7633_vm6 = vcmp.lt.f32.partialorder %v7899_v52, 0.5  ;;  %v7904_v50 = vmov 0.125  }
 0x2b3   :  { %7103 = vmatprep.subr.mxu0 %v10156_v59  ;;  %v7184_v13 = vand.u32 4294901760, %v7183_v30  ;;  %v7191_v8 = vsub.f32 %v7189_v31, %v7190_v0  ;;  %v7198_v63 = vand.u32 4294901760, %v7197_v36 }
 0x2b4   :  { %7105 = vmatpush1.msra.mxu0 %v10152_v49 }
 0x2b5   :  { %7107 = vmatprep.subr.mxu0 %v10154_v25  ;;  %v7185_v55 = vsub.f32 %v7183_v30, %v7184_v13  ;;  %v7192_v45 = vand.u32 4294901760, %v7191_v8 }
 0x2b6   :  { %7109 = vmatpush1.msra.mxu0 %v10158_v14 }
 0x2b7   :  { %7111 = vmatprep.subr.mxu0 %v10160_v9  ;;  %v7186_v7 = vand.u32 4294901760, %v7185_v55 }
 0x2b8   :  { %7113 = vmatpush1.msra.mxu0 %v10167_v10 }
 0x2b9   :  { %7152 = vmatmul.mubr.f32.vlgmr.msra.gmra.mxu0 %v9532_v44  ;;  %7187 = vmatprep.subr.mxu1 %v7186_v7  ;;  %v7222_v44 = vand.u32 4294901760, %v7221_v4 }
 0x2ba   :  { %7296 = vmatprep.subr.mxu0 %v7183_v30  ;;  %7193 = vmatpush1.msra.mxu1 %v7192_v45  ;;  %v7635_v45 = vsel %vm7633_vm6, 1.0, %v7904_v50 }
 0x2bb   :  { %7299 = vmatpush1.msra.mxu0 %v7189_v31  ;;  %7199 = vmatprep.subr.mxu1 %v7198_v63  ;;  %v7905_v63 = vmov 0.25  }
 0x2bc   :  { %7302 = vmatprep.subr.mxu0 %v10163_v18  ;;  %7205 = vmatpush1.msra.mxu1 %v7204_v6  ;;  %v7637_v4 = vsel %vm7633_vm6, 2.5, %v7905_v63  ;;  %v10525_v6 = vld [vmem:[#allocation3_spill] sm:$0xff] }
 0x2bd   :  { %7305 = vmatpush1.msra.mxu0 %v10170_v37  ;;  %7211 = vmatprep.subr.mxu1 %v7210_v16 }
 0x2be   :  { %7308 = vmatprep.subr.mxu0 %v10173_v38  ;;  %7217 = vmatpush1.msra.mxu1 %v7216_v1  ;;  %v7884_v1 = vrot.slane %v7635_v45, 9 }
 0x2bf   :  { %7311 = vmatpush1.msra.mxu0 %v10179_v56  ;;  %7223 = vmatprep.subr.mxu1 %v7222_v44 }
 0x2c0   :  { %7314 = vmatprep.subr.mxu0 %v10182_v43  ;;  %7229 = vmatpush1.msra.mxu1 %v7228_v60  ;;  %v10524_v43 = vmov 0   ;;  %v7888_v60 = vrot.slane %v7637_v4, 9 }
 0x2c1   :  { %7317 = vmatpush1.msra.mxu0 %v10188_v29  ;;  %7264 = vmatmul.mubr.f32.vlgmr.msra.gmra.mxu1 %v9447_v40 }
 0x2c2   :  { %7350 = vmatprep.mubr.f32.mxu0 %v10425_v3  ;;  %7384 = vmatprep.subr.mxu1 %v10176_v32 }
 0x2c3   :  { %7468 = vmatprep.subr.mxu0 %v7184_v13  ;;  %7353 = vmatmul.mubr.f32.vlgmr.msra.gmra.mxu0 %v9453_v28 }
 0x2c4   :  { %7386 = vmatpush1.msra.mxu1 %v10165_v5  ;;  %7472 = vmatpush1.msra.mxu0 %v7190_v0  ;;  %v7623_v0 = vsel %vm7621_vm5, 1, %v10524_v43 }
 0x2c5   :  { %7388 = vmatprep.subr.mxu1 %v10156_v59  ;;  %7476 = vmatprep.subr.mxu0 %v7196_v11 }
 0x2c6   :  { %7390 = vmatpush1.msra.mxu1 %v10152_v49  ;;  %7480 = vmatpush1.msra.mxu0 %v7202_v47 }
 0x2c7   :  { %7392 = vmatprep.subr.mxu1 %v10154_v25  ;;  %7484 = vmatprep.subr.mxu0 %v7208_v62 }
 0x2c8   :  { %7394 = vmatpush1.msra.mxu1 %v10158_v14  ;;  %7488 = vmatpush1.msra.mxu0 %v7214_v35  ;;  %v7882_v35 = vrot.slane %v7623_v0, 9 }
 0x2c9   :  { %7396 = vmatprep.subr.mxu1 %v10160_v9  ;;  %7492 = vmatprep.subr.mxu0 %v7220_v61 }
 0x2ca   :  { %7398 = vmatpush1.msra.mxu1 %v10167_v10  ;;  %7431 = vmatprep.mubr.f32.mxu1 %v10425_v3  ;;  %vm7629_vm7 = vcmp.ne.s32.totalorder %v7882_v35, 0 }
 0x2cb   :  { %7496 = vmatpush1.msra.mxu0 %v7226_v42  ;;  %7435 = vmatmul.mubr.f32.vlgmr.msra.gmra.mxu1 %v9466_v24  ;;  %vm7631_vm8 = vmor %vm7617_vm3, %vm7629_vm7 }
 0x2cc   :  { %7562 = vmatprep.subr.mxu1 %v10176_v32  ;;  %7529 = vmatprep.mubr.f32.mxu0 %v10425_v3 }
 0x2cd   :  { %7564 = vmatpush1.msra.mxu1 %v10165_v5  ;;  %7531 = vmatmul.mubr.f32.vlgmr.msra.gmra.mxu0 %v9447_v40 }
 0x2ce   :  { %7566 = vmatprep.subr.mxu1 %v10156_v59  ;;  %7609 = vmatprep.mubr.f32.mxu1 %v10425_v3 }
 0x2cf   :  { %7568 = vmatpush1.msra.mxu1 %v10152_v49 }
 0x2d0   :  { %7570 = vmatprep.subr.mxu1 %v10154_v25 }
 0x2d1   :  { %7572 = vmatpush1.msra.mxu1 %v10158_v14 }
 0x2d2   :  { %7574 = vmatprep.subr.mxu1 %v10160_v9 }
 0x2d3   :  { %7576 = vmatpush1.msra.mxu1 %v10167_v10 }
 0x2d4   :  { %7611 = vmatmul.mubr.f32.vlgmr.msra.gmra.mxu1 %v9447_v40 }
 0x2df   :  { %v5524_v28 = vpop.f32.mrf.mxu0 }
 0x2e0   :  { %v5525_v40 = vadd.f32 %v5524_v28, %v10240_v34  ;;  %v10526_v28 = vld [vmem:[#allocation2_spill] sm:$0xff] }
 0x2e1   :  { %v5526_v53 = vpop.f32.mrf.mxu0 }
 0x2e2   :  { %v5527_v15 = vadd.f32 %v5526_v53, %v10240_v34  ;;  %v10260_v53 = vsub.s32 2, %v10526_v28 }
 0x2e7   :  { %v5636_v24 = vpop.f32.mrf.mxu1 }
 0x2e8   :  { %v5637_v33 = vadd.f32 %v5636_v24, %v5525_v40  ;;  %v10257_v24 = vsub.s32 0, %v10526_v28 }
 0x2e9   :  { %v5638_v23 = vpop.f32.mrf.mxu1  ;;  %v5725_v51 = vpop.f32.mrf.mxu0 }
 0x2ea   :  { %v5639_v21 = vadd.f32 %v5638_v23, %v5527_v15  ;;  %v5726_v41 = vadd.f32 %v5725_v51, %v5637_v33 }
 0x2eb   :  { %v5727_v2 = vpop.f32.mrf.mxu0 }
 0x2ec   :  { %v5728_v39 = vadd.f32 %v5727_v2, %v5639_v21  ;;  %v10266_v2 = vsub.s32 6, %v10526_v28 }
 0x2f1   :  { %v5807_v20 = vpop.f32.mrf.mxu1 }
 0x2f2   :  { %v5808_v31 = vadd.f32 %v5807_v20, %v5726_v41  ;;  %v10263_v20 = vsub.s32 4, %v10526_v28 }
 0x2f3   :  { %v5809_v3 = vpop.f32.mrf.mxu1  ;;  %v5903_v22 = vpop.f32.mrf.mxu0 }
 0x2f4   :  { %v5810_v10 = vadd.f32 %v5809_v3, %v5728_v39  ;;  %v5904_v13 = vadd.f32 %v5903_v22, %v5808_v31 }
 0x2f5   :  { %v5905_v27 = vpop.f32.mrf.mxu0 }
 0x2f6   :  { %v5906_v30 = vadd.f32 %v5905_v27, %v5810_v10 }
 0x2fa   :  { %v5983_v57 = vpop.f32.mrf.mxu1 }
 0x2fb   :  { %v5984_v55 = vadd.f32 %v5983_v57, %v5904_v13 }
 0x2fc   :  { %v5985_v19 = vpop.f32.mrf.mxu1 }
 0x2fd   :  { %v5986_v62 = vadd.f32 %v5985_v19, %v5906_v30 }
 0x2ff   :  { %v7655_v17 = vcombine.low %v5984_v55, %v5986_v62 }
 0x301   :  { %v7663_v16 = vrot.slane %v7655_v17, %v10525_v6 }
 0x313   :  { %v6067_v46 = vpop.f32.mrf.mxu0 }
 0x314   :  { %v6068_v25 = vadd.f32 %v6067_v46, %v10240_v34 }
 0x315   :  { %v6069_v58 = vpop.f32.mrf.mxu0 }
 0x316   :  { %v6070_v59 = vadd.f32 %v6069_v58, %v10240_v34 }
 0x31b   :  { %v6179_v54 = vpop.f32.mrf.mxu1 }
 0x31c   :  { %v6180_v14 = vadd.f32 %v6179_v54, %v6068_v25 }
 0x31d   :  { %v6181_v48 = vpop.f32.mrf.mxu1  ;;  %v6268_v49 = vpop.f32.mrf.mxu0 }
 0x31e   :  { %v6182_v9 = vadd.f32 %v6181_v48, %v6070_v59  ;;  %v6269_v32 = vadd.f32 %v6268_v49, %v6180_v14 }
 0x31f   :  { %v6270_v5 = vpop.f32.mrf.mxu0 }
 0x320   :  { %v6271_v56 = vadd.f32 %v6270_v5, %v6182_v9 }
 0x325   :  { %v6350_v18 = vpop.f32.mrf.mxu1 }
 0x326   :  { %v6351_v11 = vadd.f32 %v6350_v18, %v6269_v32 }
 0x327   :  { %v6352_v37 = vpop.f32.mrf.mxu1  ;;  %v6446_v38 = vpop.f32.mrf.mxu0 }
 0x328   :  { %v6353_v29 = vadd.f32 %v6352_v37, %v6271_v56  ;;  %v6447_v36 = vadd.f32 %v6446_v38, %v6351_v11 }
 0x329   :  { %v6448_v47 = vpop.f32.mrf.mxu0 }
 0x32a   :  { %v6449_v61 = vadd.f32 %v6448_v47, %v6353_v29 }
 0x32e   :  { %v6526_v8 = vpop.f32.mrf.mxu1 }
 0x32f   :  { %v6527_v7 = vadd.f32 %v6526_v8, %v6447_v36 }
 0x330   :  { %v6528_v42 = vpop.f32.mrf.mxu1 }
 0x331   :  { %v6529_v12 = vadd.f32 %v6528_v42, %v6449_v61 }
 0x333   :  { %v7656_v26 = vcombine.low %v6527_v7, %v6529_v12 }
 0x335   :  { %v7670_v44 = vrot.slane %v7656_v26, %v10525_v6 }
 0x337   :  { %v7671_v23 = vcombine.low %v7663_v16, %v7670_v44  ;;  %v7709_v51 = vcombine.high %v7663_v16, %v7670_v44 }
 0x339   :  { %v7691_v3 = vsel %vm7631_vm8, %v7884_v1, %v7671_v23  ;;  %v7886_v22 = vrot.slane %v7671_v23, 9  ;;  %v7713_v57 = vsel %vm7631_vm8, %v7888_v60, %v7709_v51  ;;  %v7900_v1 = vld [vmem:[%s10336_s0 + $0x8] sm:$0xff] }
 0x33a   :  { %v7720_v27 = vrot.slane %v7691_v3, %v10257_v24  ;;  %v7724_v46 = vrot.slane %v7691_v3, %v10260_v53  ;;  %v7728_v54 = vrot.slane %v7691_v3, %v10263_v20  ;;  %v7732_v15 = vrot.slane %v7691_v3, %v10266_v2 }
 0x33b   :  { %v7699_v19 = vsel %vm7631_vm8, 0.0, %v7886_v22  ;;  %v7804_v49 = vrot.slane %v7713_v57, %v10257_v24  ;;  %v7808_v33 = vrot.slane %v7713_v57, %v10260_v53  ;;  %v7812_v25 = vrot.slane %v7713_v57, %v10263_v20 }
 0x33c   :  { %v7762_v58 = vrot.slane %v7699_v19, %v10257_v24  ;;  %v7766_v40 = vrot.slane %v7699_v19, %v10260_v53  ;;  %v7770_v21 = vrot.slane %v7699_v19, %v10263_v20  ;;  %v7774_v48 = vrot.slane %v7699_v19, %v10266_v2 }
 0x33d   :  { %v7816_v59 = vrot.slane %v7713_v57, %v10266_v2  ;;  %vm7618_vm10 = vcmp.le.f32.partialorder %v7900_v1, 0.0  ;;  %vm7620_vm11 = vcmp.ge.f32.partialorder %v7900_v1, 1.0  ;;  %vm7634_vm13 = vcmp.lt.f32.partialorder %v7900_v1, 0.5 }
 0x33e   :  { %v7842_v52 = vsel %vm7841_vm9, %v7720_v27, %v7762_v58  ;;  %v7843_v39 = vsel %vm7841_vm9, %v7724_v46, %v7766_v40  ;;  %v7844_v14 = vsel %vm7841_vm9, %v7728_v54, %v7770_v21  ;;  %v7845_v9 = vsel %vm7841_vm9, %v7732_v15, %v7774_v48  ;;  %vm7622_vm12 = vmor %vm7618_vm10, %vm7620_vm11 }
 0x33f   :  { %v7850_v18 = vsel %vm105_vm1, %v7842_v52, %v7804_v49  ;;  %v7851_v5 = vsel %vm105_vm1, %v7843_v39, %v7808_v33  ;;  %v7852_v41 = vsel %vm105_vm1, %v7844_v14, %v7812_v25  ;;  %v7853_v10 = vsel %vm105_vm1, %v7845_v9, %v7816_v59 }
 0x340   :  { %v7866_v37 = vcombine.low %v7850_v18, %v7851_v5  ;;  %v7867_v38 = vcombine.low %v7852_v41, %v7853_v10  ;;  %v7624_v54 = vsel %vm7622_vm12, 1, %v10524_v43  ;;  %v7636_v41 = vsel %vm7634_vm13, 1.0, %v7904_v50 }
 0x341   :  { %v7883_v33 = vrot.slane %v7624_v54, 9  ;;  %v7638_v43 = vsel %vm7634_vm13, 2.5, %v7905_v63 }
 0x342   :  { %7874 = vst [vmem:[%s10341_s7] sm:$0x77] %v7866_v37  ;;  %7875 = vst [vmem:[%s10341_s7 + $0x8] sm:$0x77] %v7867_v38  ;;  %v7885_v38 = vrot.slane %v7636_v41, 9 }
 0x343   :  { %vm7630_vm14 = vcmp.ne.s32.totalorder %v7883_v33, 0 }
 0x344   :  { %vm7632_vm15 = vmor %vm7618_vm10, %vm7630_vm14 }
 0x346   :  { %v6610_v31 = vpop.f32.mrf.mxu0 }
 0x347   :  { %v6611_v17 = vadd.f32 %v6610_v31, %v10240_v34 }
 0x348   :  { %v6612_v56 = vpop.f32.mrf.mxu0 }
 0x349   :  { %v6613_v61 = vadd.f32 %v6612_v56, %v10240_v34 }
 0x34e   :  { %v6722_v32 = vpop.f32.mrf.mxu1 }
 0x34f   :  { %v6723_v4 = vadd.f32 %v6722_v32, %v6611_v17  ;;  %v7889_v32 = vrot.slane %v7638_v43, 9 }
 0x350   :  { %v6724_v0 = vpop.f32.mrf.mxu1  ;;  %v6811_v30 = vpop.f32.mrf.mxu0 }
 0x351   :  { %v6725_v7 = vadd.f32 %v6724_v0, %v6613_v61  ;;  %v6812_v3 = vadd.f32 %v6811_v30, %v6723_v4 }
 0x352   :  { %v6813_v29 = vpop.f32.mrf.mxu0 }
 0x353   :  { %v6814_v44 = vadd.f32 %v6813_v29, %v6725_v7 }
 0x358   :  { %v6893_v11 = vpop.f32.mrf.mxu1 }
 0x359   :  { %v6894_v19 = vadd.f32 %v6893_v11, %v6812_v3 }
 0x35a   :  { %v6895_v47 = vpop.f32.mrf.mxu1  ;;  %v6989_v13 = vpop.f32.mrf.mxu0 }
 0x35b   :  { %v6896_v22 = vadd.f32 %v6895_v47, %v6814_v44  ;;  %v6990_v48 = vadd.f32 %v6989_v13, %v6894_v19 }
 0x35c   :  { %v6991_v35 = vpop.f32.mrf.mxu0 }
 0x35d   :  { %v6992_v15 = vadd.f32 %v6991_v35, %v6896_v22 }
 0x361   :  { %v7069_v62 = vpop.f32.mrf.mxu1 }
 0x362   :  { %v7070_v59 = vadd.f32 %v7069_v62, %v6990_v48 }
 0x363   :  { %v7071_v8 = vpop.f32.mrf.mxu1 }
 0x364   :  { %v7072_v49 = vadd.f32 %v7071_v8, %v6992_v15 }
 0x366   :  { %v7672_v9 = vcombine.low %v7070_v59, %v7072_v49 }
 0x368   :  { %v7680_v37 = vrot.slane %v7672_v9, %v10525_v6 }
 0x379   :  { %v7153_v55 = vpop.f32.mrf.mxu0 }
 0x37a   :  { %v7154_v26 = vadd.f32 %v7153_v55, %v10240_v34 }
 0x37b   :  { %v7155_v42 = vpop.f32.mrf.mxu0 }
 0x37c   :  { %v7156_v16 = vadd.f32 %v7155_v42, %v10240_v34 }
 0x381   :  { %v7265_v36 = vpop.f32.mrf.mxu1 }
 0x382   :  { %v7266_v60 = vadd.f32 %v7265_v36, %v7154_v26 }
 0x383   :  { %v7267_v12 = vpop.f32.mrf.mxu1  ;;  %v7354_v45 = vpop.f32.mrf.mxu0 }
 0x384   :  { %v7268_v28 = vadd.f32 %v7267_v12, %v7156_v16  ;;  %v7355_v46 = vadd.f32 %v7354_v45, %v7266_v60 }
 0x385   :  { %v7356_v51 = vpop.f32.mrf.mxu0 }
 0x386   :  { %v7357_v34 = vadd.f32 %v7356_v51, %v7268_v28 }
 0x38b   :  { %v7436_v23 = vpop.f32.mrf.mxu1 }
 0x38c   :  { %v7437_v58 = vadd.f32 %v7436_v23, %v7355_v46 }
 0x38d   :  { %v7438_v57 = vpop.f32.mrf.mxu1  ;;  %v7532_v27 = vpop.f32.mrf.mxu0 }
 0x38e   :  { %v7439_v40 = vadd.f32 %v7438_v57, %v7357_v34  ;;  %v7533_v52 = vadd.f32 %v7532_v27, %v7437_v58 }
 0x38f   :  { %v7534_v21 = vpop.f32.mrf.mxu0 }
 0x390   :  { %v7535_v39 = vadd.f32 %v7534_v21, %v7439_v40 }
 0x394   :  { %v7612_v25 = vpop.f32.mrf.mxu1 }
 0x395   :  { %v7613_v18 = vadd.f32 %v7612_v25, %v7533_v52 }
 0x396   :  { %v7614_v14 = vpop.f32.mrf.mxu1 }
 0x397   :  { %v7615_v5 = vadd.f32 %v7614_v14, %v7535_v39 }
 0x399   :  { %v7673_v10 = vcombine.low %v7613_v18, %v7615_v5 }
 0x39b   :  { %v7687_v31 = vrot.slane %v7673_v10, %v10525_v6 }
 0x39d   :  { %v7688_v56 = vcombine.low %v7680_v37, %v7687_v31  ;;  %v7710_v0 = vcombine.high %v7680_v37, %v7687_v31 }
 0x39f   :  { %v7692_v30 = vsel %vm7632_vm15, %v7885_v38, %v7688_v56  ;;  %v7887_v11 = vrot.slane %v7688_v56, 9  ;;  %v7714_v29 = vsel %vm7632_vm15, %v7889_v32, %v7710_v0 }
 0x3a0   :  { %v7736_v47 = vrot.slane %v7692_v30, %v10257_v24  ;;  %v7740_v13 = vrot.slane %v7692_v30, %v10260_v53  ;;  %v7744_v63 = vrot.slane %v7692_v30, %v10263_v20  ;;  %v7748_v62 = vrot.slane %v7692_v30, %v10266_v2 }
 0x3a1   :  { %v7700_v50 = vsel %vm7632_vm15, 0.0, %v7887_v11  ;;  %v7820_v36 = vrot.slane %v7714_v29, %v10257_v24  ;;  %v7824_v61 = vrot.slane %v7714_v29, %v10260_v53  ;;  %v7828_v42 = vrot.slane %v7714_v29, %v10263_v20 }
 0x3a2   :  { %v7778_v35 = vrot.slane %v7700_v50, %v10257_v24  ;;  %v7782_v6 = vrot.slane %v7700_v50, %v10260_v53  ;;  %v7786_v8 = vrot.slane %v7700_v50, %v10263_v20  ;;  %v7790_v55 = vrot.slane %v7700_v50, %v10266_v2 }
 0x3a3   :  { %v7832_v17 = vrot.slane %v7714_v29, %v10266_v2 }
 0x3a4   :  { %v7846_v7 = vsel %vm7841_vm9, %v7736_v47, %v7778_v35  ;;  %v7847_v12 = vsel %vm7841_vm9, %v7740_v13, %v7782_v6  ;;  %v7848_v45 = vsel %vm7841_vm9, %v7744_v63, %v7786_v8  ;;  %v7849_v4 = vsel %vm7841_vm9, %v7748_v62, %v7790_v55 }
 0x3a5   :  { %v7854_v26 = vsel %vm105_vm1, %v7846_v7, %v7820_v36  ;;  %v7855_v16 = vsel %vm105_vm1, %v7847_v12, %v7824_v61  ;;  %v7856_v24 = vsel %vm105_vm1, %v7848_v45, %v7828_v42  ;;  %v7857_v53 = vsel %vm105_vm1, %v7849_v4, %v7832_v17 }
 0x3a6   :  { %v7868_v1 = vcombine.low %v7854_v26, %v7855_v16  ;;  %v7869_v20 = vcombine.low %v7856_v24, %v7857_v53 }
 0x3a8   :  { %7876 = vst [vmem:[%s10341_s7 + $0x10] sm:$0x77] %v7868_v1  ;;  %7877 = vst [vmem:[%s10341_s7 + $0x18] sm:$0x77] %v7869_v20 }

</bundles_post_ra>
